<compile_context>
chip_gen: v7x
topology: tpu7x:2x2x1
jax: 0.10.0
libtpu: 0.0.40
codegen_flags: <defaults>
</compile_context>

<pallas_src>
import math

import jax
import jax.numpy as jnp
from jax.experimental import pallas as pl
from jax.experimental.pallas import tpu as pltpu

NEG_INF = -1e30  # finite stand-in for float('-inf'); keeps softmax NaN-free

PARAM_NAMES = [
    "s_wqkv", "s_bqkv", "s_wo", "s_bo", "g1", "bt1",
    "c_wq", "c_bq", "c_wkv", "c_bkv", "c_wo", "c_bo", "g2", "bt2",
    "w1", "b1", "w2", "b2", "g3", "bt3",
]


def make_decoder_kernel(nhead, eps, matmul_dtype):
    mm = matmul_dtype

    def kernel(x_ref, mem_ref, kpm_ref, amask_ref,
               swqkv, sbqkv, swo, sbo, g1, bt1,
               cwq, cbq, cwkv, cbkv, cwo, cbo, g2, bt2,
               w1, b1, w2, b2, g3, bt3,
               tgt_ref, attn_ref, ctx_sc, probs_sc):
        Bb, T, D = x_ref.shape
        S = mem_ref.shape[1]
        hd = D // nhead

        # Flatten the batch block into a (Bb*T, D) row slab: fills sublanes and
        # gives the MXU a real M dimension for every projection / FFN matmul.
        x2 = x_ref[...].reshape(Bb * T, D)
        m2 = mem_ref[...].reshape(Bb * S, D)

        def layer_norm(y, g_ref, b_ref):
            mu = jnp.mean(y, axis=-1, keepdims=True)
            var = jnp.mean((y - mu) ** 2, axis=-1, keepdims=True)
            return (y - mu) * jax.lax.rsqrt(var + eps) * g_ref[...] + b_ref[...]

        def mm_bias(a2d, w_ref, b_ref):
            # Weights are already in `mm` dtype (host pre-cast); only activations
            # are cast here.  Accumulation stays f32; biases stay f32.
            return jnp.dot(a2d.astype(mm), w_ref[...],
                           preferred_element_type=jnp.float32) + b_ref[...]

        def scores(qh, kh):
            # TODO(synk): check the Mosaic dump for a per-head K vxpose here; if
            # present, produce K once in (Bb, hd, n_k) layout instead of nhead
            # per-head XLU transposes per grid step.
            return jnp.einsum("bqd,bkd->bqk", qh.astype(mm), kh.astype(mm),
                              preferred_element_type=jnp.float32)

        def context(ph, vh):
            return jnp.einsum("bqk,bkd->bqd", ph.astype(mm), vh.astype(mm),
                              preferred_element_type=jnp.float32)

        # Self-attention additive bias built in-kernel from the shared (T, T)
        # attn_mask and the per-batch (Bb, 1, T) key-padding bias.  Keep in f32:
        # the two -1e30 terms can stack to -2e30.
        bias_sa = amask_ref[...][None, :, :] + kpm_ref[...]

        # --- self-attention (fused QKV projection) + add & norm (dropout1 = id) ---
        qkv = mm_bias(x2, swqkv, sbqkv)                       # (Bb*T, 3D), f32
        qf = qkv[:, 0 * D:1 * D].reshape(Bb, T, D)            # scale already folded in
        kf = qkv[:, 1 * D:2 * D].reshape(Bb, T, D)
        vf = qkv[:, 2 * D:3 * D].reshape(Bb, T, D)
        for h in range(nhead):
            lo = h * hd
            s = scores(qf[:, :, lo:lo + hd], kf[:, :, lo:lo + hd]) + bias_sa
            s = s - jnp.max(s, axis=-1, keepdims=True)
            e = jnp.exp(s)
            # internal-only softmax: approximate reciprocal (EUP slot) is fine
            ph = e * pl.reciprocal(jnp.sum(e, axis=-1, keepdims=True), approx=True)
            ctx_sc[:, lo:lo + hd] = context(ph, vf[:, :, lo:lo + hd]).reshape(Bb * T, hd)
        sa_out = jnp.dot(ctx_sc[...].astype(mm), swo[...],
                         preferred_element_type=jnp.float32) + sbo[...]
        t1 = layer_norm(x2 + sa_out, g1, bt1)

        # --- cross-attention (fused KV projection, no masks) + add & norm ---
        qf = mm_bias(t1, cwq, cbq).reshape(Bb, T, D)
        kv = mm_bias(m2, cwkv, cbkv)                          # (Bb*S, 2D), f32
        kf = kv[:, 0 * D:1 * D].reshape(Bb, S, D)
        vf = kv[:, 1 * D:2 * D].reshape(Bb, S, D)
        for h in range(nhead):
            lo = h * hd
            s = scores(qf[:, :, lo:lo + hd], kf[:, :, lo:lo + hd])
            s = s - jnp.max(s, axis=-1, keepdims=True)
            e = jnp.exp(s)
            # exact divide: these probabilities are a user-visible output
            ph = e / jnp.sum(e, axis=-1, keepdims=True)
            if h == 0:
                probs_sc[...] = ph
            else:
                probs_sc[...] += ph
            ctx_sc[:, lo:lo + hd] = context(ph, vf[:, :, lo:lo + hd]).reshape(Bb * T, hd)
        ca_out = jnp.dot(ctx_sc[...].astype(mm), cwo[...],
                         preferred_element_type=jnp.float32) + cbo[...]
        t2 = layer_norm(t1 + ca_out, g2, bt2)

        # --- feed-forward (relu) + add & norm (dropout3/4 = identity) ---
        hdn = jnp.maximum(mm_bias(t2, w1, b1), 0.0)
        ff = jnp.dot(hdn.astype(mm), w2[...],
                     preferred_element_type=jnp.float32) + b2[...]
        t3 = layer_norm(t2 + ff, g3, bt3)

        tgt_ref[...] = t3.reshape(Bb, T, D).astype(tgt_ref.dtype)
        attn_ref[...] = (probs_sc[...] * (1.0 / nhead)).astype(attn_ref.dtype)

    return kernel


def _prepare_params(params, nhead, d_model, matmul_dtype):
    """Fold the attention scale into Q, fuse QKV / KV weights, pre-cast to mm dtype."""
    hd = d_model // nhead
    scale = 1.0 / math.sqrt(hd)
    wdt, f32 = matmul_dtype, jnp.float32
    p = {
        "s_wqkv": jnp.concatenate(
            [params["s_wq"] * scale, params["s_wk"], params["s_wv"]], axis=1).astype(wdt),
        "s_bqkv": jnp.concatenate(
            [params["s_bq"] * scale, params["s_bk"], params["s_bv"]], axis=1).astype(f32),
        "s_wo": params["s_wo"].astype(wdt), "s_bo": params["s_bo"].astype(f32),
        "g1": params["g1"].astype(f32), "bt1": params["bt1"].astype(f32),
        "c_wq": (params["c_wq"] * scale).astype(wdt),
        "c_bq": (params["c_bq"] * scale).astype(f32),
        "c_wkv": jnp.concatenate([params["c_wk"], params["c_wv"]], axis=1).astype(wdt),
        "c_bkv": jnp.concatenate([params["c_bk"], params["c_bv"]], axis=1).astype(f32),
        "c_wo": params["c_wo"].astype(wdt), "c_bo": params["c_bo"].astype(f32),
        "g2": params["g2"].astype(f32), "bt2": params["bt2"].astype(f32),
        "w1": params["w1"].astype(wdt), "b1": params["b1"].astype(f32),
        "w2": params["w2"].astype(wdt), "b2": params["b2"].astype(f32),
        "g3": params["g3"].astype(f32), "bt3": params["bt3"].astype(f32),
    }
    return [p[n] for n in PARAM_NAMES]


def _pick_block_b(B, T, S, D, DFF, weight_bytes, vmem_budget, mem_eb, attn_eb):
    """VMEM- and pipelining-aware batch block: largest divisor of B that fits the
    byte model and still leaves >= 2 grid steps (DMA pipelining / v7x dual-TC)."""
    def act_bytes(bb):
        per_elt = (2 * T * D * 4            # x input block (double-buffered)
                   + 2 * S * D * mem_eb     # feature-map input block
                   + 2 * T * 4              # key-padding bias block
                   + 2 * T * D * 4          # tgt output block
                   + 2 * T * S * attn_eb    # attn output block
                   + T * D * 4              # ctx scratch
                   + T * S * 4              # probs scratch
                   + T * DFF * 4            # FFN hidden live value
                   + 3 * (T + S) * D * 4)   # fused q/k/v projection live values
        return bb * per_elt * 2              # 2x headroom for remaining temporaries
    best = 1
    for cand in range(1, B + 1):
        if B % cand:
            continue
        if B > 1 and B // cand < 2:
            continue
        if weight_bytes + act_bytes(cand) <= vmem_budget:
            best = max(best, cand)
    return best


def decoder_edit_pallas(predicts_embed, feature_map, key_padding_mask, attn_mask,
                        params, nhead, eps=1e-5, block_b=None,
                        matmul_dtype=jnp.bfloat16, attn_dtype=jnp.float32,
                        single_buffer_weights=True,
                        enforce_production_layout=False):
    B, T, D = predicts_embed.shape
    S = feature_map.shape[1]
    assert D % nhead == 0, "d_model must be divisible by nhead"
    DFF = params["w1"].shape[1]

    if enforce_production_layout:
        # lane-dense outputs / tile-aligned slabs: the single biggest store-side lever
        assert D % 128 == 0 and DFF % 128 == 0 and S % 128 == 0 and T % 8 == 0, (
            "production deployments need D/DFF/S multiples of 128 and T multiple of 8")

    # Tiny per-batch additive key-padding bias (B, 1, T) instead of a (B, T, T)
    # float mask in HBM; the shared (T, T) attn_mask is passed once.
    kpm_add = jnp.where(key_padding_mask, NEG_INF, 0.0).astype(jnp.float32)[:, None, :]
    amask = attn_mask.astype(jnp.float32)
    # feature_map is only consumed through the matmul path -> host-side cast
    # halves its per-step DMA and VMEM footprint in the bf16 configuration.
    mem_in = feature_map.astype(matmul_dtype)

    param_list = _prepare_params(params, nhead, D, matmul_dtype)
    weight_bytes = sum(int(p.size) * p.dtype.itemsize for p in param_list)

    # VMEM budget ~75% of physical capacity: ~48 MiB on v7x, ~96 MiB on v5e/v6e.
    try:
        vmem_cap = int(pltpu.get_tpu_info().vmem_capacity_bytes)
    except Exception:
        vmem_cap = 64 * 1024 * 1024
    vmem_limit = min(int(0.75 * vmem_cap), 112 * 1024 * 1024)

    mem_eb = jnp.dtype(matmul_dtype).itemsize
    attn_eb = jnp.dtype(attn_dtype).itemsize
    if block_b is None:
        block_b = _pick_block_b(B, T, S, D, DFF, weight_bytes,
                                int(0.7 * vmem_limit), mem_eb, attn_eb)
    assert B % block_b == 0, "block_b must divide the batch size"
    num_blocks = B // block_b

    cost = pl.CostEstimate(
        flops=int(2 * B * (T * D * 3 * D          # self fused QKV
                           + 2 * T * T * D        # self scores + context
                           + T * D * D            # self out proj
                           + T * D * D            # cross Q
                           + S * D * 2 * D        # cross fused KV
                           + 2 * T * S * D        # cross scores + context
                           + T * D * D            # cross out proj
                           + 2 * T * D * DFF)),   # FFN
        transcendentals=int(B * (T * T + T * S)),
        bytes_accessed=int(predicts_embed.size * 4 + mem_in.size * mem_eb
                           + kpm_add.size * 4 + amask.size * 4 + weight_bytes
                           + B * T * D * 4 + B * T * S * attn_eb),
    )

    kernel = make_decoder_kernel(nhead, eps, matmul_dtype)
    out_shape = (jax.ShapeDtypeStruct((B, T, D), jnp.float32),
                 jax.ShapeDtypeStruct((B, T, S), attn_dtype))
    out_specs = (pl.BlockSpec((block_b, T, D), lambda b: (b, 0, 0)),
                 pl.BlockSpec((block_b, T, S), lambda b: (b, 0, 0)))
    scratch_shapes = [pltpu.VMEM((block_b * T, D), jnp.float32),   # per-head contexts
                      pltpu.VMEM((block_b, T, S), jnp.float32)]    # probs accumulator

    def build(weight_pipeline_mode):
        def wspec(shape):
            if weight_pipeline_mode is None:
                return pl.BlockSpec(tuple(shape), lambda b: (0, 0))
            # Constant index_map -> single-buffer the weight block (halves weight VMEM).
            return pl.BlockSpec(tuple(shape), lambda b: (0, 0),
                                pipeline_mode=weight_pipeline_mode)
        in_specs = [
            pl.BlockSpec((block_b, T, D), lambda b: (b, 0, 0)),   # predicts_embed
            pl.BlockSpec((block_b, S, D), lambda b: (b, 0, 0)),   # feature_map (mm dtype)
            pl.BlockSpec((block_b, 1, T), lambda b: (b, 0, 0)),   # key-padding bias
            pl.BlockSpec((T, T), lambda b: (0, 0)),               # shared attn_mask
        ] + [wspec(p.shape) for p in param_list]
        return pl.pallas_call(
            kernel,
            grid=(num_blocks,),
            in_specs=in_specs,
            out_specs=out_specs,
            out_shape=out_shape,
            scratch_shapes=scratch_shapes,
            cost_estimate=cost,
            compiler_params=pltpu.CompilerParams(
                dimension_semantics=("parallel",),
                vmem_limit_bytes=vmem_limit,
            ),
        )

    args = (predicts_embed, mem_in, kpm_add, amask, *param_list)
    if single_buffer_weights:
        try:
            return build(pl.Buffered(1))(*args)
        except Exception:
            pass  # fall back to default double-buffered weight blocks
    return build(None)(*args)


def init_params(key, d_model, nhead, dim_feedforward):
    std = 0.05
    keys = iter(jax.random.split(key, 32))

    def nrm(shape):
        return (jax.random.normal(next(keys), shape) * std).astype(jnp.float32)

    p = {}
    for pre in ("s_", "c_"):            # self- / cross-attention, (D, D) weights
        p[pre + "wq"], p[pre + "wk"], p[pre + "wv"], p[pre + "wo"] = (
            nrm((d_model, d_model)) for _ in range(4))
        p[pre + "bq"], p[pre + "bk"], p[pre + "bv"], p[pre + "bo"] = (
            nrm((1, d_model)) for _ in range(4))
    for g, b in (("g1", "bt1"), ("g2", "bt2"), ("g3", "bt3")):
        p[g] = 1.0 + nrm((1, d_model))
        p[b] = nrm((1, d_model))
    p["w1"] = nrm((d_model, dim_feedforward))
    p["b1"] = nrm((1, dim_feedforward))
    p["w2"] = nrm((dim_feedforward, d_model))
    p["b2"] = nrm((1, d_model))
    return p


def decoder_edit_reference(predicts_embed, feature_map, key_padding_mask, attn_mask,
                           params, nhead, eps=1e-5):
    """Plain-JAX f32 reference mirroring nn.MultiheadAttention / LayerNorm (eval mode)."""
    D = predicts_embed.shape[-1]
    hd = D // nhead
    kpm_add = jnp.where(key_padding_mask, NEG_INF, 0.0).astype(jnp.float32)  # (B, T)

    def ln(y, g, b):
        mu = y.mean(-1, keepdims=True)
        var = ((y - mu) ** 2).mean(-1, keepdims=True)
        return (y - mu) / jnp.sqrt(var + eps) * g + b

    def mha(qin, kvin, pre, bias):
        wq, bq = params[pre + "wq"], params[pre + "bq"]
        wk, bk = params[pre + "wk"], params[pre + "bk"]
        wv, bv = params[pre + "wv"], params[pre + "bv"]
        wo, bo = params[pre + "wo"], params[pre + "bo"]
        tq, tk = qin.shape[0], kvin.shape[0]
        q = (qin @ wq + bq).reshape(tq, nhead, hd).transpose(1, 0, 2)
        k = (kvin @ wk + bk).reshape(tk, nhead, hd).transpose(1, 0, 2)
        v = (kvin @ wv + bv).reshape(tk, nhead, hd).transpose(1, 0, 2)
        s = jnp.einsum("htd,hsd->hts", q, k) / math.sqrt(hd)
        if bias is not None:
            s = s + bias[None]
        p = jax.nn.softmax(s, axis=-1)
        ctx = jnp.einsum("hts,hsd->htd", p, v).transpose(1, 0, 2).reshape(tq, D)
        return ctx @ wo + bo, p.mean(0)

    def one(x, mem, kpm_row):
        bias = attn_mask.astype(jnp.float32) + kpm_row[None, :]
        sa, _ = mha(x, x, "s_", bias)
        t1 = ln(x + sa, params["g1"], params["bt1"])
        ca, attn2 = mha(t1, mem, "c_", None)
        t2 = ln(t1 + ca, params["g2"], params["bt2"])
        ff = jnp.maximum(t2 @ params["w1"] + params["b1"], 0.0) @ params["w2"] + params["b2"]
        t3 = ln(t2 + ff, params["g3"], params["bt3"])
        return t3, attn2

    return jax.vmap(one, in_axes=(0, 0, 0))(predicts_embed, feature_map, kpm_add)


if __name__ == "__main__":
    B, T, S = 2, 8, 16          # batch, target length, memory (feature map) length
    D, H, DFF = 32, 4, 64       # d_model, nhead, dim_feedforward (small synthetic sizes)

    root = jax.random.PRNGKey(0)
    k_x, k_f, k_p = jax.random.split(root, 3)

    predicts_embed = jax.random.normal(k_x, (B, T, D), jnp.float32)
    feature_map = jax.random.normal(k_f, (B, S, D), jnp.float32)

    # key_padding_mask: True = padded/ignored key position (batch 1 has 2 padded slots).
    lengths = jnp.array([T, T - 2])
    key_padding_mask = jnp.arange(T)[None, :] >= lengths[:, None]
    # attn_mask: additive float causal mask (T, T).
    attn_mask = jnp.where(jnp.triu(jnp.ones((T, T), bool), k=1), NEG_INF, 0.0).astype(jnp.float32)

    params = init_params(k_p, D, H, DFF)

    tgt_ref, attn_ref = decoder_edit_reference(predicts_embed, feature_map,
                                               key_padding_mask, attn_mask, params, nhead=H)

    # Strict numerics check: f32 matmul inputs.
    tgt32, attn32 = decoder_edit_pallas(predicts_embed, feature_map, key_padding_mask,
                                        attn_mask, params, nhead=H,
                                        matmul_dtype=jnp.float32)
    jax.block_until_ready((tgt32, attn32))
    assert tgt32.shape == (B, T, D) and attn32.shape == (B, T, S)
    assert jnp.allclose(tgt32, tgt_ref, atol=2e-3, rtol=2e-3), "tgt mismatch (f32)"
    assert jnp.allclose(attn32, attn_ref, atol=2e-3, rtol=2e-3), "attn mismatch (f32)"

    # Production configuration: bf16 weights/feature_map/matmul inputs, f32 accumulation.
    tgt16, attn16 = decoder_edit_pallas(predicts_embed, feature_map, key_padding_mask,
                                        attn_mask, params, nhead=H,
                                        matmul_dtype=jnp.bfloat16)
    jax.block_until_ready((tgt16, attn16))
    assert jnp.allclose(tgt16, tgt_ref, atol=5e-2, rtol=5e-2), "tgt mismatch (bf16)"
    assert jnp.allclose(attn16, attn_ref, atol=5e-2, rtol=5e-2), "attn mismatch (bf16)"

    # NOTE: for fully-masked query rows (padded positions), softmax becomes uniform
    # (finite NEG_INF) instead of PyTorch's NaN behaviour; mask those rows downstream.
    print("KERNEL_OK")
</pallas_src>

<mosaic_0001>
module attributes {stable_mosaic.version = 11 : i64} {
  func.func @kernel(%arg0: i32, %arg1: memref<1x8x32xf32, #tpu.memory_space<vmem>>, %arg2: memref<1x16x32xf32, #tpu.memory_space<vmem>>, %arg3: memref<1x1x8xf32, #tpu.memory_space<vmem>>, %arg4: memref<8x8xf32, #tpu.memory_space<vmem>>, %arg5: memref<32x96xf32, #tpu.memory_space<vmem>>, %arg6: memref<1x96xf32, #tpu.memory_space<vmem>>, %arg7: memref<32x32xf32, #tpu.memory_space<vmem>>, %arg8: memref<1x32xf32, #tpu.memory_space<vmem>>, %arg9: memref<1x32xf32, #tpu.memory_space<vmem>>, %arg10: memref<1x32xf32, #tpu.memory_space<vmem>>, %arg11: memref<32x32xf32, #tpu.memory_space<vmem>>, %arg12: memref<1x32xf32, #tpu.memory_space<vmem>>, %arg13: memref<32x64xf32, #tpu.memory_space<vmem>>, %arg14: memref<1x64xf32, #tpu.memory_space<vmem>>, %arg15: memref<32x32xf32, #tpu.memory_space<vmem>>, %arg16: memref<1x32xf32, #tpu.memory_space<vmem>>, %arg17: memref<1x32xf32, #tpu.memory_space<vmem>>, %arg18: memref<1x32xf32, #tpu.memory_space<vmem>>, %arg19: memref<32x64xf32, #tpu.memory_space<vmem>>, %arg20: memref<1x64xf32, #tpu.memory_space<vmem>>, %arg21: memref<64x32xf32, #tpu.memory_space<vmem>>, %arg22: memref<1x32xf32, #tpu.memory_space<vmem>>, %arg23: memref<1x32xf32, #tpu.memory_space<vmem>>, %arg24: memref<1x32xf32, #tpu.memory_space<vmem>>, %arg25: memref<1x8x32xf32, #tpu.memory_space<vmem>>, %arg26: memref<1x8x16xf32, #tpu.memory_space<vmem>>, %arg27: memref<8x32xf32, #tpu.memory_space<vmem>>, %arg28: memref<1x8x16xf32, #tpu.memory_space<vmem>>) attributes {dimension_semantics = [#tpu.dimension_semantics<parallel>], iteration_bounds = array<i64: 2>, scalar_prefetch = 0 : i64, scratch_operands = 2 : i64, tpu.core_type = #tpu.core_type<tc>, window_params = [{transform_indices = @transform_0, window_bounds = array<i64: 1, 8, 32>}, {transform_indices = @transform_1, window_bounds = array<i64: 1, 16, 32>}, {transform_indices = @transform_2, window_bounds = array<i64: 1, 1, 8>}, {pipeline_mode = #tpu.pipeline_mode<synchronous>, transform_indices = @transform_3, window_bounds = array<i64: 8, 8>}, {pipeline_mode = #tpu.pipeline_mode<synchronous>, transform_indices = @transform_4, window_bounds = array<i64: 32, 96>}, {pipeline_mode = #tpu.pipeline_mode<synchronous>, transform_indices = @transform_5, window_bounds = array<i64: 1, 96>}, {pipeline_mode = #tpu.pipeline_mode<synchronous>, transform_indices = @transform_6, window_bounds = array<i64: 32, 32>}, {pipeline_mode = #tpu.pipeline_mode<synchronous>, transform_indices = @transform_7, window_bounds = array<i64: 1, 32>}, {pipeline_mode = #tpu.pipeline_mode<synchronous>, transform_indices = @transform_8, window_bounds = array<i64: 1, 32>}, {pipeline_mode = #tpu.pipeline_mode<synchronous>, transform_indices = @transform_9, window_bounds = array<i64: 1, 32>}, {pipeline_mode = #tpu.pipeline_mode<synchronous>, transform_indices = @transform_10, window_bounds = array<i64: 32, 32>}, {pipeline_mode = #tpu.pipeline_mode<synchronous>, transform_indices = @transform_11, window_bounds = array<i64: 1, 32>}, {pipeline_mode = #tpu.pipeline_mode<synchronous>, transform_indices = @transform_12, window_bounds = array<i64: 32, 64>}, {pipeline_mode = #tpu.pipeline_mode<synchronous>, transform_indices = @transform_13, window_bounds = array<i64: 1, 64>}, {pipeline_mode = #tpu.pipeline_mode<synchronous>, transform_indices = @transform_14, window_bounds = array<i64: 32, 32>}, {pipeline_mode = #tpu.pipeline_mode<synchronous>, transform_indices = @transform_15, window_bounds = array<i64: 1, 32>}, {pipeline_mode = #tpu.pipeline_mode<synchronous>, transform_indices = @transform_16, window_bounds = array<i64: 1, 32>}, {pipeline_mode = #tpu.pipeline_mode<synchronous>, transform_indices = @transform_17, window_bounds = array<i64: 1, 32>}, {pipeline_mode = #tpu.pipeline_mode<synchronous>, transform_indices = @transform_18, window_bounds = array<i64: 32, 64>}, {pipeline_mode = #tpu.pipeline_mode<synchronous>, transform_indices = @transform_19, window_bounds = array<i64: 1, 64>}, {pipeline_mode = #tpu.pipeline_mode<synchronous>, transform_indices = @transform_20, window_bounds = array<i64: 64, 32>}, {pipeline_mode = #tpu.pipeline_mode<synchronous>, transform_indices = @transform_21, window_bounds = array<i64: 1, 32>}, {pipeline_mode = #tpu.pipeline_mode<synchronous>, transform_indices = @transform_22, window_bounds = array<i64: 1, 32>}, {pipeline_mode = #tpu.pipeline_mode<synchronous>, transform_indices = @transform_23, window_bounds = array<i64: 1, 32>}, {transform_indices = @transform_24, window_bounds = array<i64: 1, 8, 32>}, {transform_indices = @transform_25, window_bounds = array<i64: 1, 8, 16>}]} {
    %c0 = arith.constant 0 : index
    %c0_0 = arith.constant 0 : index
    %c0_1 = arith.constant 0 : index
    %0 = vector.load %arg1[%c0, %c0_0, %c0_1] : memref<1x8x32xf32, #tpu.memory_space<vmem>>, vector<1x8x32xf32>
    %1 = vector.shape_cast %0 : vector<1x8x32xf32> to vector<8x32xf32>
    %c0_2 = arith.constant 0 : index
    %c0_3 = arith.constant 0 : index
    %c0_4 = arith.constant 0 : index
    %2 = vector.load %arg2[%c0_2, %c0_3, %c0_4] : memref<1x16x32xf32, #tpu.memory_space<vmem>>, vector<1x16x32xf32>
    %3 = vector.shape_cast %2 : vector<1x16x32xf32> to vector<16x32xf32>
    %c0_5 = arith.constant 0 : index
    %c0_6 = arith.constant 0 : index
    %4 = vector.load %arg4[%c0_5, %c0_6] : memref<8x8xf32, #tpu.memory_space<vmem>>, vector<8x8xf32>
    %5 = vector.shape_cast %4 : vector<8x8xf32> to vector<1x8x8xf32>
    %c0_7 = arith.constant 0 : index
    %c0_8 = arith.constant 0 : index
    %c0_9 = arith.constant 0 : index
    %6 = vector.load %arg3[%c0_7, %c0_8, %c0_9] : memref<1x1x8xf32, #tpu.memory_space<vmem>>, vector<1x1x8xf32>
    %7 = vector.broadcast %6 : vector<1x1x8xf32> to vector<1x8x8xf32>
    %8 = arith.addf %5, %7 : vector<1x8x8xf32>
    %c0_10 = arith.constant 0 : index
    %c0_11 = arith.constant 0 : index
    %9 = vector.load %arg5[%c0_10, %c0_11] : memref<32x96xf32, #tpu.memory_space<vmem>>, vector<32x96xf32>
    %cst = arith.constant dense<0.000000e+00> : vector<8x96xf32>
    %10 = tpu.matmul %1, %9, %cst {dimension_numbers = #tpu.dot_dimension_numbers<[1], [0], [0], [1], [0, 0, 1, 1], [], []>} : vector<8x32xf32>, vector<32x96xf32>, vector<8x96xf32> -> vector<8x96xf32>
    %c0_12 = arith.constant 0 : index
    %c0_13 = arith.constant 0 : index
    %11 = vector.load %arg6[%c0_12, %c0_13] : memref<1x96xf32, #tpu.memory_space<vmem>>, vector<1x96xf32>
    %12 = vector.broadcast %11 : vector<1x96xf32> to vector<8x96xf32>
    %13 = arith.addf %10, %12 : vector<8x96xf32>
    %14 = vector.extract_strided_slice %13 {offsets = [0, 0], sizes = [8, 32], strides = [1, 1]} : vector<8x96xf32> to vector<8x32xf32>
    %15 = vector.shape_cast %14 : vector<8x32xf32> to vector<1x8x32xf32>
    %16 = vector.extract_strided_slice %13 {offsets = [0, 32], sizes = [8, 32], strides = [1, 1]} : vector<8x96xf32> to vector<8x32xf32>
    %17 = vector.shape_cast %16 : vector<8x32xf32> to vector<1x8x32xf32>
    %18 = vector.extract_strided_slice %13 {offsets = [0, 64], sizes = [8, 32], strides = [1, 1]} : vector<8x96xf32> to vector<8x32xf32>
    %19 = vector.shape_cast %18 : vector<8x32xf32> to vector<1x8x32xf32>
    %20 = vector.extract_strided_slice %15 {offsets = [0, 0, 0], sizes = [1, 8, 8], strides = [1, 1, 1]} : vector<1x8x32xf32> to vector<1x8x8xf32>
    %21 = vector.extract_strided_slice %17 {offsets = [0, 0, 0], sizes = [1, 8, 8], strides = [1, 1, 1]} : vector<1x8x32xf32> to vector<1x8x8xf32>
    "tpu.trace_start"() <{level = 10 : i32, message = "bqd,bkd->bqk"}> : () -> ()
    %cst_14 = arith.constant dense<0.000000e+00> : vector<1x8x8xf32>
    %22 = tpu.matmul %20, %21, %cst_14 {dimension_numbers = #tpu.dot_dimension_numbers<[2], [2], [1], [1], [0, 0, 0, 1, 1, 1], [0], [0]>} : vector<1x8x8xf32>, vector<1x8x8xf32>, vector<1x8x8xf32> -> vector<1x8x8xf32>
    "tpu.trace_stop"() : () -> ()
    %23 = arith.addf %22, %8 : vector<1x8x8xf32>
    %cst_15 = arith.constant dense<0xFF800000> : vector<1x8xf32>
    %24 = vector.multi_reduction <maximumf>, %23, %cst_15 [2] : vector<1x8x8xf32> to vector<1x8xf32>
    %25 = vector.shape_cast %24 : vector<1x8xf32> to vector<1x8x1xf32>
    %26 = vector.broadcast %25 : vector<1x8x1xf32> to vector<1x8x8xf32>
    %27 = arith.subf %23, %26 : vector<1x8x8xf32>
    %28 = math.exp %27 : vector<1x8x8xf32>
    %cst_16 = arith.constant dense<0.000000e+00> : vector<1x8xf32>
    %29 = vector.multi_reduction <add>, %28, %cst_16 [2] : vector<1x8x8xf32> to vector<1x8xf32>
    %30 = vector.shape_cast %29 : vector<1x8xf32> to vector<1x8x1xf32>
    %31 = tpu.reciprocal %30 {approx = true} : vector<1x8x1xf32> -> vector<1x8x1xf32>
    %32 = vector.broadcast %31 : vector<1x8x1xf32> to vector<1x8x8xf32>
    %33 = arith.mulf %28, %32 : vector<1x8x8xf32>
    %34 = vector.extract_strided_slice %19 {offsets = [0, 0, 0], sizes = [1, 8, 8], strides = [1, 1, 1]} : vector<1x8x32xf32> to vector<1x8x8xf32>
    "tpu.trace_start"() <{level = 10 : i32, message = "bqk,bkd->bqd"}> : () -> ()
    %cst_17 = arith.constant dense<0.000000e+00> : vector<1x8x8xf32>
    %35 = tpu.matmul %33, %34, %cst_17 {dimension_numbers = #tpu.dot_dimension_numbers<[2], [1], [1], [2], [0, 0, 0, 1, 1, 2], [0], [0]>} : vector<1x8x8xf32>, vector<1x8x8xf32>, vector<1x8x8xf32> -> vector<1x8x8xf32>
    "tpu.trace_stop"() : () -> ()
    %36 = vector.shape_cast %35 : vector<1x8x8xf32> to vector<8x8xf32>
    %c0_18 = arith.constant 0 : index
    %c0_19 = arith.constant 0 : index
    %37 = vector.load %arg27[%c0_18, %c0_19] : memref<8x32xf32, #tpu.memory_space<vmem>>, vector<8x8xf32>
    tpu.vector_store %arg27[%c0_18, %c0_19], %36 {strides = array<i32>} : memref<8x32xf32, #tpu.memory_space<vmem>>, vector<8x8xf32>,
    %38 = vector.extract_strided_slice %15 {offsets = [0, 0, 8], sizes = [1, 8, 8], strides = [1, 1, 1]} : vector<1x8x32xf32> to vector<1x8x8xf32>
    %39 = vector.extract_strided_slice %17 {offsets = [0, 0, 8], sizes = [1, 8, 8], strides = [1, 1, 1]} : vector<1x8x32xf32> to vector<1x8x8xf32>
    "tpu.trace_start"() <{level = 10 : i32, message = "bqd,bkd->bqk"}> : () -> ()
    %cst_20 = arith.constant dense<0.000000e+00> : vector<1x8x8xf32>
    %40 = tpu.matmul %38, %39, %cst_20 {dimension_numbers = #tpu.dot_dimension_numbers<[2], [2], [1], [1], [0, 0, 0, 1, 1, 1], [0], [0]>} : vector<1x8x8xf32>, vector<1x8x8xf32>, vector<1x8x8xf32> -> vector<1x8x8xf32>
    "tpu.trace_stop"() : () -> ()
    %41 = arith.addf %40, %8 : vector<1x8x8xf32>
    %cst_21 = arith.constant dense<0xFF800000> : vector<1x8xf32>
    %42 = vector.multi_reduction <maximumf>, %41, %cst_21 [2] : vector<1x8x8xf32> to vector<1x8xf32>
    %43 = vector.shape_cast %42 : vector<1x8xf32> to vector<1x8x1xf32>
    %44 = vector.broadcast %43 : vector<1x8x1xf32> to vector<1x8x8xf32>
    %45 = arith.subf %41, %44 : vector<1x8x8xf32>
    %46 = math.exp %45 : vector<1x8x8xf32>
    %cst_22 = arith.constant dense<0.000000e+00> : vector<1x8xf32>
    %47 = vector.multi_reduction <add>, %46, %cst_22 [2] : vector<1x8x8xf32> to vector<1x8xf32>
    %48 = vector.shape_cast %47 : vector<1x8xf32> to vector<1x8x1xf32>
    %49 = tpu.reciprocal %48 {approx = true} : vector<1x8x1xf32> -> vector<1x8x1xf32>
    %50 = vector.broadcast %49 : vector<1x8x1xf32> to vector<1x8x8xf32>
    %51 = arith.mulf %46, %50 : vector<1x8x8xf32>
    %52 = vector.extract_strided_slice %19 {offsets = [0, 0, 8], sizes = [1, 8, 8], strides = [1, 1, 1]} : vector<1x8x32xf32> to vector<1x8x8xf32>
    "tpu.trace_start"() <{level = 10 : i32, message = "bqk,bkd->bqd"}> : () -> ()
    %cst_23 = arith.constant dense<0.000000e+00> : vector<1x8x8xf32>
    %53 = tpu.matmul %51, %52, %cst_23 {dimension_numbers = #tpu.dot_dimension_numbers<[2], [1], [1], [2], [0, 0, 0, 1, 1, 2], [0], [0]>} : vector<1x8x8xf32>, vector<1x8x8xf32>, vector<1x8x8xf32> -> vector<1x8x8xf32>
    "tpu.trace_stop"() : () -> ()
    %54 = vector.shape_cast %53 : vector<1x8x8xf32> to vector<8x8xf32>
    %c0_24 = arith.constant 0 : index
    %c8 = arith.constant 8 : index
    %55 = vector.load %arg27[%c0_24, %c8] : memref<8x32xf32, #tpu.memory_space<vmem>>, vector<8x8xf32>
    tpu.vector_store %arg27[%c0_24, %c8], %54 {strides = array<i32>} : memref<8x32xf32, #tpu.memory_space<vmem>>, vector<8x8xf32>,
    %56 = vector.extract_strided_slice %15 {offsets = [0, 0, 16], sizes = [1, 8, 8], strides = [1, 1, 1]} : vector<1x8x32xf32> to vector<1x8x8xf32>
    %57 = vector.extract_strided_slice %17 {offsets = [0, 0, 16], sizes = [1, 8, 8], strides = [1, 1, 1]} : vector<1x8x32xf32> to vector<1x8x8xf32>
    "tpu.trace_start"() <{level = 10 : i32, message = "bqd,bkd->bqk"}> : () -> ()
    %cst_25 = arith.constant dense<0.000000e+00> : vector<1x8x8xf32>
    %58 = tpu.matmul %56, %57, %cst_25 {dimension_numbers = #tpu.dot_dimension_numbers<[2], [2], [1], [1], [0, 0, 0, 1, 1, 1], [0], [0]>} : vector<1x8x8xf32>, vector<1x8x8xf32>, vector<1x8x8xf32> -> vector<1x8x8xf32>
    "tpu.trace_stop"() : () -> ()
    %59 = arith.addf %58, %8 : vector<1x8x8xf32>
    %cst_26 = arith.constant dense<0xFF800000> : vector<1x8xf32>
    %60 = vector.multi_reduction <maximumf>, %59, %cst_26 [2] : vector<1x8x8xf32> to vector<1x8xf32>
    %61 = vector.shape_cast %60 : vector<1x8xf32> to vector<1x8x1xf32>
    %62 = vector.broadcast %61 : vector<1x8x1xf32> to vector<1x8x8xf32>
    %63 = arith.subf %59, %62 : vector<1x8x8xf32>
    %64 = math.exp %63 : vector<1x8x8xf32>
    %cst_27 = arith.constant dense<0.000000e+00> : vector<1x8xf32>
    %65 = vector.multi_reduction <add>, %64, %cst_27 [2] : vector<1x8x8xf32> to vector<1x8xf32>
    %66 = vector.shape_cast %65 : vector<1x8xf32> to vector<1x8x1xf32>
    %67 = tpu.reciprocal %66 {approx = true} : vector<1x8x1xf32> -> vector<1x8x1xf32>
    %68 = vector.broadcast %67 : vector<1x8x1xf32> to vector<1x8x8xf32>
    %69 = arith.mulf %64, %68 : vector<1x8x8xf32>
    %70 = vector.extract_strided_slice %19 {offsets = [0, 0, 16], sizes = [1, 8, 8], strides = [1, 1, 1]} : vector<1x8x32xf32> to vector<1x8x8xf32>
    "tpu.trace_start"() <{level = 10 : i32, message = "bqk,bkd->bqd"}> : () -> ()
    %cst_28 = arith.constant dense<0.000000e+00> : vector<1x8x8xf32>
    %71 = tpu.matmul %69, %70, %cst_28 {dimension_numbers = #tpu.dot_dimension_numbers<[2], [1], [1], [2], [0, 0, 0, 1, 1, 2], [0], [0]>} : vector<1x8x8xf32>, vector<1x8x8xf32>, vector<1x8x8xf32> -> vector<1x8x8xf32>
    "tpu.trace_stop"() : () -> ()
    %72 = vector.shape_cast %71 : vector<1x8x8xf32> to vector<8x8xf32>
    %c0_29 = arith.constant 0 : index
    %c16 = arith.constant 16 : index
    %73 = vector.load %arg27[%c0_29, %c16] : memref<8x32xf32, #tpu.memory_space<vmem>>, vector<8x8xf32>
    tpu.vector_store %arg27[%c0_29, %c16], %72 {strides = array<i32>} : memref<8x32xf32, #tpu.memory_space<vmem>>, vector<8x8xf32>,
    %74 = vector.extract_strided_slice %15 {offsets = [0, 0, 24], sizes = [1, 8, 8], strides = [1, 1, 1]} : vector<1x8x32xf32> to vector<1x8x8xf32>
    %75 = vector.extract_strided_slice %17 {offsets = [0, 0, 24], sizes = [1, 8, 8], strides = [1, 1, 1]} : vector<1x8x32xf32> to vector<1x8x8xf32>
    "tpu.trace_start"() <{level = 10 : i32, message = "bqd,bkd->bqk"}> : () -> ()
    %cst_30 = arith.constant dense<0.000000e+00> : vector<1x8x8xf32>
    %76 = tpu.matmul %74, %75, %cst_30 {dimension_numbers = #tpu.dot_dimension_numbers<[2], [2], [1], [1], [0, 0, 0, 1, 1, 1], [0], [0]>} : vector<1x8x8xf32>, vector<1x8x8xf32>, vector<1x8x8xf32> -> vector<1x8x8xf32>
    "tpu.trace_stop"() : () -> ()
    %77 = arith.addf %76, %8 : vector<1x8x8xf32>
    %cst_31 = arith.constant dense<0xFF800000> : vector<1x8xf32>
    %78 = vector.multi_reduction <maximumf>, %77, %cst_31 [2] : vector<1x8x8xf32> to vector<1x8xf32>
    %79 = vector.shape_cast %78 : vector<1x8xf32> to vector<1x8x1xf32>
    %80 = vector.broadcast %79 : vector<1x8x1xf32> to vector<1x8x8xf32>
    %81 = arith.subf %77, %80 : vector<1x8x8xf32>
    %82 = math.exp %81 : vector<1x8x8xf32>
    %cst_32 = arith.constant dense<0.000000e+00> : vector<1x8xf32>
    %83 = vector.multi_reduction <add>, %82, %cst_32 [2] : vector<1x8x8xf32> to vector<1x8xf32>
    %84 = vector.shape_cast %83 : vector<1x8xf32> to vector<1x8x1xf32>
    %85 = tpu.reciprocal %84 {approx = true} : vector<1x8x1xf32> -> vector<1x8x1xf32>
    %86 = vector.broadcast %85 : vector<1x8x1xf32> to vector<1x8x8xf32>
    %87 = arith.mulf %82, %86 : vector<1x8x8xf32>
    %88 = vector.extract_strided_slice %19 {offsets = [0, 0, 24], sizes = [1, 8, 8], strides = [1, 1, 1]} : vector<1x8x32xf32> to vector<1x8x8xf32>
    "tpu.trace_start"() <{level = 10 : i32, message = "bqk,bkd->bqd"}> : () -> ()
    %cst_33 = arith.constant dense<0.000000e+00> : vector<1x8x8xf32>
    %89 = tpu.matmul %87, %88, %cst_33 {dimension_numbers = #tpu.dot_dimension_numbers<[2], [1], [1], [2], [0, 0, 0, 1, 1, 2], [0], [0]>} : vector<1x8x8xf32>, vector<1x8x8xf32>, vector<1x8x8xf32> -> vector<1x8x8xf32>
    "tpu.trace_stop"() : () -> ()
    %90 = vector.shape_cast %89 : vector<1x8x8xf32> to vector<8x8xf32>
    %c0_34 = arith.constant 0 : index
    %c24 = arith.constant 24 : index
    %91 = vector.load %arg27[%c0_34, %c24] : memref<8x32xf32, #tpu.memory_space<vmem>>, vector<8x8xf32>
    tpu.vector_store %arg27[%c0_34, %c24], %90 {strides = array<i32>} : memref<8x32xf32, #tpu.memory_space<vmem>>, vector<8x8xf32>,
    %c0_35 = arith.constant 0 : index
    %c0_36 = arith.constant 0 : index
    %92 = vector.load %arg27[%c0_35, %c0_36] : memref<8x32xf32, #tpu.memory_space<vmem>>, vector<8x32xf32>
    %c0_37 = arith.constant 0 : index
    %c0_38 = arith.constant 0 : index
    %93 = vector.load %arg7[%c0_37, %c0_38] : memref<32x32xf32, #tpu.memory_space<vmem>>, vector<32x32xf32>
    %cst_39 = arith.constant dense<0.000000e+00> : vector<8x32xf32>
    %94 = tpu.matmul %92, %93, %cst_39 {dimension_numbers = #tpu.dot_dimension_numbers<[1], [0], [0], [1], [0, 0, 1, 1], [], []>} : vector<8x32xf32>, vector<32x32xf32>, vector<8x32xf32> -> vector<8x32xf32>
    %c0_40 = arith.constant 0 : index
    %c0_41 = arith.constant 0 : index
    %95 = vector.load %arg8[%c0_40, %c0_41] : memref<1x32xf32, #tpu.memory_space<vmem>>, vector<1x32xf32>
    %96 = vector.broadcast %95 : vector<1x32xf32> to vector<8x32xf32>
    %97 = arith.addf %94, %96 : vector<8x32xf32>
    %98 = arith.addf %1, %97 : vector<8x32xf32>
    %cst_42 = arith.constant dense<0.000000e+00> : vector<8xf32>
    %99 = vector.multi_reduction <add>, %98, %cst_42 [1] : vector<8x32xf32> to vector<8xf32>
    %100 = vector.shape_cast %99 : vector<8xf32> to vector<8x1xf32>
    %cst_43 = arith.constant 3.200000e+01 : f32
    %101 = vector.broadcast %cst_43 : f32 to vector<8x1xf32>
    %102 = arith.divf %100, %101 : vector<8x1xf32>
    %103 = vector.broadcast %102 : vector<8x1xf32> to vector<8x32xf32>
    %104 = arith.subf %98, %103 : vector<8x32xf32>
    %105 = arith.mulf %104, %104 : vector<8x32xf32>
    %cst_44 = arith.constant dense<0.000000e+00> : vector<8xf32>
    %106 = vector.multi_reduction <add>, %105, %cst_44 [1] : vector<8x32xf32> to vector<8xf32>
    %107 = vector.shape_cast %106 : vector<8xf32> to vector<8x1xf32>
    %cst_45 = arith.constant 3.200000e+01 : f32
    %108 = vector.broadcast %cst_45 : f32 to vector<8x1xf32>
    %109 = arith.divf %107, %108 : vector<8x1xf32>
    %110 = vector.broadcast %102 : vector<8x1xf32> to vector<8x32xf32>
    %111 = arith.subf %98, %110 : vector<8x32xf32>
    %cst_46 = arith.constant 9.99999974E-6 : f32
    %112 = vector.broadcast %cst_46 : f32 to vector<8x1xf32>
    %113 = arith.addf %109, %112 : vector<8x1xf32>
    %114 = math.rsqrt %113 : vector<8x1xf32>
    %115 = vector.broadcast %114 : vector<8x1xf32> to vector<8x32xf32>
    %116 = arith.mulf %111, %115 : vector<8x32xf32>
    %c0_47 = arith.constant 0 : index
    %c0_48 = arith.constant 0 : index
    %117 = vector.load %arg9[%c0_47, %c0_48] : memref<1x32xf32, #tpu.memory_space<vmem>>, vector<1x32xf32>
    %118 = vector.broadcast %117 : vector<1x32xf32> to vector<8x32xf32>
    %119 = arith.mulf %116, %118 : vector<8x32xf32>
    %c0_49 = arith.constant 0 : index
    %c0_50 = arith.constant 0 : index
    %120 = vector.load %arg10[%c0_49, %c0_50] : memref<1x32xf32, #tpu.memory_space<vmem>>, vector<1x32xf32>
    %121 = vector.broadcast %120 : vector<1x32xf32> to vector<8x32xf32>
    %122 = arith.addf %119, %121 : vector<8x32xf32>
    %c0_51 = arith.constant 0 : index
    %c0_52 = arith.constant 0 : index
    %123 = vector.load %arg11[%c0_51, %c0_52] : memref<32x32xf32, #tpu.memory_space<vmem>>, vector<32x32xf32>
    %cst_53 = arith.constant dense<0.000000e+00> : vector<8x32xf32>
    %124 = tpu.matmul %122, %123, %cst_53 {dimension_numbers = #tpu.dot_dimension_numbers<[1], [0], [0], [1], [0, 0, 1, 1], [], []>} : vector<8x32xf32>, vector<32x32xf32>, vector<8x32xf32> -> vector<8x32xf32>
    %c0_54 = arith.constant 0 : index
    %c0_55 = arith.constant 0 : index
    %125 = vector.load %arg12[%c0_54, %c0_55] : memref<1x32xf32, #tpu.memory_space<vmem>>, vector<1x32xf32>
    %126 = vector.broadcast %125 : vector<1x32xf32> to vector<8x32xf32>
    %127 = arith.addf %124, %126 : vector<8x32xf32>
    %128 = vector.shape_cast %127 : vector<8x32xf32> to vector<1x8x32xf32>
    %c0_56 = arith.constant 0 : index
    %c0_57 = arith.constant 0 : index
    %129 = vector.load %arg13[%c0_56, %c0_57] : memref<32x64xf32, #tpu.memory_space<vmem>>, vector<32x64xf32>
    %cst_58 = arith.constant dense<0.000000e+00> : vector<16x64xf32>
    %130 = tpu.matmul %3, %129, %cst_58 {dimension_numbers = #tpu.dot_dimension_numbers<[1], [0], [0], [1], [0, 0, 1, 1], [], []>} : vector<16x32xf32>, vector<32x64xf32>, vector<16x64xf32> -> vector<16x64xf32>
    %c0_59 = arith.constant 0 : index
    %c0_60 = arith.constant 0 : index
    %131 = vector.load %arg14[%c0_59, %c0_60] : memref<1x64xf32, #tpu.memory_space<vmem>>, vector<1x64xf32>
    %132 = vector.broadcast %131 : vector<1x64xf32> to vector<16x64xf32>
    %133 = arith.addf %130, %132 : vector<16x64xf32>
    %134 = vector.extract_strided_slice %133 {offsets = [0, 0], sizes = [16, 32], strides = [1, 1]} : vector<16x64xf32> to vector<16x32xf32>
    %135 = vector.shape_cast %134 : vector<16x32xf32> to vector<1x16x32xf32>
    %136 = vector.extract_strided_slice %133 {offsets = [0, 32], sizes = [16, 32], strides = [1, 1]} : vector<16x64xf32> to vector<16x32xf32>
    %137 = vector.shape_cast %136 : vector<16x32xf32> to vector<1x16x32xf32>
    %138 = vector.extract_strided_slice %128 {offsets = [0, 0, 0], sizes = [1, 8, 8], strides = [1, 1, 1]} : vector<1x8x32xf32> to vector<1x8x8xf32>
    %139 = vector.extract_strided_slice %135 {offsets = [0, 0, 0], sizes = [1, 16, 8], strides = [1, 1, 1]} : vector<1x16x32xf32> to vector<1x16x8xf32>
    "tpu.trace_start"() <{level = 10 : i32, message = "bqd,bkd->bqk"}> : () -> ()
    %cst_61 = arith.constant dense<0.000000e+00> : vector<1x8x16xf32>
    %140 = tpu.matmul %138, %139, %cst_61 {dimension_numbers = #tpu.dot_dimension_numbers<[2], [2], [1], [1], [0, 0, 0, 1, 1, 1], [0], [0]>} : vector<1x8x8xf32>, vector<1x16x8xf32>, vector<1x8x16xf32> -> vector<1x8x16xf32>
    "tpu.trace_stop"() : () -> ()
    %cst_62 = arith.constant dense<0xFF800000> : vector<1x8xf32>
    %141 = vector.multi_reduction <maximumf>, %140, %cst_62 [2] : vector<1x8x16xf32> to vector<1x8xf32>
    %142 = vector.shape_cast %141 : vector<1x8xf32> to vector<1x8x1xf32>
    %143 = vector.broadcast %142 : vector<1x8x1xf32> to vector<1x8x16xf32>
    %144 = arith.subf %140, %143 : vector<1x8x16xf32>
    %145 = math.exp %144 : vector<1x8x16xf32>
    %cst_63 = arith.constant dense<0.000000e+00> : vector<1x8xf32>
    %146 = vector.multi_reduction <add>, %145, %cst_63 [2] : vector<1x8x16xf32> to vector<1x8xf32>
    %147 = vector.shape_cast %146 : vector<1x8xf32> to vector<1x8x1xf32>
    %148 = vector.broadcast %147 : vector<1x8x1xf32> to vector<1x8x16xf32>
    %149 = arith.divf %145, %148 : vector<1x8x16xf32>
    %c0_64 = arith.constant 0 : index
    %c0_65 = arith.constant 0 : index
    %c0_66 = arith.constant 0 : index
    %150 = vector.load %arg28[%c0_64, %c0_65, %c0_66] : memref<1x8x16xf32, #tpu.memory_space<vmem>>, vector<1x8x16xf32>
    tpu.vector_store %arg28[%c0_64, %c0_65, %c0_66], %149 {strides = array<i32>} : memref<1x8x16xf32, #tpu.memory_space<vmem>>, vector<1x8x16xf32>,
    %151 = vector.extract_strided_slice %137 {offsets = [0, 0, 0], sizes = [1, 16, 8], strides = [1, 1, 1]} : vector<1x16x32xf32> to vector<1x16x8xf32>
    "tpu.trace_start"() <{level = 10 : i32, message = "bqk,bkd->bqd"}> : () -> ()
    %cst_67 = arith.constant dense<0.000000e+00> : vector<1x8x8xf32>
    %152 = tpu.matmul %149, %151, %cst_67 {dimension_numbers = #tpu.dot_dimension_numbers<[2], [1], [1], [2], [0, 0, 0, 1, 1, 2], [0], [0]>} : vector<1x8x16xf32>, vector<1x16x8xf32>, vector<1x8x8xf32> -> vector<1x8x8xf32>
    "tpu.trace_stop"() : () -> ()
    %153 = vector.shape_cast %152 : vector<1x8x8xf32> to vector<8x8xf32>
    %c0_68 = arith.constant 0 : index
    %c0_69 = arith.constant 0 : index
    %154 = vector.load %arg27[%c0_68, %c0_69] : memref<8x32xf32, #tpu.memory_space<vmem>>, vector<8x8xf32>
    tpu.vector_store %arg27[%c0_68, %c0_69], %153 {strides = array<i32>} : memref<8x32xf32, #tpu.memory_space<vmem>>, vector<8x8xf32>,
    %155 = vector.extract_strided_slice %128 {offsets = [0, 0, 8], sizes = [1, 8, 8], strides = [1, 1, 1]} : vector<1x8x32xf32> to vector<1x8x8xf32>
    %156 = vector.extract_strided_slice %135 {offsets = [0, 0, 8], sizes = [1, 16, 8], strides = [1, 1, 1]} : vector<1x16x32xf32> to vector<1x16x8xf32>
    "tpu.trace_start"() <{level = 10 : i32, message = "bqd,bkd->bqk"}> : () -> ()
    %cst_70 = arith.constant dense<0.000000e+00> : vector<1x8x16xf32>
    %157 = tpu.matmul %155, %156, %cst_70 {dimension_numbers = #tpu.dot_dimension_numbers<[2], [2], [1], [1], [0, 0, 0, 1, 1, 1], [0], [0]>} : vector<1x8x8xf32>, vector<1x16x8xf32>, vector<1x8x16xf32> -> vector<1x8x16xf32>
    "tpu.trace_stop"() : () -> ()
    %cst_71 = arith.constant dense<0xFF800000> : vector<1x8xf32>
    %158 = vector.multi_reduction <maximumf>, %157, %cst_71 [2] : vector<1x8x16xf32> to vector<1x8xf32>
    %159 = vector.shape_cast %158 : vector<1x8xf32> to vector<1x8x1xf32>
    %160 = vector.broadcast %159 : vector<1x8x1xf32> to vector<1x8x16xf32>
    %161 = arith.subf %157, %160 : vector<1x8x16xf32>
    %162 = math.exp %161 : vector<1x8x16xf32>
    %cst_72 = arith.constant dense<0.000000e+00> : vector<1x8xf32>
    %163 = vector.multi_reduction <add>, %162, %cst_72 [2] : vector<1x8x16xf32> to vector<1x8xf32>
    %164 = vector.shape_cast %163 : vector<1x8xf32> to vector<1x8x1xf32>
    %165 = vector.broadcast %164 : vector<1x8x1xf32> to vector<1x8x16xf32>
    %166 = arith.divf %162, %165 : vector<1x8x16xf32>
    %c0_73 = arith.constant 0 : index
    %c0_74 = arith.constant 0 : index
    %c0_75 = arith.constant 0 : index
    %167 = vector.load %arg28[%c0_73, %c0_74, %c0_75] : memref<1x8x16xf32, #tpu.memory_space<vmem>>, vector<1x8x16xf32>
    %168 = arith.addf %167, %166 : vector<1x8x16xf32>
    %c0_76 = arith.constant 0 : index
    %c0_77 = arith.constant 0 : index
    %c0_78 = arith.constant 0 : index
    %169 = vector.load %arg28[%c0_76, %c0_77, %c0_78] : memref<1x8x16xf32, #tpu.memory_space<vmem>>, vector<1x8x16xf32>
    tpu.vector_store %arg28[%c0_76, %c0_77, %c0_78], %168 {strides = array<i32>} : memref<1x8x16xf32, #tpu.memory_space<vmem>>, vector<1x8x16xf32>,
    %170 = vector.extract_strided_slice %137 {offsets = [0, 0, 8], sizes = [1, 16, 8], strides = [1, 1, 1]} : vector<1x16x32xf32> to vector<1x16x8xf32>
    "tpu.trace_start"() <{level = 10 : i32, message = "bqk,bkd->bqd"}> : () -> ()
    %cst_79 = arith.constant dense<0.000000e+00> : vector<1x8x8xf32>
    %171 = tpu.matmul %166, %170, %cst_79 {dimension_numbers = #tpu.dot_dimension_numbers<[2], [1], [1], [2], [0, 0, 0, 1, 1, 2], [0], [0]>} : vector<1x8x16xf32>, vector<1x16x8xf32>, vector<1x8x8xf32> -> vector<1x8x8xf32>
    "tpu.trace_stop"() : () -> ()
    %172 = vector.shape_cast %171 : vector<1x8x8xf32> to vector<8x8xf32>
    %c0_80 = arith.constant 0 : index
    %c8_81 = arith.constant 8 : index
    %173 = vector.load %arg27[%c0_80, %c8_81] : memref<8x32xf32, #tpu.memory_space<vmem>>, vector<8x8xf32>
    tpu.vector_store %arg27[%c0_80, %c8_81], %172 {strides = array<i32>} : memref<8x32xf32, #tpu.memory_space<vmem>>, vector<8x8xf32>,
    %174 = vector.extract_strided_slice %128 {offsets = [0, 0, 16], sizes = [1, 8, 8], strides = [1, 1, 1]} : vector<1x8x32xf32> to vector<1x8x8xf32>
    %175 = vector.extract_strided_slice %135 {offsets = [0, 0, 16], sizes = [1, 16, 8], strides = [1, 1, 1]} : vector<1x16x32xf32> to vector<1x16x8xf32>
    "tpu.trace_start"() <{level = 10 : i32, message = "bqd,bkd->bqk"}> : () -> ()
    %cst_82 = arith.constant dense<0.000000e+00> : vector<1x8x16xf32>
    %176 = tpu.matmul %174, %175, %cst_82 {dimension_numbers = #tpu.dot_dimension_numbers<[2], [2], [1], [1], [0, 0, 0, 1, 1, 1], [0], [0]>} : vector<1x8x8xf32>, vector<1x16x8xf32>, vector<1x8x16xf32> -> vector<1x8x16xf32>
    "tpu.trace_stop"() : () -> ()
    %cst_83 = arith.constant dense<0xFF800000> : vector<1x8xf32>
    %177 = vector.multi_reduction <maximumf>, %176, %cst_83 [2] : vector<1x8x16xf32> to vector<1x8xf32>
    %178 = vector.shape_cast %177 : vector<1x8xf32> to vector<1x8x1xf32>
    %179 = vector.broadcast %178 : vector<1x8x1xf32> to vector<1x8x16xf32>
    %180 = arith.subf %176, %179 : vector<1x8x16xf32>
    %181 = math.exp %180 : vector<1x8x16xf32>
    %cst_84 = arith.constant dense<0.000000e+00> : vector<1x8xf32>
    %182 = vector.multi_reduction <add>, %181, %cst_84 [2] : vector<1x8x16xf32> to vector<1x8xf32>
    %183 = vector.shape_cast %182 : vector<1x8xf32> to vector<1x8x1xf32>
    %184 = vector.broadcast %183 : vector<1x8x1xf32> to vector<1x8x16xf32>
    %185 = arith.divf %181, %184 : vector<1x8x16xf32>
    %c0_85 = arith.constant 0 : index
    %c0_86 = arith.constant 0 : index
    %c0_87 = arith.constant 0 : index
    %186 = vector.load %arg28[%c0_85, %c0_86, %c0_87] : memref<1x8x16xf32, #tpu.memory_space<vmem>>, vector<1x8x16xf32>
    %187 = arith.addf %186, %185 : vector<1x8x16xf32>
    %c0_88 = arith.constant 0 : index
    %c0_89 = arith.constant 0 : index
    %c0_90 = arith.constant 0 : index
    %188 = vector.load %arg28[%c0_88, %c0_89, %c0_90] : memref<1x8x16xf32, #tpu.memory_space<vmem>>, vector<1x8x16xf32>
    tpu.vector_store %arg28[%c0_88, %c0_89, %c0_90], %187 {strides = array<i32>} : memref<1x8x16xf32, #tpu.memory_space<vmem>>, vector<1x8x16xf32>,
    %189 = vector.extract_strided_slice %137 {offsets = [0, 0, 16], sizes = [1, 16, 8], strides = [1, 1, 1]} : vector<1x16x32xf32> to vector<1x16x8xf32>
    "tpu.trace_start"() <{level = 10 : i32, message = "bqk,bkd->bqd"}> : () -> ()
    %cst_91 = arith.constant dense<0.000000e+00> : vector<1x8x8xf32>
    %190 = tpu.matmul %185, %189, %cst_91 {dimension_numbers = #tpu.dot_dimension_numbers<[2], [1], [1], [2], [0, 0, 0, 1, 1, 2], [0], [0]>} : vector<1x8x16xf32>, vector<1x16x8xf32>, vector<1x8x8xf32> -> vector<1x8x8xf32>
    "tpu.trace_stop"() : () -> ()
    %191 = vector.shape_cast %190 : vector<1x8x8xf32> to vector<8x8xf32>
    %c0_92 = arith.constant 0 : index
    %c16_93 = arith.constant 16 : index
    %192 = vector.load %arg27[%c0_92, %c16_93] : memref<8x32xf32, #tpu.memory_space<vmem>>, vector<8x8xf32>
    tpu.vector_store %arg27[%c0_92, %c16_93], %191 {strides = array<i32>} : memref<8x32xf32, #tpu.memory_space<vmem>>, vector<8x8xf32>,
    %193 = vector.extract_strided_slice %128 {offsets = [0, 0, 24], sizes = [1, 8, 8], strides = [1, 1, 1]} : vector<1x8x32xf32> to vector<1x8x8xf32>
    %194 = vector.extract_strided_slice %135 {offsets = [0, 0, 24], sizes = [1, 16, 8], strides = [1, 1, 1]} : vector<1x16x32xf32> to vector<1x16x8xf32>
    "tpu.trace_start"() <{level = 10 : i32, message = "bqd,bkd->bqk"}> : () -> ()
    %cst_94 = arith.constant dense<0.000000e+00> : vector<1x8x16xf32>
    %195 = tpu.matmul %193, %194, %cst_94 {dimension_numbers = #tpu.dot_dimension_numbers<[2], [2], [1], [1], [0, 0, 0, 1, 1, 1], [0], [0]>} : vector<1x8x8xf32>, vector<1x16x8xf32>, vector<1x8x16xf32> -> vector<1x8x16xf32>
    "tpu.trace_stop"() : () -> ()
    %cst_95 = arith.constant dense<0xFF800000> : vector<1x8xf32>
    %196 = vector.multi_reduction <maximumf>, %195, %cst_95 [2] : vector<1x8x16xf32> to vector<1x8xf32>
    %197 = vector.shape_cast %196 : vector<1x8xf32> to vector<1x8x1xf32>
    %198 = vector.broadcast %197 : vector<1x8x1xf32> to vector<1x8x16xf32>
    %199 = arith.subf %195, %198 : vector<1x8x16xf32>
    %200 = math.exp %199 : vector<1x8x16xf32>
    %cst_96 = arith.constant dense<0.000000e+00> : vector<1x8xf32>
    %201 = vector.multi_reduction <add>, %200, %cst_96 [2] : vector<1x8x16xf32> to vector<1x8xf32>
    %202 = vector.shape_cast %201 : vector<1x8xf32> to vector<1x8x1xf32>
    %203 = vector.broadcast %202 : vector<1x8x1xf32> to vector<1x8x16xf32>
    %204 = arith.divf %200, %203 : vector<1x8x16xf32>
    %c0_97 = arith.constant 0 : index
    %c0_98 = arith.constant 0 : index
    %c0_99 = arith.constant 0 : index
    %205 = vector.load %arg28[%c0_97, %c0_98, %c0_99] : memref<1x8x16xf32, #tpu.memory_space<vmem>>, vector<1x8x16xf32>
    %206 = arith.addf %205, %204 : vector<1x8x16xf32>
    %c0_100 = arith.constant 0 : index
    %c0_101 = arith.constant 0 : index
    %c0_102 = arith.constant 0 : index
    %207 = vector.load %arg28[%c0_100, %c0_101, %c0_102] : memref<1x8x16xf32, #tpu.memory_space<vmem>>, vector<1x8x16xf32>
    tpu.vector_store %arg28[%c0_100, %c0_101, %c0_102], %206 {strides = array<i32>} : memref<1x8x16xf32, #tpu.memory_space<vmem>>, vector<1x8x16xf32>,
    %208 = vector.extract_strided_slice %137 {offsets = [0, 0, 24], sizes = [1, 16, 8], strides = [1, 1, 1]} : vector<1x16x32xf32> to vector<1x16x8xf32>
    "tpu.trace_start"() <{level = 10 : i32, message = "bqk,bkd->bqd"}> : () -> ()
    %cst_103 = arith.constant dense<0.000000e+00> : vector<1x8x8xf32>
    %209 = tpu.matmul %204, %208, %cst_103 {dimension_numbers = #tpu.dot_dimension_numbers<[2], [1], [1], [2], [0, 0, 0, 1, 1, 2], [0], [0]>} : vector<1x8x16xf32>, vector<1x16x8xf32>, vector<1x8x8xf32> -> vector<1x8x8xf32>
    "tpu.trace_stop"() : () -> ()
    %210 = vector.shape_cast %209 : vector<1x8x8xf32> to vector<8x8xf32>
    %c0_104 = arith.constant 0 : index
    %c24_105 = arith.constant 24 : index
    %211 = vector.load %arg27[%c0_104, %c24_105] : memref<8x32xf32, #tpu.memory_space<vmem>>, vector<8x8xf32>
    tpu.vector_store %arg27[%c0_104, %c24_105], %210 {strides = array<i32>} : memref<8x32xf32, #tpu.memory_space<vmem>>, vector<8x8xf32>,
    %c0_106 = arith.constant 0 : index
    %c0_107 = arith.constant 0 : index
    %212 = vector.load %arg27[%c0_106, %c0_107] : memref<8x32xf32, #tpu.memory_space<vmem>>, vector<8x32xf32>
    %c0_108 = arith.constant 0 : index
    %c0_109 = arith.constant 0 : index
    %213 = vector.load %arg15[%c0_108, %c0_109] : memref<32x32xf32, #tpu.memory_space<vmem>>, vector<32x32xf32>
    %cst_110 = arith.constant dense<0.000000e+00> : vector<8x32xf32>
    %214 = tpu.matmul %212, %213, %cst_110 {dimension_numbers = #tpu.dot_dimension_numbers<[1], [0], [0], [1], [0, 0, 1, 1], [], []>} : vector<8x32xf32>, vector<32x32xf32>, vector<8x32xf32> -> vector<8x32xf32>
    %c0_111 = arith.constant 0 : index
    %c0_112 = arith.constant 0 : index
    %215 = vector.load %arg16[%c0_111, %c0_112] : memref<1x32xf32, #tpu.memory_space<vmem>>, vector<1x32xf32>
    %216 = vector.broadcast %215 : vector<1x32xf32> to vector<8x32xf32>
    %217 = arith.addf %214, %216 : vector<8x32xf32>
    %218 = arith.addf %122, %217 : vector<8x32xf32>
    %cst_113 = arith.constant dense<0.000000e+00> : vector<8xf32>
    %219 = vector.multi_reduction <add>, %218, %cst_113 [1] : vector<8x32xf32> to vector<8xf32>
    %220 = vector.shape_cast %219 : vector<8xf32> to vector<8x1xf32>
    %cst_114 = arith.constant 3.200000e+01 : f32
    %221 = vector.broadcast %cst_114 : f32 to vector<8x1xf32>
    %222 = arith.divf %220, %221 : vector<8x1xf32>
    %223 = vector.broadcast %222 : vector<8x1xf32> to vector<8x32xf32>
    %224 = arith.subf %218, %223 : vector<8x32xf32>
    %225 = arith.mulf %224, %224 : vector<8x32xf32>
    %cst_115 = arith.constant dense<0.000000e+00> : vector<8xf32>
    %226 = vector.multi_reduction <add>, %225, %cst_115 [1] : vector<8x32xf32> to vector<8xf32>
    %227 = vector.shape_cast %226 : vector<8xf32> to vector<8x1xf32>
    %cst_116 = arith.constant 3.200000e+01 : f32
    %228 = vector.broadcast %cst_116 : f32 to vector<8x1xf32>
    %229 = arith.divf %227, %228 : vector<8x1xf32>
    %230 = vector.broadcast %222 : vector<8x1xf32> to vector<8x32xf32>
    %231 = arith.subf %218, %230 : vector<8x32xf32>
    %cst_117 = arith.constant 9.99999974E-6 : f32
    %232 = vector.broadcast %cst_117 : f32 to vector<8x1xf32>
    %233 = arith.addf %229, %232 : vector<8x1xf32>
    %234 = math.rsqrt %233 : vector<8x1xf32>
    %235 = vector.broadcast %234 : vector<8x1xf32> to vector<8x32xf32>
    %236 = arith.mulf %231, %235 : vector<8x32xf32>
    %c0_118 = arith.constant 0 : index
    %c0_119 = arith.constant 0 : index
    %237 = vector.load %arg17[%c0_118, %c0_119] : memref<1x32xf32, #tpu.memory_space<vmem>>, vector<1x32xf32>
    %238 = vector.broadcast %237 : vector<1x32xf32> to vector<8x32xf32>
    %239 = arith.mulf %236, %238 : vector<8x32xf32>
    %c0_120 = arith.constant 0 : index
    %c0_121 = arith.constant 0 : index
    %240 = vector.load %arg18[%c0_120, %c0_121] : memref<1x32xf32, #tpu.memory_space<vmem>>, vector<1x32xf32>
    %241 = vector.broadcast %240 : vector<1x32xf32> to vector<8x32xf32>
    %242 = arith.addf %239, %241 : vector<8x32xf32>
    %c0_122 = arith.constant 0 : index
    %c0_123 = arith.constant 0 : index
    %243 = vector.load %arg19[%c0_122, %c0_123] : memref<32x64xf32, #tpu.memory_space<vmem>>, vector<32x64xf32>
    %cst_124 = arith.constant dense<0.000000e+00> : vector<8x64xf32>
    %244 = tpu.matmul %242, %243, %cst_124 {dimension_numbers = #tpu.dot_dimension_numbers<[1], [0], [0], [1], [0, 0, 1, 1], [], []>} : vector<8x32xf32>, vector<32x64xf32>, vector<8x64xf32> -> vector<8x64xf32>
    %c0_125 = arith.constant 0 : index
    %c0_126 = arith.constant 0 : index
    %245 = vector.load %arg20[%c0_125, %c0_126] : memref<1x64xf32, #tpu.memory_space<vmem>>, vector<1x64xf32>
    %246 = vector.broadcast %245 : vector<1x64xf32> to vector<8x64xf32>
    %247 = arith.addf %244, %246 : vector<8x64xf32>
    %cst_127 = arith.constant 0.000000e+00 : f32
    %248 = vector.broadcast %cst_127 : f32 to vector<8x64xf32>
    %249 = arith.maximumf %247, %248 : vector<8x64xf32>
    %c0_128 = arith.constant 0 : index
    %c0_129 = arith.constant 0 : index
    %250 = vector.load %arg21[%c0_128, %c0_129] : memref<64x32xf32, #tpu.memory_space<vmem>>, vector<64x32xf32>
    %cst_130 = arith.constant dense<0.000000e+00> : vector<8x32xf32>
    %251 = tpu.matmul %249, %250, %cst_130 {dimension_numbers = #tpu.dot_dimension_numbers<[1], [0], [0], [1], [0, 0, 1, 1], [], []>} : vector<8x64xf32>, vector<64x32xf32>, vector<8x32xf32> -> vector<8x32xf32>
    %c0_131 = arith.constant 0 : index
    %c0_132 = arith.constant 0 : index
    %252 = vector.load %arg22[%c0_131, %c0_132] : memref<1x32xf32, #tpu.memory_space<vmem>>, vector<1x32xf32>
    %253 = vector.broadcast %252 : vector<1x32xf32> to vector<8x32xf32>
    %254 = arith.addf %251, %253 : vector<8x32xf32>
    %255 = arith.addf %242, %254 : vector<8x32xf32>
    %cst_133 = arith.constant dense<0.000000e+00> : vector<8xf32>
    %256 = vector.multi_reduction <add>, %255, %cst_133 [1] : vector<8x32xf32> to vector<8xf32>
    %257 = vector.shape_cast %256 : vector<8xf32> to vector<8x1xf32>
    %cst_134 = arith.constant 3.200000e+01 : f32
    %258 = vector.broadcast %cst_134 : f32 to vector<8x1xf32>
    %259 = arith.divf %257, %258 : vector<8x1xf32>
    %260 = vector.broadcast %259 : vector<8x1xf32> to vector<8x32xf32>
    %261 = arith.subf %255, %260 : vector<8x32xf32>
    %262 = arith.mulf %261, %261 : vector<8x32xf32>
    %cst_135 = arith.constant dense<0.000000e+00> : vector<8xf32>
    %263 = vector.multi_reduction <add>, %262, %cst_135 [1] : vector<8x32xf32> to vector<8xf32>
    %264 = vector.shape_cast %263 : vector<8xf32> to vector<8x1xf32>
    %cst_136 = arith.constant 3.200000e+01 : f32
    %265 = vector.broadcast %cst_136 : f32 to vector<8x1xf32>
    %266 = arith.divf %264, %265 : vector<8x1xf32>
    %267 = vector.broadcast %259 : vector<8x1xf32> to vector<8x32xf32>
    %268 = arith.subf %255, %267 : vector<8x32xf32>
    %cst_137 = arith.constant 9.99999974E-6 : f32
    %269 = vector.broadcast %cst_137 : f32 to vector<8x1xf32>
    %270 = arith.addf %266, %269 : vector<8x1xf32>
    %271 = math.rsqrt %270 : vector<8x1xf32>
    %272 = vector.broadcast %271 : vector<8x1xf32> to vector<8x32xf32>
    %273 = arith.mulf %268, %272 : vector<8x32xf32>
    %c0_138 = arith.constant 0 : index
    %c0_139 = arith.constant 0 : index
    %274 = vector.load %arg23[%c0_138, %c0_139] : memref<1x32xf32, #tpu.memory_space<vmem>>, vector<1x32xf32>
    %275 = vector.broadcast %274 : vector<1x32xf32> to vector<8x32xf32>
    %276 = arith.mulf %273, %275 : vector<8x32xf32>
    %c0_140 = arith.constant 0 : index
    %c0_141 = arith.constant 0 : index
    %277 = vector.load %arg24[%c0_140, %c0_141] : memref<1x32xf32, #tpu.memory_space<vmem>>, vector<1x32xf32>
    %278 = vector.broadcast %277 : vector<1x32xf32> to vector<8x32xf32>
    %279 = arith.addf %276, %278 : vector<8x32xf32>
    %280 = vector.shape_cast %279 : vector<8x32xf32> to vector<1x8x32xf32>
    %c0_142 = arith.constant 0 : index
    %c0_143 = arith.constant 0 : index
    %c0_144 = arith.constant 0 : index
    %281 = vector.load %arg25[%c0_142, %c0_143, %c0_144] : memref<1x8x32xf32, #tpu.memory_space<vmem>>, vector<1x8x32xf32>
    tpu.vector_store %arg25[%c0_142, %c0_143, %c0_144], %280 {strides = array<i32>} : memref<1x8x32xf32, #tpu.memory_space<vmem>>, vector<1x8x32xf32>,
    %c0_145 = arith.constant 0 : index
    %c0_146 = arith.constant 0 : index
    %c0_147 = arith.constant 0 : index
    %282 = vector.load %arg28[%c0_145, %c0_146, %c0_147] : memref<1x8x16xf32, #tpu.memory_space<vmem>>, vector<1x8x16xf32>
    %cst_148 = arith.constant 2.500000e-01 : f32
    %283 = vector.broadcast %cst_148 : f32 to vector<1x8x16xf32>
    %284 = arith.mulf %282, %283 : vector<1x8x16xf32>
    %c0_149 = arith.constant 0 : index
    %c0_150 = arith.constant 0 : index
    %c0_151 = arith.constant 0 : index
    %285 = vector.load %arg26[%c0_149, %c0_150, %c0_151] : memref<1x8x16xf32, #tpu.memory_space<vmem>>, vector<1x8x16xf32>
    tpu.vector_store %arg26[%c0_149, %c0_150, %c0_151], %284 {strides = array<i32>} : memref<1x8x16xf32, #tpu.memory_space<vmem>>, vector<1x8x16xf32>,
    return
  }
  func.func @transform_0(%arg0: i32) -> (i32, i32, i32) {
    %c0_i32 = arith.constant 0 : i32
    %c0_i32_0 = arith.constant 0 : i32
    %c0_i32_1 = arith.constant 0 : i32
    return %arg0, %c0_i32, %c0_i32_0 : i32, i32, i32
  }
  func.func @transform_1(%arg0: i32) -> (i32, i32, i32) {
    %c0_i32 = arith.constant 0 : i32
    %c0_i32_0 = arith.constant 0 : i32
    %c0_i32_1 = arith.constant 0 : i32
    return %arg0, %c0_i32, %c0_i32_0 : i32, i32, i32
  }
  func.func @transform_2(%arg0: i32) -> (i32, i32, i32) {
    %c0_i32 = arith.constant 0 : i32
    %c0_i32_0 = arith.constant 0 : i32
    %c0_i32_1 = arith.constant 0 : i32
    return %arg0, %c0_i32, %c0_i32_0 : i32, i32, i32
  }
  func.func @transform_3(%arg0: i32) -> (i32, i32) {
    %c0_i32 = arith.constant 0 : i32
    %c0_i32_0 = arith.constant 0 : i32
    %c0_i32_1 = arith.constant 0 : i32
    return %c0_i32, %c0_i32_0 : i32, i32
  }
  func.func @transform_4(%arg0: i32) -> (i32, i32) {
    %c0_i32 = arith.constant 0 : i32
    %c0_i32_0 = arith.constant 0 : i32
    %c0_i32_1 = arith.constant 0 : i32
    return %c0_i32, %c0_i32_0 : i32, i32
  }
  func.func @transform_5(%arg0: i32) -> (i32, i32) {
    %c0_i32 = arith.constant 0 : i32
    %c0_i32_0 = arith.constant 0 : i32
    %c0_i32_1 = arith.constant 0 : i32
    return %c0_i32, %c0_i32_0 : i32, i32
  }
  func.func @transform_6(%arg0: i32) -> (i32, i32) {
    %c0_i32 = arith.constant 0 : i32
    %c0_i32_0 = arith.constant 0 : i32
    %c0_i32_1 = arith.constant 0 : i32
    return %c0_i32, %c0_i32_0 : i32, i32
  }
  func.func @transform_7(%arg0: i32) -> (i32, i32) {
    %c0_i32 = arith.constant 0 : i32
    %c0_i32_0 = arith.constant 0 : i32
    %c0_i32_1 = arith.constant 0 : i32
    return %c0_i32, %c0_i32_0 : i32, i32
  }
  func.func @transform_8(%arg0: i32) -> (i32, i32) {
    %c0_i32 = arith.constant 0 : i32
    %c0_i32_0 = arith.constant 0 : i32
    %c0_i32_1 = arith.constant 0 : i32
    return %c0_i32, %c0_i32_0 : i32, i32
  }
  func.func @transform_9(%arg0: i32) -> (i32, i32) {
    %c0_i32 = arith.constant 0 : i32
    %c0_i32_0 = arith.constant 0 : i32
    %c0_i32_1 = arith.constant 0 : i32
    return %c0_i32, %c0_i32_0 : i32, i32
  }
  func.func @transform_10(%arg0: i32) -> (i32, i32) {
    %c0_i32 = arith.constant 0 : i32
    %c0_i32_0 = arith.constant 0 : i32
    %c0_i32_1 = arith.constant 0 : i32
    return %c0_i32, %c0_i32_0 : i32, i32
  }
  func.func @transform_11(%arg0: i32) -> (i32, i32) {
    %c0_i32 = arith.constant 0 : i32
    %c0_i32_0 = arith.constant 0 : i32
    %c0_i32_1 = arith.constant 0 : i32
    return %c0_i32, %c0_i32_0 : i32, i32
  }
  func.func @transform_12(%arg0: i32) -> (i32, i32) {
    %c0_i32 = arith.constant 0 : i32
    %c0_i32_0 = arith.constant 0 : i32
    %c0_i32_1 = arith.constant 0 : i32
    return %c0_i32, %c0_i32_0 : i32, i32
  }
  func.func @transform_13(%arg0: i32) -> (i32, i32) {
    %c0_i32 = arith.constant 0 : i32
    %c0_i32_0 = arith.constant 0 : i32
    %c0_i32_1 = arith.constant 0 : i32
    return %c0_i32, %c0_i32_0 : i32, i32
  }
  func.func @transform_14(%arg0: i32) -> (i32, i32) {
    %c0_i32 = arith.constant 0 : i32
    %c0_i32_0 = arith.constant 0 : i32
    %c0_i32_1 = arith.constant 0 : i32
    return %c0_i32, %c0_i32_0 : i32, i32
  }
  func.func @transform_15(%arg0: i32) -> (i32, i32) {
    %c0_i32 = arith.constant 0 : i32
    %c0_i32_0 = arith.constant 0 : i32
    %c0_i32_1 = arith.constant 0 : i32
    return %c0_i32, %c0_i32_0 : i32, i32
  }
  func.func @transform_16(%arg0: i32) -> (i32, i32) {
    %c0_i32 = arith.constant 0 : i32
    %c0_i32_0 = arith.constant 0 : i32
    %c0_i32_1 = arith.constant 0 : i32
    return %c0_i32, %c0_i32_0 : i32, i32
  }
  func.func @transform_17(%arg0: i32) -> (i32, i32) {
    %c0_i32 = arith.constant 0 : i32
    %c0_i32_0 = arith.constant 0 : i32
    %c0_i32_1 = arith.constant 0 : i32
    return %c0_i32, %c0_i32_0 : i32, i32
  }
  func.func @transform_18(%arg0: i32) -> (i32, i32) {
    %c0_i32 = arith.constant 0 : i32
    %c0_i32_0 = arith.constant 0 : i32
    %c0_i32_1 = arith.constant 0 : i32
    return %c0_i32, %c0_i32_0 : i32, i32
  }
  func.func @transform_19(%arg0: i32) -> (i32, i32) {
    %c0_i32 = arith.constant 0 : i32
    %c0_i32_0 = arith.constant 0 : i32
    %c0_i32_1 = arith.constant 0 : i32
    return %c0_i32, %c0_i32_0 : i32, i32
  }
  func.func @transform_20(%arg0: i32) -> (i32, i32) {
    %c0_i32 = arith.constant 0 : i32
    %c0_i32_0 = arith.constant 0 : i32
    %c0_i32_1 = arith.constant 0 : i32
    return %c0_i32, %c0_i32_0 : i32, i32
  }
  func.func @transform_21(%arg0: i32) -> (i32, i32) {
    %c0_i32 = arith.constant 0 : i32
    %c0_i32_0 = arith.constant 0 : i32
    %c0_i32_1 = arith.constant 0 : i32
    return %c0_i32, %c0_i32_0 : i32, i32
  }
  func.func @transform_22(%arg0: i32) -> (i32, i32) {
    %c0_i32 = arith.constant 0 : i32
    %c0_i32_0 = arith.constant 0 : i32
    %c0_i32_1 = arith.constant 0 : i32
    return %c0_i32, %c0_i32_0 : i32, i32
  }
  func.func @transform_23(%arg0: i32) -> (i32, i32) {
    %c0_i32 = arith.constant 0 : i32
    %c0_i32_0 = arith.constant 0 : i32
    %c0_i32_1 = arith.constant 0 : i32
    return %c0_i32, %c0_i32_0 : i32, i32
  }
  func.func @transform_24(%arg0: i32) -> (i32, i32, i32) {
    %c0_i32 = arith.constant 0 : i32
    %c0_i32_0 = arith.constant 0 : i32
    %c0_i32_1 = arith.constant 0 : i32
    return %arg0, %c0_i32, %c0_i32_0 : i32, i32, i32
  }
  func.func @transform_25(%arg0: i32) -> (i32, i32, i32) {
    %c0_i32 = arith.constant 0 : i32
    %c0_i32_0 = arith.constant 0 : i32
    %c0_i32_1 = arith.constant 0 : i32
    return %arg0, %c0_i32, %c0_i32_0 : i32, i32, i32
  }
}

module attributes {stable_mosaic.version = 11 : i64} {
  func.func @kernel(%arg0: i32, %arg1: memref<1x8x32xf32, #tpu.memory_space<vmem>>, %arg2: memref<1x16x32xf32, #tpu.memory_space<vmem>>, %arg3: memref<1x1x8xf32, #tpu.memory_space<vmem>>, %arg4: memref<8x8xf32, #tpu.memory_space<vmem>>, %arg5: memref<32x96xf32, #tpu.memory_space<vmem>>, %arg6: memref<1x96xf32, #tpu.memory_space<vmem>>, %arg7: memref<32x32xf32, #tpu.memory_space<vmem>>, %arg8: memref<1x32xf32, #tpu.memory_space<vmem>>, %arg9: memref<1x32xf32, #tpu.memory_space<vmem>>, %arg10: memref<1x32xf32, #tpu.memory_space<vmem>>, %arg11: memref<32x32xf32, #tpu.memory_space<vmem>>, %arg12: memref<1x32xf32, #tpu.memory_space<vmem>>, %arg13: memref<32x64xf32, #tpu.memory_space<vmem>>, %arg14: memref<1x64xf32, #tpu.memory_space<vmem>>, %arg15: memref<32x32xf32, #tpu.memory_space<vmem>>, %arg16: memref<1x32xf32, #tpu.memory_space<vmem>>, %arg17: memref<1x32xf32, #tpu.memory_space<vmem>>, %arg18: memref<1x32xf32, #tpu.memory_space<vmem>>, %arg19: memref<32x64xf32, #tpu.memory_space<vmem>>, %arg20: memref<1x64xf32, #tpu.memory_space<vmem>>, %arg21: memref<64x32xf32, #tpu.memory_space<vmem>>, %arg22: memref<1x32xf32, #tpu.memory_space<vmem>>, %arg23: memref<1x32xf32, #tpu.memory_space<vmem>>, %arg24: memref<1x32xf32, #tpu.memory_space<vmem>>, %arg25: memref<1x8x32xf32, #tpu.memory_space<vmem>>, %arg26: memref<1x8x16xf32, #tpu.memory_space<vmem>>, %arg27: memref<8x32xf32, #tpu.memory_space<vmem>>, %arg28: memref<1x8x16xf32, #tpu.memory_space<vmem>>) attributes {dimension_semantics = [#tpu.dimension_semantics<parallel>], iteration_bounds = array<i64: 2>, scalar_prefetch = 0 : i64, scratch_operands = 2 : i64, tpu.core_type = #tpu.core_type<tc>, window_params = [{transform_indices = @transform_0, window_bounds = array<i64: 1, 8, 32>}, {transform_indices = @transform_1, window_bounds = array<i64: 1, 16, 32>}, {transform_indices = @transform_2, window_bounds = array<i64: 1, 1, 8>}, {pipeline_mode = #tpu.pipeline_mode<synchronous>, transform_indices = @transform_3, window_bounds = array<i64: 8, 8>}, {pipeline_mode = #tpu.pipeline_mode<synchronous>, transform_indices = @transform_4, window_bounds = array<i64: 32, 96>}, {pipeline_mode = #tpu.pipeline_mode<synchronous>, transform_indices = @transform_5, window_bounds = array<i64: 1, 96>}, {pipeline_mode = #tpu.pipeline_mode<synchronous>, transform_indices = @transform_6, window_bounds = array<i64: 32, 32>}, {pipeline_mode = #tpu.pipeline_mode<synchronous>, transform_indices = @transform_7, window_bounds = array<i64: 1, 32>}, {pipeline_mode = #tpu.pipeline_mode<synchronous>, transform_indices = @transform_8, window_bounds = array<i64: 1, 32>}, {pipeline_mode = #tpu.pipeline_mode<synchronous>, transform_indices = @transform_9, window_bounds = array<i64: 1, 32>}, {pipeline_mode = #tpu.pipeline_mode<synchronous>, transform_indices = @transform_10, window_bounds = array<i64: 32, 32>}, {pipeline_mode = #tpu.pipeline_mode<synchronous>, transform_indices = @transform_11, window_bounds = array<i64: 1, 32>}, {pipeline_mode = #tpu.pipeline_mode<synchronous>, transform_indices = @transform_12, window_bounds = array<i64: 32, 64>}, {pipeline_mode = #tpu.pipeline_mode<synchronous>, transform_indices = @transform_13, window_bounds = array<i64: 1, 64>}, {pipeline_mode = #tpu.pipeline_mode<synchronous>, transform_indices = @transform_14, window_bounds = array<i64: 32, 32>}, {pipeline_mode = #tpu.pipeline_mode<synchronous>, transform_indices = @transform_15, window_bounds = array<i64: 1, 32>}, {pipeline_mode = #tpu.pipeline_mode<synchronous>, transform_indices = @transform_16, window_bounds = array<i64: 1, 32>}, {pipeline_mode = #tpu.pipeline_mode<synchronous>, transform_indices = @transform_17, window_bounds = array<i64: 1, 32>}, {pipeline_mode = #tpu.pipeline_mode<synchronous>, transform_indices = @transform_18, window_bounds = array<i64: 32, 64>}, {pipeline_mode = #tpu.pipeline_mode<synchronous>, transform_indices = @transform_19, window_bounds = array<i64: 1, 64>}, {pipeline_mode = #tpu.pipeline_mode<synchronous>, transform_indices = @transform_20, window_bounds = array<i64: 64, 32>}, {pipeline_mode = #tpu.pipeline_mode<synchronous>, transform_indices = @transform_21, window_bounds = array<i64: 1, 32>}, {pipeline_mode = #tpu.pipeline_mode<synchronous>, transform_indices = @transform_22, window_bounds = array<i64: 1, 32>}, {pipeline_mode = #tpu.pipeline_mode<synchronous>, transform_indices = @transform_23, window_bounds = array<i64: 1, 32>}, {transform_indices = @transform_24, window_bounds = array<i64: 1, 8, 32>}, {transform_indices = @transform_25, window_bounds = array<i64: 1, 8, 16>}]} {
    %c0 = arith.constant 0 : index
    %c0_0 = arith.constant 0 : index
    %c0_1 = arith.constant 0 : index
    %0 = vector.load %arg1[%c0, %c0_0, %c0_1] : memref<1x8x32xf32, #tpu.memory_space<vmem>>, vector<1x8x32xf32>
    %1 = vector.shape_cast %0 : vector<1x8x32xf32> to vector<8x32xf32>
    %c0_2 = arith.constant 0 : index
    %c0_3 = arith.constant 0 : index
    %c0_4 = arith.constant 0 : index
    %2 = vector.load %arg2[%c0_2, %c0_3, %c0_4] : memref<1x16x32xf32, #tpu.memory_space<vmem>>, vector<1x16x32xf32>
    %3 = vector.shape_cast %2 : vector<1x16x32xf32> to vector<16x32xf32>
    %c0_5 = arith.constant 0 : index
    %c0_6 = arith.constant 0 : index
    %4 = vector.load %arg4[%c0_5, %c0_6] : memref<8x8xf32, #tpu.memory_space<vmem>>, vector<8x8xf32>
    %5 = vector.shape_cast %4 : vector<8x8xf32> to vector<1x8x8xf32>
    %c0_7 = arith.constant 0 : index
    %c0_8 = arith.constant 0 : index
    %c0_9 = arith.constant 0 : index
    %6 = vector.load %arg3[%c0_7, %c0_8, %c0_9] : memref<1x1x8xf32, #tpu.memory_space<vmem>>, vector<1x1x8xf32>
    %7 = vector.broadcast %6 : vector<1x1x8xf32> to vector<1x8x8xf32>
    %8 = arith.addf %5, %7 : vector<1x8x8xf32>
    %c0_10 = arith.constant 0 : index
    %c0_11 = arith.constant 0 : index
    %9 = vector.load %arg5[%c0_10, %c0_11] : memref<32x96xf32, #tpu.memory_space<vmem>>, vector<32x96xf32>
    %cst = arith.constant dense<0.000000e+00> : vector<8x96xf32>
    %10 = tpu.matmul %1, %9, %cst {dimension_numbers = #tpu.dot_dimension_numbers<[1], [0], [0], [1], [0, 0, 1, 1], [], []>} : vector<8x32xf32>, vector<32x96xf32>, vector<8x96xf32> -> vector<8x96xf32>
    %c0_12 = arith.constant 0 : index
    %c0_13 = arith.constant 0 : index
    %11 = vector.load %arg6[%c0_12, %c0_13] : memref<1x96xf32, #tpu.memory_space<vmem>>, vector<1x96xf32>
    %12 = vector.broadcast %11 : vector<1x96xf32> to vector<8x96xf32>
    %13 = arith.addf %10, %12 : vector<8x96xf32>
    %14 = vector.extract_strided_slice %13 {offsets = [0, 0], sizes = [8, 32], strides = [1, 1]} : vector<8x96xf32> to vector<8x32xf32>
    %15 = vector.shape_cast %14 : vector<8x32xf32> to vector<1x8x32xf32>
    %16 = vector.extract_strided_slice %13 {offsets = [0, 32], sizes = [8, 32], strides = [1, 1]} : vector<8x96xf32> to vector<8x32xf32>
    %17 = vector.shape_cast %16 : vector<8x32xf32> to vector<1x8x32xf32>
    %18 = vector.extract_strided_slice %13 {offsets = [0, 64], sizes = [8, 32], strides = [1, 1]} : vector<8x96xf32> to vector<8x32xf32>
    %19 = vector.shape_cast %18 : vector<8x32xf32> to vector<1x8x32xf32>
    %20 = vector.extract_strided_slice %15 {offsets = [0, 0, 0], sizes = [1, 8, 8], strides = [1, 1, 1]} : vector<1x8x32xf32> to vector<1x8x8xf32>
    %21 = vector.extract_strided_slice %17 {offsets = [0, 0, 0], sizes = [1, 8, 8], strides = [1, 1, 1]} : vector<1x8x32xf32> to vector<1x8x8xf32>
    "tpu.trace_start"() <{level = 10 : i32, message = "bqd,bkd->bqk"}> : () -> ()
    %cst_14 = arith.constant dense<0.000000e+00> : vector<1x8x8xf32>
    %22 = tpu.matmul %20, %21, %cst_14 {dimension_numbers = #tpu.dot_dimension_numbers<[2], [2], [1], [1], [0, 0, 0, 1, 1, 1], [0], [0]>} : vector<1x8x8xf32>, vector<1x8x8xf32>, vector<1x8x8xf32> -> vector<1x8x8xf32>
    "tpu.trace_stop"() : () -> ()
    %23 = arith.addf %22, %8 : vector<1x8x8xf32>
    %cst_15 = arith.constant dense<0xFF800000> : vector<1x8xf32>
    %24 = vector.multi_reduction <maximumf>, %23, %cst_15 [2] : vector<1x8x8xf32> to vector<1x8xf32>
    %25 = vector.shape_cast %24 : vector<1x8xf32> to vector<1x8x1xf32>
    %26 = vector.broadcast %25 : vector<1x8x1xf32> to vector<1x8x8xf32>
    %27 = arith.subf %23, %26 : vector<1x8x8xf32>
    %28 = math.exp %27 : vector<1x8x8xf32>
    %cst_16 = arith.constant dense<0.000000e+00> : vector<1x8xf32>
    %29 = vector.multi_reduction <add>, %28, %cst_16 [2] : vector<1x8x8xf32> to vector<1x8xf32>
    %30 = vector.shape_cast %29 : vector<1x8xf32> to vector<1x8x1xf32>
    %31 = tpu.reciprocal %30 {approx = true} : vector<1x8x1xf32> -> vector<1x8x1xf32>
    %32 = vector.broadcast %31 : vector<1x8x1xf32> to vector<1x8x8xf32>
    %33 = arith.mulf %28, %32 : vector<1x8x8xf32>
    %34 = vector.extract_strided_slice %19 {offsets = [0, 0, 0], sizes = [1, 8, 8], strides = [1, 1, 1]} : vector<1x8x32xf32> to vector<1x8x8xf32>
    "tpu.trace_start"() <{level = 10 : i32, message = "bqk,bkd->bqd"}> : () -> ()
    %cst_17 = arith.constant dense<0.000000e+00> : vector<1x8x8xf32>
    %35 = tpu.matmul %33, %34, %cst_17 {dimension_numbers = #tpu.dot_dimension_numbers<[2], [1], [1], [2], [0, 0, 0, 1, 1, 2], [0], [0]>} : vector<1x8x8xf32>, vector<1x8x8xf32>, vector<1x8x8xf32> -> vector<1x8x8xf32>
    "tpu.trace_stop"() : () -> ()
    %36 = vector.shape_cast %35 : vector<1x8x8xf32> to vector<8x8xf32>
    %c0_18 = arith.constant 0 : index
    %c0_19 = arith.constant 0 : index
    %37 = vector.load %arg27[%c0_18, %c0_19] : memref<8x32xf32, #tpu.memory_space<vmem>>, vector<8x8xf32>
    tpu.vector_store %arg27[%c0_18, %c0_19], %36 {strides = array<i32>} : memref<8x32xf32, #tpu.memory_space<vmem>>, vector<8x8xf32>,
    %38 = vector.extract_strided_slice %15 {offsets = [0, 0, 8], sizes = [1, 8, 8], strides = [1, 1, 1]} : vector<1x8x32xf32> to vector<1x8x8xf32>
    %39 = vector.extract_strided_slice %17 {offsets = [0, 0, 8], sizes = [1, 8, 8], strides = [1, 1, 1]} : vector<1x8x32xf32> to vector<1x8x8xf32>
    "tpu.trace_start"() <{level = 10 : i32, message = "bqd,bkd->bqk"}> : () -> ()
    %cst_20 = arith.constant dense<0.000000e+00> : vector<1x8x8xf32>
    %40 = tpu.matmul %38, %39, %cst_20 {dimension_numbers = #tpu.dot_dimension_numbers<[2], [2], [1], [1], [0, 0, 0, 1, 1, 1], [0], [0]>} : vector<1x8x8xf32>, vector<1x8x8xf32>, vector<1x8x8xf32> -> vector<1x8x8xf32>
    "tpu.trace_stop"() : () -> ()
    %41 = arith.addf %40, %8 : vector<1x8x8xf32>
    %cst_21 = arith.constant dense<0xFF800000> : vector<1x8xf32>
    %42 = vector.multi_reduction <maximumf>, %41, %cst_21 [2] : vector<1x8x8xf32> to vector<1x8xf32>
    %43 = vector.shape_cast %42 : vector<1x8xf32> to vector<1x8x1xf32>
    %44 = vector.broadcast %43 : vector<1x8x1xf32> to vector<1x8x8xf32>
    %45 = arith.subf %41, %44 : vector<1x8x8xf32>
    %46 = math.exp %45 : vector<1x8x8xf32>
    %cst_22 = arith.constant dense<0.000000e+00> : vector<1x8xf32>
    %47 = vector.multi_reduction <add>, %46, %cst_22 [2] : vector<1x8x8xf32> to vector<1x8xf32>
    %48 = vector.shape_cast %47 : vector<1x8xf32> to vector<1x8x1xf32>
    %49 = tpu.reciprocal %48 {approx = true} : vector<1x8x1xf32> -> vector<1x8x1xf32>
    %50 = vector.broadcast %49 : vector<1x8x1xf32> to vector<1x8x8xf32>
    %51 = arith.mulf %46, %50 : vector<1x8x8xf32>
    %52 = vector.extract_strided_slice %19 {offsets = [0, 0, 8], sizes = [1, 8, 8], strides = [1, 1, 1]} : vector<1x8x32xf32> to vector<1x8x8xf32>
    "tpu.trace_start"() <{level = 10 : i32, message = "bqk,bkd->bqd"}> : () -> ()
    %cst_23 = arith.constant dense<0.000000e+00> : vector<1x8x8xf32>
    %53 = tpu.matmul %51, %52, %cst_23 {dimension_numbers = #tpu.dot_dimension_numbers<[2], [1], [1], [2], [0, 0, 0, 1, 1, 2], [0], [0]>} : vector<1x8x8xf32>, vector<1x8x8xf32>, vector<1x8x8xf32> -> vector<1x8x8xf32>
    "tpu.trace_stop"() : () -> ()
    %54 = vector.shape_cast %53 : vector<1x8x8xf32> to vector<8x8xf32>
    %c0_24 = arith.constant 0 : index
    %c8 = arith.constant 8 : index
    %55 = vector.load %arg27[%c0_24, %c8] : memref<8x32xf32, #tpu.memory_space<vmem>>, vector<8x8xf32>
    tpu.vector_store %arg27[%c0_24, %c8], %54 {strides = array<i32>} : memref<8x32xf32, #tpu.memory_space<vmem>>, vector<8x8xf32>,
    %56 = vector.extract_strided_slice %15 {offsets = [0, 0, 16], sizes = [1, 8, 8], strides = [1, 1, 1]} : vector<1x8x32xf32> to vector<1x8x8xf32>
    %57 = vector.extract_strided_slice %17 {offsets = [0, 0, 16], sizes = [1, 8, 8], strides = [1, 1, 1]} : vector<1x8x32xf32> to vector<1x8x8xf32>
    "tpu.trace_start"() <{level = 10 : i32, message = "bqd,bkd->bqk"}> : () -> ()
    %cst_25 = arith.constant dense<0.000000e+00> : vector<1x8x8xf32>
    %58 = tpu.matmul %56, %57, %cst_25 {dimension_numbers = #tpu.dot_dimension_numbers<[2], [2], [1], [1], [0, 0, 0, 1, 1, 1], [0], [0]>} : vector<1x8x8xf32>, vector<1x8x8xf32>, vector<1x8x8xf32> -> vector<1x8x8xf32>
    "tpu.trace_stop"() : () -> ()
    %59 = arith.addf %58, %8 : vector<1x8x8xf32>
    %cst_26 = arith.constant dense<0xFF800000> : vector<1x8xf32>
    %60 = vector.multi_reduction <maximumf>, %59, %cst_26 [2] : vector<1x8x8xf32> to vector<1x8xf32>
    %61 = vector.shape_cast %60 : vector<1x8xf32> to vector<1x8x1xf32>
    %62 = vector.broadcast %61 : vector<1x8x1xf32> to vector<1x8x8xf32>
    %63 = arith.subf %59, %62 : vector<1x8x8xf32>
    %64 = math.exp %63 : vector<1x8x8xf32>
    %cst_27 = arith.constant dense<0.000000e+00> : vector<1x8xf32>
    %65 = vector.multi_reduction <add>, %64, %cst_27 [2] : vector<1x8x8xf32> to vector<1x8xf32>
    %66 = vector.shape_cast %65 : vector<1x8xf32> to vector<1x8x1xf32>
    %67 = tpu.reciprocal %66 {approx = true} : vector<1x8x1xf32> -> vector<1x8x1xf32>
    %68 = vector.broadcast %67 : vector<1x8x1xf32> to vector<1x8x8xf32>
    %69 = arith.mulf %64, %68 : vector<1x8x8xf32>
    %70 = vector.extract_strided_slice %19 {offsets = [0, 0, 16], sizes = [1, 8, 8], strides = [1, 1, 1]} : vector<1x8x32xf32> to vector<1x8x8xf32>
    "tpu.trace_start"() <{level = 10 : i32, message = "bqk,bkd->bqd"}> : () -> ()
    %cst_28 = arith.constant dense<0.000000e+00> : vector<1x8x8xf32>
    %71 = tpu.matmul %69, %70, %cst_28 {dimension_numbers = #tpu.dot_dimension_numbers<[2], [1], [1], [2], [0, 0, 0, 1, 1, 2], [0], [0]>} : vector<1x8x8xf32>, vector<1x8x8xf32>, vector<1x8x8xf32> -> vector<1x8x8xf32>
    "tpu.trace_stop"() : () -> ()
    %72 = vector.shape_cast %71 : vector<1x8x8xf32> to vector<8x8xf32>
    %c0_29 = arith.constant 0 : index
    %c16 = arith.constant 16 : index
    %73 = vector.load %arg27[%c0_29, %c16] : memref<8x32xf32, #tpu.memory_space<vmem>>, vector<8x8xf32>
    tpu.vector_store %arg27[%c0_29, %c16], %72 {strides = array<i32>} : memref<8x32xf32, #tpu.memory_space<vmem>>, vector<8x8xf32>,
    %74 = vector.extract_strided_slice %15 {offsets = [0, 0, 24], sizes = [1, 8, 8], strides = [1, 1, 1]} : vector<1x8x32xf32> to vector<1x8x8xf32>
    %75 = vector.extract_strided_slice %17 {offsets = [0, 0, 24], sizes = [1, 8, 8], strides = [1, 1, 1]} : vector<1x8x32xf32> to vector<1x8x8xf32>
    "tpu.trace_start"() <{level = 10 : i32, message = "bqd,bkd->bqk"}> : () -> ()
    %cst_30 = arith.constant dense<0.000000e+00> : vector<1x8x8xf32>
    %76 = tpu.matmul %74, %75, %cst_30 {dimension_numbers = #tpu.dot_dimension_numbers<[2], [2], [1], [1], [0, 0, 0, 1, 1, 1], [0], [0]>} : vector<1x8x8xf32>, vector<1x8x8xf32>, vector<1x8x8xf32> -> vector<1x8x8xf32>
    "tpu.trace_stop"() : () -> ()
    %77 = arith.addf %76, %8 : vector<1x8x8xf32>
    %cst_31 = arith.constant dense<0xFF800000> : vector<1x8xf32>
    %78 = vector.multi_reduction <maximumf>, %77, %cst_31 [2] : vector<1x8x8xf32> to vector<1x8xf32>
    %79 = vector.shape_cast %78 : vector<1x8xf32> to vector<1x8x1xf32>
    %80 = vector.broadcast %79 : vector<1x8x1xf32> to vector<1x8x8xf32>
    %81 = arith.subf %77, %80 : vector<1x8x8xf32>
    %82 = math.exp %81 : vector<1x8x8xf32>
    %cst_32 = arith.constant dense<0.000000e+00> : vector<1x8xf32>
    %83 = vector.multi_reduction <add>, %82, %cst_32 [2] : vector<1x8x8xf32> to vector<1x8xf32>
    %84 = vector.shape_cast %83 : vector<1x8xf32> to vector<1x8x1xf32>
    %85 = tpu.reciprocal %84 {approx = true} : vector<1x8x1xf32> -> vector<1x8x1xf32>
    %86 = vector.broadcast %85 : vector<1x8x1xf32> to vector<1x8x8xf32>
    %87 = arith.mulf %82, %86 : vector<1x8x8xf32>
    %88 = vector.extract_strided_slice %19 {offsets = [0, 0, 24], sizes = [1, 8, 8], strides = [1, 1, 1]} : vector<1x8x32xf32> to vector<1x8x8xf32>
    "tpu.trace_start"() <{level = 10 : i32, message = "bqk,bkd->bqd"}> : () -> ()
    %cst_33 = arith.constant dense<0.000000e+00> : vector<1x8x8xf32>
    %89 = tpu.matmul %87, %88, %cst_33 {dimension_numbers = #tpu.dot_dimension_numbers<[2], [1], [1], [2], [0, 0, 0, 1, 1, 2], [0], [0]>} : vector<1x8x8xf32>, vector<1x8x8xf32>, vector<1x8x8xf32> -> vector<1x8x8xf32>
    "tpu.trace_stop"() : () -> ()
    %90 = vector.shape_cast %89 : vector<1x8x8xf32> to vector<8x8xf32>
    %c0_34 = arith.constant 0 : index
    %c24 = arith.constant 24 : index
    %91 = vector.load %arg27[%c0_34, %c24] : memref<8x32xf32, #tpu.memory_space<vmem>>, vector<8x8xf32>
    tpu.vector_store %arg27[%c0_34, %c24], %90 {strides = array<i32>} : memref<8x32xf32, #tpu.memory_space<vmem>>, vector<8x8xf32>,
    %c0_35 = arith.constant 0 : index
    %c0_36 = arith.constant 0 : index
    %92 = vector.load %arg27[%c0_35, %c0_36] : memref<8x32xf32, #tpu.memory_space<vmem>>, vector<8x32xf32>
    %c0_37 = arith.constant 0 : index
    %c0_38 = arith.constant 0 : index
    %93 = vector.load %arg7[%c0_37, %c0_38] : memref<32x32xf32, #tpu.memory_space<vmem>>, vector<32x32xf32>
    %cst_39 = arith.constant dense<0.000000e+00> : vector<8x32xf32>
    %94 = tpu.matmul %92, %93, %cst_39 {dimension_numbers = #tpu.dot_dimension_numbers<[1], [0], [0], [1], [0, 0, 1, 1], [], []>} : vector<8x32xf32>, vector<32x32xf32>, vector<8x32xf32> -> vector<8x32xf32>
    %c0_40 = arith.constant 0 : index
    %c0_41 = arith.constant 0 : index
    %95 = vector.load %arg8[%c0_40, %c0_41] : memref<1x32xf32, #tpu.memory_space<vmem>>, vector<1x32xf32>
    %96 = vector.broadcast %95 : vector<1x32xf32> to vector<8x32xf32>
    %97 = arith.addf %94, %96 : vector<8x32xf32>
    %98 = arith.addf %1, %97 : vector<8x32xf32>
    %cst_42 = arith.constant dense<0.000000e+00> : vector<8xf32>
    %99 = vector.multi_reduction <add>, %98, %cst_42 [1] : vector<8x32xf32> to vector<8xf32>
    %100 = vector.shape_cast %99 : vector<8xf32> to vector<8x1xf32>
    %cst_43 = arith.constant 3.200000e+01 : f32
    %101 = vector.broadcast %cst_43 : f32 to vector<8x1xf32>
    %102 = arith.divf %100, %101 : vector<8x1xf32>
    %103 = vector.broadcast %102 : vector<8x1xf32> to vector<8x32xf32>
    %104 = arith.subf %98, %103 : vector<8x32xf32>
    %105 = arith.mulf %104, %104 : vector<8x32xf32>
    %cst_44 = arith.constant dense<0.000000e+00> : vector<8xf32>
    %106 = vector.multi_reduction <add>, %105, %cst_44 [1] : vector<8x32xf32> to vector<8xf32>
    %107 = vector.shape_cast %106 : vector<8xf32> to vector<8x1xf32>
    %cst_45 = arith.constant 3.200000e+01 : f32
    %108 = vector.broadcast %cst_45 : f32 to vector<8x1xf32>
    %109 = arith.divf %107, %108 : vector<8x1xf32>
    %110 = vector.broadcast %102 : vector<8x1xf32> to vector<8x32xf32>
    %111 = arith.subf %98, %110 : vector<8x32xf32>
    %cst_46 = arith.constant 9.99999974E-6 : f32
    %112 = vector.broadcast %cst_46 : f32 to vector<8x1xf32>
    %113 = arith.addf %109, %112 : vector<8x1xf32>
    %114 = math.rsqrt %113 : vector<8x1xf32>
    %115 = vector.broadcast %114 : vector<8x1xf32> to vector<8x32xf32>
    %116 = arith.mulf %111, %115 : vector<8x32xf32>
    %c0_47 = arith.constant 0 : index
    %c0_48 = arith.constant 0 : index
    %117 = vector.load %arg9[%c0_47, %c0_48] : memref<1x32xf32, #tpu.memory_space<vmem>>, vector<1x32xf32>
    %118 = vector.broadcast %117 : vector<1x32xf32> to vector<8x32xf32>
    %119 = arith.mulf %116, %118 : vector<8x32xf32>
    %c0_49 = arith.constant 0 : index
    %c0_50 = arith.constant 0 : index
    %120 = vector.load %arg10[%c0_49, %c0_50] : memref<1x32xf32, #tpu.memory_space<vmem>>, vector<1x32xf32>
    %121 = vector.broadcast %120 : vector<1x32xf32> to vector<8x32xf32>
    %122 = arith.addf %119, %121 : vector<8x32xf32>
    %c0_51 = arith.constant 0 : index
    %c0_52 = arith.constant 0 : index
    %123 = vector.load %arg11[%c0_51, %c0_52] : memref<32x32xf32, #tpu.memory_space<vmem>>, vector<32x32xf32>
    %cst_53 = arith.constant dense<0.000000e+00> : vector<8x32xf32>
    %124 = tpu.matmul %122, %123, %cst_53 {dimension_numbers = #tpu.dot_dimension_numbers<[1], [0], [0], [1], [0, 0, 1, 1], [], []>} : vector<8x32xf32>, vector<32x32xf32>, vector<8x32xf32> -> vector<8x32xf32>
    %c0_54 = arith.constant 0 : index
    %c0_55 = arith.constant 0 : index
    %125 = vector.load %arg12[%c0_54, %c0_55] : memref<1x32xf32, #tpu.memory_space<vmem>>, vector<1x32xf32>
    %126 = vector.broadcast %125 : vector<1x32xf32> to vector<8x32xf32>
    %127 = arith.addf %124, %126 : vector<8x32xf32>
    %128 = vector.shape_cast %127 : vector<8x32xf32> to vector<1x8x32xf32>
    %c0_56 = arith.constant 0 : index
    %c0_57 = arith.constant 0 : index
    %129 = vector.load %arg13[%c0_56, %c0_57] : memref<32x64xf32, #tpu.memory_space<vmem>>, vector<32x64xf32>
    %cst_58 = arith.constant dense<0.000000e+00> : vector<16x64xf32>
    %130 = tpu.matmul %3, %129, %cst_58 {dimension_numbers = #tpu.dot_dimension_numbers<[1], [0], [0], [1], [0, 0, 1, 1], [], []>} : vector<16x32xf32>, vector<32x64xf32>, vector<16x64xf32> -> vector<16x64xf32>
    %c0_59 = arith.constant 0 : index
    %c0_60 = arith.constant 0 : index
    %131 = vector.load %arg14[%c0_59, %c0_60] : memref<1x64xf32, #tpu.memory_space<vmem>>, vector<1x64xf32>
    %132 = vector.broadcast %131 : vector<1x64xf32> to vector<16x64xf32>
    %133 = arith.addf %130, %132 : vector<16x64xf32>
    %134 = vector.extract_strided_slice %133 {offsets = [0, 0], sizes = [16, 32], strides = [1, 1]} : vector<16x64xf32> to vector<16x32xf32>
    %135 = vector.shape_cast %134 : vector<16x32xf32> to vector<1x16x32xf32>
    %136 = vector.extract_strided_slice %133 {offsets = [0, 32], sizes = [16, 32], strides = [1, 1]} : vector<16x64xf32> to vector<16x32xf32>
    %137 = vector.shape_cast %136 : vector<16x32xf32> to vector<1x16x32xf32>
    %138 = vector.extract_strided_slice %128 {offsets = [0, 0, 0], sizes = [1, 8, 8], strides = [1, 1, 1]} : vector<1x8x32xf32> to vector<1x8x8xf32>
    %139 = vector.extract_strided_slice %135 {offsets = [0, 0, 0], sizes = [1, 16, 8], strides = [1, 1, 1]} : vector<1x16x32xf32> to vector<1x16x8xf32>
    "tpu.trace_start"() <{level = 10 : i32, message = "bqd,bkd->bqk"}> : () -> ()
    %cst_61 = arith.constant dense<0.000000e+00> : vector<1x8x16xf32>
    %140 = tpu.matmul %138, %139, %cst_61 {dimension_numbers = #tpu.dot_dimension_numbers<[2], [2], [1], [1], [0, 0, 0, 1, 1, 1], [0], [0]>} : vector<1x8x8xf32>, vector<1x16x8xf32>, vector<1x8x16xf32> -> vector<1x8x16xf32>
    "tpu.trace_stop"() : () -> ()
    %cst_62 = arith.constant dense<0xFF800000> : vector<1x8xf32>
    %141 = vector.multi_reduction <maximumf>, %140, %cst_62 [2] : vector<1x8x16xf32> to vector<1x8xf32>
    %142 = vector.shape_cast %141 : vector<1x8xf32> to vector<1x8x1xf32>
    %143 = vector.broadcast %142 : vector<1x8x1xf32> to vector<1x8x16xf32>
    %144 = arith.subf %140, %143 : vector<1x8x16xf32>
    %145 = math.exp %144 : vector<1x8x16xf32>
    %cst_63 = arith.constant dense<0.000000e+00> : vector<1x8xf32>
    %146 = vector.multi_reduction <add>, %145, %cst_63 [2] : vector<1x8x16xf32> to vector<1x8xf32>
    %147 = vector.shape_cast %146 : vector<1x8xf32> to vector<1x8x1xf32>
    %148 = vector.broadcast %147 : vector<1x8x1xf32> to vector<1x8x16xf32>
    %149 = arith.divf %145, %148 : vector<1x8x16xf32>
    %c0_64 = arith.constant 0 : index
    %c0_65 = arith.constant 0 : index
    %c0_66 = arith.constant 0 : index
    %150 = vector.load %arg28[%c0_64, %c0_65, %c0_66] : memref<1x8x16xf32, #tpu.memory_space<vmem>>, vector<1x8x16xf32>
    tpu.vector_store %arg28[%c0_64, %c0_65, %c0_66], %149 {strides = array<i32>} : memref<1x8x16xf32, #tpu.memory_space<vmem>>, vector<1x8x16xf32>,
    %151 = vector.extract_strided_slice %137 {offsets = [0, 0, 0], sizes = [1, 16, 8], strides = [1, 1, 1]} : vector<1x16x32xf32> to vector<1x16x8xf32>
    "tpu.trace_start"() <{level = 10 : i32, message = "bqk,bkd->bqd"}> : () -> ()
    %cst_67 = arith.constant dense<0.000000e+00> : vector<1x8x8xf32>
    %152 = tpu.matmul %149, %151, %cst_67 {dimension_numbers = #tpu.dot_dimension_numbers<[2], [1], [1], [2], [0, 0, 0, 1, 1, 2], [0], [0]>} : vector<1x8x16xf32>, vector<1x16x8xf32>, vector<1x8x8xf32> -> vector<1x8x8xf32>
    "tpu.trace_stop"() : () -> ()
    %153 = vector.shape_cast %152 : vector<1x8x8xf32> to vector<8x8xf32>
    %c0_68 = arith.constant 0 : index
    %c0_69 = arith.constant 0 : index
    %154 = vector.load %arg27[%c0_68, %c0_69] : memref<8x32xf32, #tpu.memory_space<vmem>>, vector<8x8xf32>
    tpu.vector_store %arg27[%c0_68, %c0_69], %153 {strides = array<i32>} : memref<8x32xf32, #tpu.memory_space<vmem>>, vector<8x8xf32>,
    %155 = vector.extract_strided_slice %128 {offsets = [0, 0, 8], sizes = [1, 8, 8], strides = [1, 1, 1]} : vector<1x8x32xf32> to vector<1x8x8xf32>
    %156 = vector.extract_strided_slice %135 {offsets = [0, 0, 8], sizes = [1, 16, 8], strides = [1, 1, 1]} : vector<1x16x32xf32> to vector<1x16x8xf32>
    "tpu.trace_start"() <{level = 10 : i32, message = "bqd,bkd->bqk"}> : () -> ()
    %cst_70 = arith.constant dense<0.000000e+00> : vector<1x8x16xf32>
    %157 = tpu.matmul %155, %156, %cst_70 {dimension_numbers = #tpu.dot_dimension_numbers<[2], [2], [1], [1], [0, 0, 0, 1, 1, 1], [0], [0]>} : vector<1x8x8xf32>, vector<1x16x8xf32>, vector<1x8x16xf32> -> vector<1x8x16xf32>
    "tpu.trace_stop"() : () -> ()
    %cst_71 = arith.constant dense<0xFF800000> : vector<1x8xf32>
    %158 = vector.multi_reduction <maximumf>, %157, %cst_71 [2] : vector<1x8x16xf32> to vector<1x8xf32>
    %159 = vector.shape_cast %158 : vector<1x8xf32> to vector<1x8x1xf32>
    %160 = vector.broadcast %159 : vector<1x8x1xf32> to vector<1x8x16xf32>
    %161 = arith.subf %157, %160 : vector<1x8x16xf32>
    %162 = math.exp %161 : vector<1x8x16xf32>
    %cst_72 = arith.constant dense<0.000000e+00> : vector<1x8xf32>
    %163 = vector.multi_reduction <add>, %162, %cst_72 [2] : vector<1x8x16xf32> to vector<1x8xf32>
    %164 = vector.shape_cast %163 : vector<1x8xf32> to vector<1x8x1xf32>
    %165 = vector.broadcast %164 : vector<1x8x1xf32> to vector<1x8x16xf32>
    %166 = arith.divf %162, %165 : vector<1x8x16xf32>
    %c0_73 = arith.constant 0 : index
    %c0_74 = arith.constant 0 : index
    %c0_75 = arith.constant 0 : index
    %167 = vector.load %arg28[%c0_73, %c0_74, %c0_75] : memref<1x8x16xf32, #tpu.memory_space<vmem>>, vector<1x8x16xf32>
    %168 = arith.addf %167, %166 : vector<1x8x16xf32>
    %c0_76 = arith.constant 0 : index
    %c0_77 = arith.constant 0 : index
    %c0_78 = arith.constant 0 : index
    %169 = vector.load %arg28[%c0_76, %c0_77, %c0_78] : memref<1x8x16xf32, #tpu.memory_space<vmem>>, vector<1x8x16xf32>
    tpu.vector_store %arg28[%c0_76, %c0_77, %c0_78], %168 {strides = array<i32>} : memref<1x8x16xf32, #tpu.memory_space<vmem>>, vector<1x8x16xf32>,
    %170 = vector.extract_strided_slice %137 {offsets = [0, 0, 8], sizes = [1, 16, 8], strides = [1, 1, 1]} : vector<1x16x32xf32> to vector<1x16x8xf32>
    "tpu.trace_start"() <{level = 10 : i32, message = "bqk,bkd->bqd"}> : () -> ()
    %cst_79 = arith.constant dense<0.000000e+00> : vector<1x8x8xf32>
    %171 = tpu.matmul %166, %170, %cst_79 {dimension_numbers = #tpu.dot_dimension_numbers<[2], [1], [1], [2], [0, 0, 0, 1, 1, 2], [0], [0]>} : vector<1x8x16xf32>, vector<1x16x8xf32>, vector<1x8x8xf32> -> vector<1x8x8xf32>
    "tpu.trace_stop"() : () -> ()
    %172 = vector.shape_cast %171 : vector<1x8x8xf32> to vector<8x8xf32>
    %c0_80 = arith.constant 0 : index
    %c8_81 = arith.constant 8 : index
    %173 = vector.load %arg27[%c0_80, %c8_81] : memref<8x32xf32, #tpu.memory_space<vmem>>, vector<8x8xf32>
    tpu.vector_store %arg27[%c0_80, %c8_81], %172 {strides = array<i32>} : memref<8x32xf32, #tpu.memory_space<vmem>>, vector<8x8xf32>,
    %174 = vector.extract_strided_slice %128 {offsets = [0, 0, 16], sizes = [1, 8, 8], strides = [1, 1, 1]} : vector<1x8x32xf32> to vector<1x8x8xf32>
    %175 = vector.extract_strided_slice %135 {offsets = [0, 0, 16], sizes = [1, 16, 8], strides = [1, 1, 1]} : vector<1x16x32xf32> to vector<1x16x8xf32>
    "tpu.trace_start"() <{level = 10 : i32, message = "bqd,bkd->bqk"}> : () -> ()
    %cst_82 = arith.constant dense<0.000000e+00> : vector<1x8x16xf32>
    %176 = tpu.matmul %174, %175, %cst_82 {dimension_numbers = #tpu.dot_dimension_numbers<[2], [2], [1], [1], [0, 0, 0, 1, 1, 1], [0], [0]>} : vector<1x8x8xf32>, vector<1x16x8xf32>, vector<1x8x16xf32> -> vector<1x8x16xf32>
    "tpu.trace_stop"() : () -> ()
    %cst_83 = arith.constant dense<0xFF800000> : vector<1x8xf32>
    %177 = vector.multi_reduction <maximumf>, %176, %cst_83 [2] : vector<1x8x16xf32> to vector<1x8xf32>
    %178 = vector.shape_cast %177 : vector<1x8xf32> to vector<1x8x1xf32>
    %179 = vector.broadcast %178 : vector<1x8x1xf32> to vector<1x8x16xf32>
    %180 = arith.subf %176, %179 : vector<1x8x16xf32>
    %181 = math.exp %180 : vector<1x8x16xf32>
    %cst_84 = arith.constant dense<0.000000e+00> : vector<1x8xf32>
    %182 = vector.multi_reduction <add>, %181, %cst_84 [2] : vector<1x8x16xf32> to vector<1x8xf32>
    %183 = vector.shape_cast %182 : vector<1x8xf32> to vector<1x8x1xf32>
    %184 = vector.broadcast %183 : vector<1x8x1xf32> to vector<1x8x16xf32>
    %185 = arith.divf %181, %184 : vector<1x8x16xf32>
    %c0_85 = arith.constant 0 : index
    %c0_86 = arith.constant 0 : index
    %c0_87 = arith.constant 0 : index
    %186 = vector.load %arg28[%c0_85, %c0_86, %c0_87] : memref<1x8x16xf32, #tpu.memory_space<vmem>>, vector<1x8x16xf32>
    %187 = arith.addf %186, %185 : vector<1x8x16xf32>
    %c0_88 = arith.constant 0 : index
    %c0_89 = arith.constant 0 : index
    %c0_90 = arith.constant 0 : index
    %188 = vector.load %arg28[%c0_88, %c0_89, %c0_90] : memref<1x8x16xf32, #tpu.memory_space<vmem>>, vector<1x8x16xf32>
    tpu.vector_store %arg28[%c0_88, %c0_89, %c0_90], %187 {strides = array<i32>} : memref<1x8x16xf32, #tpu.memory_space<vmem>>, vector<1x8x16xf32>,
    %189 = vector.extract_strided_slice %137 {offsets = [0, 0, 16], sizes = [1, 16, 8], strides = [1, 1, 1]} : vector<1x16x32xf32> to vector<1x16x8xf32>
    "tpu.trace_start"() <{level = 10 : i32, message = "bqk,bkd->bqd"}> : () -> ()
    %cst_91 = arith.constant dense<0.000000e+00> : vector<1x8x8xf32>
    %190 = tpu.matmul %185, %189, %cst_91 {dimension_numbers = #tpu.dot_dimension_numbers<[2], [1], [1], [2], [0, 0, 0, 1, 1, 2], [0], [0]>} : vector<1x8x16xf32>, vector<1x16x8xf32>, vector<1x8x8xf32> -> vector<1x8x8xf32>
    "tpu.trace_stop"() : () -> ()
    %191 = vector.shape_cast %190 : vector<1x8x8xf32> to vector<8x8xf32>
    %c0_92 = arith.constant 0 : index
    %c16_93 = arith.constant 16 : index
    %192 = vector.load %arg27[%c0_92, %c16_93] : memref<8x32xf32, #tpu.memory_space<vmem>>, vector<8x8xf32>
    tpu.vector_store %arg27[%c0_92, %c16_93], %191 {strides = array<i32>} : memref<8x32xf32, #tpu.memory_space<vmem>>, vector<8x8xf32>,
    %193 = vector.extract_strided_slice %128 {offsets = [0, 0, 24], sizes = [1, 8, 8], strides = [1, 1, 1]} : vector<1x8x32xf32> to vector<1x8x8xf32>
    %194 = vector.extract_strided_slice %135 {offsets = [0, 0, 24], sizes = [1, 16, 8], strides = [1, 1, 1]} : vector<1x16x32xf32> to vector<1x16x8xf32>
    "tpu.trace_start"() <{level = 10 : i32, message = "bqd,bkd->bqk"}> : () -> ()
    %cst_94 = arith.constant dense<0.000000e+00> : vector<1x8x16xf32>
    %195 = tpu.matmul %193, %194, %cst_94 {dimension_numbers = #tpu.dot_dimension_numbers<[2], [2], [1], [1], [0, 0, 0, 1, 1, 1], [0], [0]>} : vector<1x8x8xf32>, vector<1x16x8xf32>, vector<1x8x16xf32> -> vector<1x8x16xf32>
    "tpu.trace_stop"() : () -> ()
    %cst_95 = arith.constant dense<0xFF800000> : vector<1x8xf32>
    %196 = vector.multi_reduction <maximumf>, %195, %cst_95 [2] : vector<1x8x16xf32> to vector<1x8xf32>
    %197 = vector.shape_cast %196 : vector<1x8xf32> to vector<1x8x1xf32>
    %198 = vector.broadcast %197 : vector<1x8x1xf32> to vector<1x8x16xf32>
    %199 = arith.subf %195, %198 : vector<1x8x16xf32>
    %200 = math.exp %199 : vector<1x8x16xf32>
    %cst_96 = arith.constant dense<0.000000e+00> : vector<1x8xf32>
    %201 = vector.multi_reduction <add>, %200, %cst_96 [2] : vector<1x8x16xf32> to vector<1x8xf32>
    %202 = vector.shape_cast %201 : vector<1x8xf32> to vector<1x8x1xf32>
    %203 = vector.broadcast %202 : vector<1x8x1xf32> to vector<1x8x16xf32>
    %204 = arith.divf %200, %203 : vector<1x8x16xf32>
    %c0_97 = arith.constant 0 : index
    %c0_98 = arith.constant 0 : index
    %c0_99 = arith.constant 0 : index
    %205 = vector.load %arg28[%c0_97, %c0_98, %c0_99] : memref<1x8x16xf32, #tpu.memory_space<vmem>>, vector<1x8x16xf32>
    %206 = arith.addf %205, %204 : vector<1x8x16xf32>
    %c0_100 = arith.constant 0 : index
    %c0_101 = arith.constant 0 : index
    %c0_102 = arith.constant 0 : index
    %207 = vector.load %arg28[%c0_100, %c0_101, %c0_102] : memref<1x8x16xf32, #tpu.memory_space<vmem>>, vector<1x8x16xf32>
    tpu.vector_store %arg28[%c0_100, %c0_101, %c0_102], %206 {strides = array<i32>} : memref<1x8x16xf32, #tpu.memory_space<vmem>>, vector<1x8x16xf32>,
    %208 = vector.extract_strided_slice %137 {offsets = [0, 0, 24], sizes = [1, 16, 8], strides = [1, 1, 1]} : vector<1x16x32xf32> to vector<1x16x8xf32>
    "tpu.trace_start"() <{level = 10 : i32, message = "bqk,bkd->bqd"}> : () -> ()
    %cst_103 = arith.constant dense<0.000000e+00> : vector<1x8x8xf32>
    %209 = tpu.matmul %204, %208, %cst_103 {dimension_numbers = #tpu.dot_dimension_numbers<[2], [1], [1], [2], [0, 0, 0, 1, 1, 2], [0], [0]>} : vector<1x8x16xf32>, vector<1x16x8xf32>, vector<1x8x8xf32> -> vector<1x8x8xf32>
    "tpu.trace_stop"() : () -> ()
    %210 = vector.shape_cast %209 : vector<1x8x8xf32> to vector<8x8xf32>
    %c0_104 = arith.constant 0 : index
    %c24_105 = arith.constant 24 : index
    %211 = vector.load %arg27[%c0_104, %c24_105] : memref<8x32xf32, #tpu.memory_space<vmem>>, vector<8x8xf32>
    tpu.vector_store %arg27[%c0_104, %c24_105], %210 {strides = array<i32>} : memref<8x32xf32, #tpu.memory_space<vmem>>, vector<8x8xf32>,
    %c0_106 = arith.constant 0 : index
    %c0_107 = arith.constant 0 : index
    %212 = vector.load %arg27[%c0_106, %c0_107] : memref<8x32xf32, #tpu.memory_space<vmem>>, vector<8x32xf32>
    %c0_108 = arith.constant 0 : index
    %c0_109 = arith.constant 0 : index
    %213 = vector.load %arg15[%c0_108, %c0_109] : memref<32x32xf32, #tpu.memory_space<vmem>>, vector<32x32xf32>
    %cst_110 = arith.constant dense<0.000000e+00> : vector<8x32xf32>
    %214 = tpu.matmul %212, %213, %cst_110 {dimension_numbers = #tpu.dot_dimension_numbers<[1], [0], [0], [1], [0, 0, 1, 1], [], []>} : vector<8x32xf32>, vector<32x32xf32>, vector<8x32xf32> -> vector<8x32xf32>
    %c0_111 = arith.constant 0 : index
    %c0_112 = arith.constant 0 : index
    %215 = vector.load %arg16[%c0_111, %c0_112] : memref<1x32xf32, #tpu.memory_space<vmem>>, vector<1x32xf32>
    %216 = vector.broadcast %215 : vector<1x32xf32> to vector<8x32xf32>
    %217 = arith.addf %214, %216 : vector<8x32xf32>
    %218 = arith.addf %122, %217 : vector<8x32xf32>
    %cst_113 = arith.constant dense<0.000000e+00> : vector<8xf32>
    %219 = vector.multi_reduction <add>, %218, %cst_113 [1] : vector<8x32xf32> to vector<8xf32>
    %220 = vector.shape_cast %219 : vector<8xf32> to vector<8x1xf32>
    %cst_114 = arith.constant 3.200000e+01 : f32
    %221 = vector.broadcast %cst_114 : f32 to vector<8x1xf32>
    %222 = arith.divf %220, %221 : vector<8x1xf32>
    %223 = vector.broadcast %222 : vector<8x1xf32> to vector<8x32xf32>
    %224 = arith.subf %218, %223 : vector<8x32xf32>
    %225 = arith.mulf %224, %224 : vector<8x32xf32>
    %cst_115 = arith.constant dense<0.000000e+00> : vector<8xf32>
    %226 = vector.multi_reduction <add>, %225, %cst_115 [1] : vector<8x32xf32> to vector<8xf32>
    %227 = vector.shape_cast %226 : vector<8xf32> to vector<8x1xf32>
    %cst_116 = arith.constant 3.200000e+01 : f32
    %228 = vector.broadcast %cst_116 : f32 to vector<8x1xf32>
    %229 = arith.divf %227, %228 : vector<8x1xf32>
    %230 = vector.broadcast %222 : vector<8x1xf32> to vector<8x32xf32>
    %231 = arith.subf %218, %230 : vector<8x32xf32>
    %cst_117 = arith.constant 9.99999974E-6 : f32
    %232 = vector.broadcast %cst_117 : f32 to vector<8x1xf32>
    %233 = arith.addf %229, %232 : vector<8x1xf32>
    %234 = math.rsqrt %233 : vector<8x1xf32>
    %235 = vector.broadcast %234 : vector<8x1xf32> to vector<8x32xf32>
    %236 = arith.mulf %231, %235 : vector<8x32xf32>
    %c0_118 = arith.constant 0 : index
    %c0_119 = arith.constant 0 : index
    %237 = vector.load %arg17[%c0_118, %c0_119] : memref<1x32xf32, #tpu.memory_space<vmem>>, vector<1x32xf32>
    %238 = vector.broadcast %237 : vector<1x32xf32> to vector<8x32xf32>
    %239 = arith.mulf %236, %238 : vector<8x32xf32>
    %c0_120 = arith.constant 0 : index
    %c0_121 = arith.constant 0 : index
    %240 = vector.load %arg18[%c0_120, %c0_121] : memref<1x32xf32, #tpu.memory_space<vmem>>, vector<1x32xf32>
    %241 = vector.broadcast %240 : vector<1x32xf32> to vector<8x32xf32>
    %242 = arith.addf %239, %241 : vector<8x32xf32>
    %c0_122 = arith.constant 0 : index
    %c0_123 = arith.constant 0 : index
    %243 = vector.load %arg19[%c0_122, %c0_123] : memref<32x64xf32, #tpu.memory_space<vmem>>, vector<32x64xf32>
    %cst_124 = arith.constant dense<0.000000e+00> : vector<8x64xf32>
    %244 = tpu.matmul %242, %243, %cst_124 {dimension_numbers = #tpu.dot_dimension_numbers<[1], [0], [0], [1], [0, 0, 1, 1], [], []>} : vector<8x32xf32>, vector<32x64xf32>, vector<8x64xf32> -> vector<8x64xf32>
    %c0_125 = arith.constant 0 : index
    %c0_126 = arith.constant 0 : index
    %245 = vector.load %arg20[%c0_125, %c0_126] : memref<1x64xf32, #tpu.memory_space<vmem>>, vector<1x64xf32>
    %246 = vector.broadcast %245 : vector<1x64xf32> to vector<8x64xf32>
    %247 = arith.addf %244, %246 : vector<8x64xf32>
    %cst_127 = arith.constant 0.000000e+00 : f32
    %248 = vector.broadcast %cst_127 : f32 to vector<8x64xf32>
    %249 = arith.maximumf %247, %248 : vector<8x64xf32>
    %c0_128 = arith.constant 0 : index
    %c0_129 = arith.constant 0 : index
    %250 = vector.load %arg21[%c0_128, %c0_129] : memref<64x32xf32, #tpu.memory_space<vmem>>, vector<64x32xf32>
    %cst_130 = arith.constant dense<0.000000e+00> : vector<8x32xf32>
    %251 = tpu.matmul %249, %250, %cst_130 {dimension_numbers = #tpu.dot_dimension_numbers<[1], [0], [0], [1], [0, 0, 1, 1], [], []>} : vector<8x64xf32>, vector<64x32xf32>, vector<8x32xf32> -> vector<8x32xf32>
    %c0_131 = arith.constant 0 : index
    %c0_132 = arith.constant 0 : index
    %252 = vector.load %arg22[%c0_131, %c0_132] : memref<1x32xf32, #tpu.memory_space<vmem>>, vector<1x32xf32>
    %253 = vector.broadcast %252 : vector<1x32xf32> to vector<8x32xf32>
    %254 = arith.addf %251, %253 : vector<8x32xf32>
    %255 = arith.addf %242, %254 : vector<8x32xf32>
    %cst_133 = arith.constant dense<0.000000e+00> : vector<8xf32>
    %256 = vector.multi_reduction <add>, %255, %cst_133 [1] : vector<8x32xf32> to vector<8xf32>
    %257 = vector.shape_cast %256 : vector<8xf32> to vector<8x1xf32>
    %cst_134 = arith.constant 3.200000e+01 : f32
    %258 = vector.broadcast %cst_134 : f32 to vector<8x1xf32>
    %259 = arith.divf %257, %258 : vector<8x1xf32>
    %260 = vector.broadcast %259 : vector<8x1xf32> to vector<8x32xf32>
    %261 = arith.subf %255, %260 : vector<8x32xf32>
    %262 = arith.mulf %261, %261 : vector<8x32xf32>
    %cst_135 = arith.constant dense<0.000000e+00> : vector<8xf32>
    %263 = vector.multi_reduction <add>, %262, %cst_135 [1] : vector<8x32xf32> to vector<8xf32>
    %264 = vector.shape_cast %263 : vector<8xf32> to vector<8x1xf32>
    %cst_136 = arith.constant 3.200000e+01 : f32
    %265 = vector.broadcast %cst_136 : f32 to vector<8x1xf32>
    %266 = arith.divf %264, %265 : vector<8x1xf32>
    %267 = vector.broadcast %259 : vector<8x1xf32> to vector<8x32xf32>
    %268 = arith.subf %255, %267 : vector<8x32xf32>
    %cst_137 = arith.constant 9.99999974E-6 : f32
    %269 = vector.broadcast %cst_137 : f32 to vector<8x1xf32>
    %270 = arith.addf %266, %269 : vector<8x1xf32>
    %271 = math.rsqrt %270 : vector<8x1xf32>
    %272 = vector.broadcast %271 : vector<8x1xf32> to vector<8x32xf32>
    %273 = arith.mulf %268, %272 : vector<8x32xf32>
    %c0_138 = arith.constant 0 : index
    %c0_139 = arith.constant 0 : index
    %274 = vector.load %arg23[%c0_138, %c0_139] : memref<1x32xf32, #tpu.memory_space<vmem>>, vector<1x32xf32>
    %275 = vector.broadcast %274 : vector<1x32xf32> to vector<8x32xf32>
    %276 = arith.mulf %273, %275 : vector<8x32xf32>
    %c0_140 = arith.constant 0 : index
    %c0_141 = arith.constant 0 : index
    %277 = vector.load %arg24[%c0_140, %c0_141] : memref<1x32xf32, #tpu.memory_space<vmem>>, vector<1x32xf32>
    %278 = vector.broadcast %277 : vector<1x32xf32> to vector<8x32xf32>
    %279 = arith.addf %276, %278 : vector<8x32xf32>
    %280 = vector.shape_cast %279 : vector<8x32xf32> to vector<1x8x32xf32>
    %c0_142 = arith.constant 0 : index
    %c0_143 = arith.constant 0 : index
    %c0_144 = arith.constant 0 : index
    %281 = vector.load %arg25[%c0_142, %c0_143, %c0_144] : memref<1x8x32xf32, #tpu.memory_space<vmem>>, vector<1x8x32xf32>
    tpu.vector_store %arg25[%c0_142, %c0_143, %c0_144], %280 {strides = array<i32>} : memref<1x8x32xf32, #tpu.memory_space<vmem>>, vector<1x8x32xf32>,
    %c0_145 = arith.constant 0 : index
    %c0_146 = arith.constant 0 : index
    %c0_147 = arith.constant 0 : index
    %282 = vector.load %arg28[%c0_145, %c0_146, %c0_147] : memref<1x8x16xf32, #tpu.memory_space<vmem>>, vector<1x8x16xf32>
    %cst_148 = arith.constant 2.500000e-01 : f32
    %283 = vector.broadcast %cst_148 : f32 to vector<1x8x16xf32>
    %284 = arith.mulf %282, %283 : vector<1x8x16xf32>
    %c0_149 = arith.constant 0 : index
    %c0_150 = arith.constant 0 : index
    %c0_151 = arith.constant 0 : index
    %285 = vector.load %arg26[%c0_149, %c0_150, %c0_151] : memref<1x8x16xf32, #tpu.memory_space<vmem>>, vector<1x8x16xf32>
    tpu.vector_store %arg26[%c0_149, %c0_150, %c0_151], %284 {strides = array<i32>} : memref<1x8x16xf32, #tpu.memory_space<vmem>>, vector<1x8x16xf32>,
    return
  }
  func.func @transform_0(%arg0: i32) -> (i32, i32, i32) {
    %c0_i32 = arith.constant 0 : i32
    %c0_i32_0 = arith.constant 0 : i32
    %c0_i32_1 = arith.constant 0 : i32
    return %arg0, %c0_i32, %c0_i32_0 : i32, i32, i32
  }
  func.func @transform_1(%arg0: i32) -> (i32, i32, i32) {
    %c0_i32 = arith.constant 0 : i32
    %c0_i32_0 = arith.constant 0 : i32
    %c0_i32_1 = arith.constant 0 : i32
    return %arg0, %c0_i32, %c0_i32_0 : i32, i32, i32
  }
  func.func @transform_2(%arg0: i32) -> (i32, i32, i32) {
    %c0_i32 = arith.constant 0 : i32
    %c0_i32_0 = arith.constant 0 : i32
    %c0_i32_1 = arith.constant 0 : i32
    return %arg0, %c0_i32, %c0_i32_0 : i32, i32, i32
  }
  func.func @transform_3(%arg0: i32) -> (i32, i32) {
    %c0_i32 = arith.constant 0 : i32
    %c0_i32_0 = arith.constant 0 : i32
    %c0_i32_1 = arith.constant 0 : i32
    return %c0_i32, %c0_i32_0 : i32, i32
  }
  func.func @transform_4(%arg0: i32) -> (i32, i32) {
    %c0_i32 = arith.constant 0 : i32
    %c0_i32_0 = arith.constant 0 : i32
    %c0_i32_1 = arith.constant 0 : i32
    return %c0_i32, %c0_i32_0 : i32, i32
  }
  func.func @transform_5(%arg0: i32) -> (i32, i32) {
    %c0_i32 = arith.constant 0 : i32
    %c0_i32_0 = arith.constant 0 : i32
    %c0_i32_1 = arith.constant 0 : i32
    return %c0_i32, %c0_i32_0 : i32, i32
  }
  func.func @transform_6(%arg0: i32) -> (i32, i32) {
    %c0_i32 = arith.constant 0 : i32
    %c0_i32_0 = arith.constant 0 : i32
    %c0_i32_1 = arith.constant 0 : i32
    return %c0_i32, %c0_i32_0 : i32, i32
  }
  func.func @transform_7(%arg0: i32) -> (i32, i32) {
    %c0_i32 = arith.constant 0 : i32
    %c0_i32_0 = arith.constant 0 : i32
    %c0_i32_1 = arith.constant 0 : i32
    return %c0_i32, %c0_i32_0 : i32, i32
  }
  func.func @transform_8(%arg0: i32) -> (i32, i32) {
    %c0_i32 = arith.constant 0 : i32
    %c0_i32_0 = arith.constant 0 : i32
    %c0_i32_1 = arith.constant 0 : i32
    return %c0_i32, %c0_i32_0 : i32, i32
  }
  func.func @transform_9(%arg0: i32) -> (i32, i32) {
    %c0_i32 = arith.constant 0 : i32
    %c0_i32_0 = arith.constant 0 : i32
    %c0_i32_1 = arith.constant 0 : i32
    return %c0_i32, %c0_i32_0 : i32, i32
  }
  func.func @transform_10(%arg0: i32) -> (i32, i32) {
    %c0_i32 = arith.constant 0 : i32
    %c0_i32_0 = arith.constant 0 : i32
    %c0_i32_1 = arith.constant 0 : i32
    return %c0_i32, %c0_i32_0 : i32, i32
  }
  func.func @transform_11(%arg0: i32) -> (i32, i32) {
    %c0_i32 = arith.constant 0 : i32
    %c0_i32_0 = arith.constant 0 : i32
    %c0_i32_1 = arith.constant 0 : i32
    return %c0_i32, %c0_i32_0 : i32, i32
  }
  func.func @transform_12(%arg0: i32) -> (i32, i32) {
    %c0_i32 = arith.constant 0 : i32
    %c0_i32_0 = arith.constant 0 : i32
    %c0_i32_1 = arith.constant 0 : i32
    return %c0_i32, %c0_i32_0 : i32, i32
  }
  func.func @transform_13(%arg0: i32) -> (i32, i32) {
    %c0_i32 = arith.constant 0 : i32
    %c0_i32_0 = arith.constant 0 : i32
    %c0_i32_1 = arith.constant 0 : i32
    return %c0_i32, %c0_i32_0 : i32, i32
  }
  func.func @transform_14(%arg0: i32) -> (i32, i32) {
    %c0_i32 = arith.constant 0 : i32
    %c0_i32_0 = arith.constant 0 : i32
    %c0_i32_1 = arith.constant 0 : i32
    return %c0_i32, %c0_i32_0 : i32, i32
  }
  func.func @transform_15(%arg0: i32) -> (i32, i32) {
    %c0_i32 = arith.constant 0 : i32
    %c0_i32_0 = arith.constant 0 : i32
    %c0_i32_1 = arith.constant 0 : i32
    return %c0_i32, %c0_i32_0 : i32, i32
  }
  func.func @transform_16(%arg0: i32) -> (i32, i32) {
    %c0_i32 = arith.constant 0 : i32
    %c0_i32_0 = arith.constant 0 : i32
    %c0_i32_1 = arith.constant 0 : i32
    return %c0_i32, %c0_i32_0 : i32, i32
  }
  func.func @transform_17(%arg0: i32) -> (i32, i32) {
    %c0_i32 = arith.constant 0 : i32
    %c0_i32_0 = arith.constant 0 : i32
    %c0_i32_1 = arith.constant 0 : i32
    return %c0_i32, %c0_i32_0 : i32, i32
  }
  func.func @transform_18(%arg0: i32) -> (i32, i32) {
    %c0_i32 = arith.constant 0 : i32
    %c0_i32_0 = arith.constant 0 : i32
    %c0_i32_1 = arith.constant 0 : i32
    return %c0_i32, %c0_i32_0 : i32, i32
  }
  func.func @transform_19(%arg0: i32) -> (i32, i32) {
    %c0_i32 = arith.constant 0 : i32
    %c0_i32_0 = arith.constant 0 : i32
    %c0_i32_1 = arith.constant 0 : i32
    return %c0_i32, %c0_i32_0 : i32, i32
  }
  func.func @transform_20(%arg0: i32) -> (i32, i32) {
    %c0_i32 = arith.constant 0 : i32
    %c0_i32_0 = arith.constant 0 : i32
    %c0_i32_1 = arith.constant 0 : i32
    return %c0_i32, %c0_i32_0 : i32, i32
  }
  func.func @transform_21(%arg0: i32) -> (i32, i32) {
    %c0_i32 = arith.constant 0 : i32
    %c0_i32_0 = arith.constant 0 : i32
    %c0_i32_1 = arith.constant 0 : i32
    return %c0_i32, %c0_i32_0 : i32, i32
  }
  func.func @transform_22(%arg0: i32) -> (i32, i32) {
    %c0_i32 = arith.constant 0 : i32
    %c0_i32_0 = arith.constant 0 : i32
    %c0_i32_1 = arith.constant 0 : i32
    return %c0_i32, %c0_i32_0 : i32, i32
  }
  func.func @transform_23(%arg0: i32) -> (i32, i32) {
    %c0_i32 = arith.constant 0 : i32
    %c0_i32_0 = arith.constant 0 : i32
    %c0_i32_1 = arith.constant 0 : i32
    return %c0_i32, %c0_i32_0 : i32, i32
  }
  func.func @transform_24(%arg0: i32) -> (i32, i32, i32) {
    %c0_i32 = arith.constant 0 : i32
    %c0_i32_0 = arith.constant 0 : i32
    %c0_i32_1 = arith.constant 0 : i32
    return %arg0, %c0_i32, %c0_i32_0 : i32, i32, i32
  }
  func.func @transform_25(%arg0: i32) -> (i32, i32, i32) {
    %c0_i32 = arith.constant 0 : i32
    %c0_i32_0 = arith.constant 0 : i32
    %c0_i32_1 = arith.constant 0 : i32
    return %arg0, %c0_i32, %c0_i32_0 : i32, i32, i32
  }
}

</mosaic_0001>

<bundles_post_ra>
// kernel: tpu_custom_call.1
= control target key start
LH: loop header
LB: loop body
LE: loop exit
PB: predicated region body
PF: predicated region fallthrough
CT: control target
= control target key end

     0   :  { %s5685_s0 = inlined_call_operand.hbm [shape: f32[2,8,32], index: 0, kind: input, shape index: {}]   ;;  %s5686_s1 = inlined_call_operand.vmem [shape: f32[2,16,32], index: 1, kind: input, shape index: {}]   ;;  %s5687_s2 = inlined_call_operand.hbm [shape: f32[2,1,8], index: 2, kind: input, shape index: {}]   ;;  %s5688_s3 = inlined_call_operand.hbm [shape: f32[8,8], index: 3, kind: input, shape index: {}]   ;;  %s5689_s4 = inlined_call_operand.vmem [shape: f32[32,96], index: 4, kind: input, shape index: {}]   ;;  %s5690_s5 = inlined_call_operand.hbm [shape: f32[1,96], index: 5, kind: input, shape index: {}]   ;;  %s5691_s6 = inlined_call_operand.vmem [shape: f32[32,32], index: 6, kind: input, shape index: {}]   ;;  %s5692_s7 = inlined_call_operand.hbm [shape: f32[1,32], index: 7, kind: input, shape index: {}]   ;;  %s5693_s8 = inlined_call_operand.hbm [shape: f32[1,32], index: 8, kind: input, shape index: {}]   ;;  %s5694_s9 = inlined_call_operand.hbm [shape: f32[1,32], index: 9, kind: input, shape index: {}]   ;;  %s5695_s10 = inlined_call_operand.vmem [shape: f32[32,32], index: 10, kind: input, shape index: {}]   ;;  %s5696_s11 = inlined_call_operand.hbm [shape: f32[1,32], index: 11, kind: input, shape index: {}]   ;;  %s5697_s12 = inlined_call_operand.hbm [shape: f32[32,64], index: 12, kind: input, shape index: {}]   ;;  %s5698_s13 = inlined_call_operand.hbm [shape: f32[1,64], index: 13, kind: input, shape index: {}]   ;;  %s5699_s14 = inlined_call_operand.hbm [shape: f32[32,32], index: 14, kind: input, shape index: {}]   ;;  %s5700_s15 = inlined_call_operand.hbm [shape: f32[1,32], index: 15, kind: input, shape index: {}]   ;;  %s5701_s16 = inlined_call_operand.hbm [shape: f32[1,32], index: 16, kind: input, shape index: {}]   ;;  %s5702_s17 = inlined_call_operand.hbm [shape: f32[1,32], index: 17, kind: input, shape index: {}]   ;;  %s5703_s18 = inlined_call_operand.hbm [shape: f32[32,64], index: 18, kind: input, shape index: {}]   ;;  %s5704_s19 = inlined_call_operand.vmem [shape: f32[1,64], index: 19, kind: input, shape index: {}]   ;;  %s5705_s20 = inlined_call_operand.vmem [shape: f32[64,32], index: 20, kind: input, shape index: {}]   ;;  %s5706_s21 = inlined_call_operand.vmem [shape: f32[1,32], index: 21, kind: input, shape index: {}]   ;;  %s5707_s22 = inlined_call_operand.vmem [shape: f32[1,32], index: 22, kind: input, shape index: {}]   ;;  %s5708_s23 = inlined_call_operand.vmem [shape: f32[1,32], index: 23, kind: input, shape index: {}]   ;;  %s5709_s24 = inlined_call_operand.hbm [shape: f32[2,8,32], index: 24, kind: output, shape index: {0}]   ;;  %s5710_s25 = inlined_call_operand.hbm [shape: f32[2,8,16], index: 25, kind: output, shape index: {1}]  }
   0x1   :  { %5745 = sst [smem:[#allocation42_spill]] %s5685_s0 }
   0x2   :  { %5746 = sst [smem:[#allocation43_spill]] %s5686_s1 }
   0x3   :  { %5747 = sst [smem:[#allocation44_spill]] %s5687_s2 }
   0x4   :  { %5748 = sst [smem:[#allocation45_spill]] %s5688_s3 }
   0x5   :  { %5749 = sst [smem:[#allocation46_spill]] %s5689_s4 }
   0x6   :  { %5750 = sst [smem:[#allocation47_spill]] %s5690_s5 }
   0x7   :  { %5751 = sst [smem:[#allocation48_spill]] %s5691_s6 }
   0x8   :  { %5752 = sst [smem:[#allocation49_spill]] %s5692_s7 }
   0x9   :  { %5753 = sst [smem:[#allocation50_spill]] %s5693_s8 }
   0xa   :  { %5754 = sst [smem:[#allocation51_spill]] %s5694_s9 }
   0xb   :  { %5755 = sst [smem:[#allocation52_spill]] %s5695_s10 }
   0xc   :  { %5756 = sst [smem:[#allocation53_spill]] %s5696_s11 }
   0xd   :  { %5757 = sst [smem:[#allocation54_spill]] %s5697_s12 }
   0xe   :  { %5758 = sst [smem:[#allocation55_spill]] %s5698_s13 }
   0xf   :  { %5759 = sst [smem:[#allocation56_spill]] %s5699_s14 }
  0x10   :  { %5760 = sst [smem:[#allocation57_spill]] %s5700_s15 }
  0x11   :  { %5761 = sst [smem:[#allocation58_spill]] %s5701_s16 }
  0x12   :  { %5762 = sst [smem:[#allocation59_spill]] %s5702_s17 }
  0x13   :  { %5763 = sst [smem:[#allocation60_spill]] %s5704_s19 }
  0x14   :  { %5764 = sst [smem:[#allocation61_spill]] %s5705_s20 }
  0x15   :  { %5765 = sst [smem:[#allocation62_spill]] %s5706_s21 }
  0x16   :  { %5766 = sst [smem:[#allocation63_spill]] %s5707_s22 }
  0x17   :  { %5767 = sst [smem:[#allocation64_spill]] %s5708_s23 }
  0x18   :  { %5768 = sst [smem:[#allocation65_spill]] %s5709_s24 }
  0x19   :  { %5769 = sst [smem:[#allocation66_spill]] %s5710_s25 }
  0x1a   :  { %31 = vsyncpa [#allocation5], 0 }
  0x1b   :  { %33 = vsyncpa [#allocation5 + $0x1], 0 }
  0x1c   :  { %34 = vsyncpa [#allocation8], 0 }
  0x1d   :  { %36 = vsyncpa [#allocation8 + $0x1], 0 }
  0x1e   :  { %37 = vsyncpa [#allocation11], 0 }
  0x1f   :  { %38 = vsyncpa [#allocation14], 0 }
  0x20   :  { %39 = vsyncpa [#allocation17], 0 }
  0x21   :  { %40 = vsyncpa [#allocation20], 0 }
  0x22   :  { %41 = vsyncpa [#allocation23], 0 }
  0x23   :  { %42 = vsyncpa [#allocation26], 0 }
  0x24   :  { %43 = vsyncpa [#allocation6], 0 }
  0x25   :  { %45 = vsyncpa [#allocation6 + $0x1], 0 }
  0x26   :  { %46 = vsyncpa [#allocation30], 0 }
  0x27   :  { %48 = vsyncpa [#allocation30 + $0x1], 0  ;;  %s4840_s29 = smov 0   ;;  %s4842_s2 = smov 0  }
  0x28   :  { %s4844_s6 = smov 0   ;;  %s4846_s30 = smov 0  }
  0x29 LB: > { %s4674_s7 = smov [#allocation9]   ;;  %s4861_s26 = sadd.s32 4294967295, %s4672_s30   ;;  %s4672_s30 = sphi %s4846_s30, %s5837_s30   ;;  %s4668_s6 = sphi %s4844_s6, %s5836_s6   ;;  %s4664_s2 = sphi %s4842_s2, %s5835_s2   ;;  %s4660_s29 = sphi %s4840_s29, %s5834_s29  }
  0x2a   : > { %s643_s3 = sshll.u32 %s4674_s7, 4  ;;  %p3406_p0 = scmp.ge.s32.totalorder %s4672_s30, 1  ;;  %s4866_s3 = int_to_ptr.vmem [resolvable:$true] %s643_s3 }
  0x2b   : > { %p5725_p1 = scmp.eq.s32.totalorder %s4861_s26, 0  ;;  %p630_p2 = scmp.lt.s32.totalorder %s4672_s30, 3 }
  0x2c   : > { %s4675_s8 = smov [#allocation10]   ;;  %s4676_s4 = smov [#allocation13]  }
  0x2d   : > { %p4868_p3 = pnand %p3406_p0, %p630_p2  ;;  %s657_s27 = sshll.u32 %s4675_s8, 4  ;;  %s4875_s27 = int_to_ptr.vmem [resolvable:$true] %s657_s27 }
  0x2e   : > { %s682_s28 = sshll.u32 %s4676_s4, 4  ;;  %s4677_s5 = smov [#allocation16]   ;;  %s4883_s28 = int_to_ptr.vmem [resolvable:$true] %s682_s28 }
  0x2f   : > { %s5770_s1 = scalar_select %p4868_p3, 1, 0 }
  0x30   : > { %p3899_p5 = pneg %p4868_p3  ;;  %s4885_s0 = sshll.u32 %s4677_s5, 4  ;;  %s708_s0 = int_to_ptr.vmem [resolvable:$true] %s4885_s0 }
  0x31   : > { %s5772_s23 = sld [smem:[#allocation45_spill]] }
  0x32   : > { %p4879_p6 = pnand %p3899_p5, %p5725_p1 }
  0x34   : > { %p4895_p8 = pneg %p4879_p6 }
  0x37   : > { %s4118_s22 = scalar_lea.hbm %s5772_s23, 128 }
  0x38   : > { %p4119_p7 = scmp.ne.s32.totalorder %s5772_s23, %s4118_s22  ;;  %p4125_p11 = scmp.lt.u32.totalorder %s4118_s22, %s5772_s23 }
  0x3a   : > { %p4121_p9 = pnand %p4895_p8, %p4119_p7 }
  0x3c   : > { %p4122_p10 = pneg %p4121_p9 }
  0x3e   : > { %p4127_p12 = pnand %p4125_p11, %p4122_p10 }
  0x40   : > { %4130 = shalt.err (!%p4127_p12)
}
  0x41   : > { %s4131_s24 = scalar_lea.vmem %s4866_s3, 128  ;;  %p4139_p5 = scmp.lt.s32.totalorder %s4866_s3, %s4866_s3 }
  0x42   : > { %p4132_p13 = scmp.ne.s32.totalorder %s4866_s3, %s4131_s24  ;;  %p4140_p4 = scmp.lt.s32.totalorder %s4131_s24, %s4131_s24 }
  0x44   : > { %p4134_p0 = pnand %p4132_p13, %p4895_p8  ;;  %p4141_p7 = por %p4140_p4, %p4139_p5 }
  0x46   : > { %p4135_p2 = pneg %p4134_p0 }
  0x48   : > { %p4142_p9 = pnand %p4141_p7, %p4135_p2 }
  0x4a   : > { %4145 = shalt.err (!%p4142_p9)
}
  0x4b   : > { %3902 = dma.hbm_to_vmem [thread:$0]  (!%p4879_p6), %s5772_s23, 128, %s4866_s3, [#allocation8]  }
  0x4c   : > { %s5774_s8 = sld [smem:[#allocation47_spill]] }
  0x52   : > { %s4146_s5 = scalar_lea.hbm %s5774_s8, 16 }
  0x53   : > { %p4147_p10 = scmp.ne.s32.totalorder %s5774_s8, %s4146_s5  ;;  %p4153_p12 = scmp.lt.u32.totalorder %s4146_s5, %s5774_s8 }
  0x55   : > { %p4149_p4 = pnand %p4147_p10, %p4895_p8 }
  0x57   : > { %p4150_p11 = pneg %p4149_p4 }
  0x59   : > { %p4155_p13 = pnand %p4153_p12, %p4150_p11 }
  0x5b   : > { %4158 = shalt.err (!%p4155_p13)
}
  0x5c   : > { %s4159_s3 = scalar_lea.vmem %s4875_s27, 16  ;;  %s4166_s19 = scalar_lea.vmem %s4875_s27, 32 }
  0x5d   : > { %p4160_p0 = scmp.ne.s32.totalorder %s4875_s27, %s4159_s3  ;;  %p4167_p7 = scmp.lt.s32.totalorder %s4875_s27, %s4875_s27 }
  0x5e   : > { %p4168_p9 = scmp.lt.s32.totalorder %s4166_s19, %s4159_s3 }
  0x5f   : > { %p4162_p2 = pnand %p4160_p0, %p4895_p8 }
  0x60   : > { %p4169_p10 = por %p4168_p9, %p4167_p7 }
  0x61   : > { %p4163_p5 = pneg %p4162_p2 }
  0x63   : > { %p4170_p4 = pnand %p4169_p10, %p4163_p5 }
  0x65   : > { %4173 = shalt.err (!%p4170_p4)
}
  0x66   : > { %3905 = dma.hbm_to_vmem [thread:$0]  (!%p4879_p6), %s5774_s8, 16, %s4875_s27, [#allocation11]  }
  0x67   : > { %s5775_s25 = sld [smem:[#allocation50_spill]] }
  0x6d   : > { %s4174_s7 = scalar_lea.hbm %s5775_s25, 16 }
  0x6e   : > { %p4175_p11 = scmp.ne.s32.totalorder %s5775_s25, %s4174_s7  ;;  %p4181_p0 = scmp.lt.u32.totalorder %s4174_s7, %s5775_s25 }
  0x70   : > { %p4177_p12 = pnand %p4175_p11, %p4895_p8 }
  0x72   : > { %p4178_p13 = pneg %p4177_p12 }
  0x74   : > { %p4183_p2 = pnand %p4181_p0, %p4178_p13 }
  0x76   : > { %4186 = shalt.err (!%p4183_p2)
}
  0x77   : > { %s4187_s27 = scalar_lea.vmem %s4883_s28, 16  ;;  %s4194_s10 = scalar_lea.vmem %s4883_s28, 32 }
  0x78   : > { %p4188_p5 = scmp.ne.s32.totalorder %s4883_s28, %s4187_s27  ;;  %p4195_p10 = scmp.lt.s32.totalorder %s4883_s28, %s4883_s28 }
  0x79   : > { %p4196_p4 = scmp.lt.s32.totalorder %s4194_s10, %s4187_s27 }
  0x7a   : > { %p4190_p7 = pnand %p4188_p5, %p4895_p8 }
  0x7b   : > { %p4197_p11 = por %p4196_p4, %p4195_p10 }
  0x7c   : > { %p4191_p9 = pneg %p4190_p7 }
  0x7e   : > { %p4198_p12 = pnand %p4197_p11, %p4191_p9 }
  0x80   : > { %4201 = shalt.err (!%p4198_p12)
}
  0x81   : > { %3911 = dma.hbm_to_vmem [thread:$0]  (!%p4879_p6), %s5775_s25, 16, %s4883_s28, [#allocation14]  }
  0x82   : > { %s4678_s22 = smov [#allocation19]   ;;  %s5776_s11 = sld [smem:[#allocation53_spill]] }
  0x83   : > { %s731_s7 = sshll.u32 %s4678_s22, 4  ;;  %s732_s7 = int_to_ptr.vmem [resolvable:$true] %s731_s7 }
  0x88   : > { %s4202_s3 = scalar_lea.hbm %s5776_s11, 16 }
  0x89   : > { %p4203_p13 = scmp.ne.s32.totalorder %s5776_s11, %s4202_s3  ;;  %p4209_p5 = scmp.lt.u32.totalorder %s4202_s3, %s5776_s11 }
  0x8b   : > { %p4205_p0 = pnand %p4203_p13, %p4895_p8 }
  0x8d   : > { %p4206_p2 = pneg %p4205_p0 }
  0x8f   : > { %p4211_p7 = pnand %p4209_p5, %p4206_p2 }
  0x91   : > { %4214 = shalt.err (!%p4211_p7)
}
  0x92   : > { %s4215_s28 = scalar_lea.vmem %s708_s0, 16  ;;  %s4222_s20 = scalar_lea.vmem %s708_s0, 32 }
  0x93   : > { %p4216_p9 = scmp.ne.s32.totalorder %s708_s0, %s4215_s28  ;;  %p4223_p11 = scmp.lt.s32.totalorder %s708_s0, %s708_s0 }
  0x94   : > { %p4224_p12 = scmp.lt.s32.totalorder %s4222_s20, %s4215_s28 }
  0x95   : > { %p4218_p10 = pnand %p4216_p9, %p4895_p8 }
  0x96   : > { %p4225_p1 = por %p4224_p12, %p4223_p11 }
  0x97   : > { %p4219_p4 = pneg %p4218_p10 }
  0x99   : > { %p4226_p3 = pnand %p4225_p1, %p4219_p4 }
  0x9b   : > { %4229 = shalt.err (!%p4226_p3)
}
  0x9c   : > { %3917 = dma.hbm_to_vmem [thread:$0]  (!%p4879_p6), %s5776_s11, 16, %s708_s0, [#allocation17]  }
  0x9d   : > { %s5777_s13 = sld [smem:[#allocation55_spill]] }
  0xa3   : > { %s4230_s24 = scalar_lea.hbm %s5777_s13, 16 }
  0xa4   : > { %p4231_p13 = scmp.ne.s32.totalorder %s5777_s13, %s4230_s24  ;;  %p4237_p3 = scmp.lt.u32.totalorder %s4230_s24, %s5777_s13 }
  0xa6   : > { %p4233_p0 = pnand %p4231_p13, %p4895_p8 }
  0xa8   : > { %p4234_p1 = pneg %p4233_p0 }
  0xaa   : > { %p4239_p2 = pnand %p4237_p3, %p4234_p1 }
  0xac   : > { %4242 = shalt.err (!%p4239_p2)
}
  0xad   : > { %s4243_s28 = scalar_lea.vmem %s732_s7, 16  ;;  %s4250_s0 = scalar_lea.vmem %s732_s7, 32 }
  0xae   : > { %p4244_p5 = scmp.ne.s32.totalorder %s732_s7, %s4243_s28  ;;  %p4251_p10 = scmp.lt.s32.totalorder %s732_s7, %s732_s7 }
  0xaf   : > { %p4252_p4 = scmp.lt.s32.totalorder %s4250_s0, %s4243_s28 }
  0xb0   : > { %p4246_p7 = pnand %p4244_p5, %p4895_p8 }
  0xb1   : > { %p4253_p11 = por %p4252_p4, %p4251_p10 }
  0xb2   : > { %p4247_p9 = pneg %p4246_p7 }
  0xb4   : > { %p4254_p12 = pnand %p4253_p11, %p4247_p9 }
  0xb6   : > { %4257 = shalt.err (!%p4254_p12)
}
  0xb7   : > { %3923 = dma.hbm_to_vmem [thread:$0]  (!%p4879_p6), %s5777_s13, 16, %s732_s7, [#allocation20]  }
  0xb8   : > { %s4679_s22 = smov [#allocation22]   ;;  %s4680_s5 = smov [#allocation25]  }
  0xb9   : > { %s755_s8 = sshll.u32 %s4679_s22, 4  ;;  %s777_s24 = sshll.u32 %s4680_s5, 4  ;;  %s756_s8 = int_to_ptr.vmem [resolvable:$true] %s755_s8  ;;  %s778_s24 = int_to_ptr.vmem [resolvable:$true] %s777_s24 }
  0xba   : > { %s5778_s15 = sld [smem:[#allocation57_spill]] }
  0xc0   : > { %s4258_s27 = scalar_lea.hbm %s5778_s15, 16 }
  0xc1   : > { %p4259_p13 = scmp.ne.s32.totalorder %s5778_s15, %s4258_s27  ;;  %p4265_p3 = scmp.lt.u32.totalorder %s4258_s27, %s5778_s15 }
  0xc3   : > { %p4261_p0 = pnand %p4259_p13, %p4895_p8 }
  0xc5   : > { %p4262_p1 = pneg %p4261_p0 }
  0xc7   : > { %p4267_p2 = pnand %p4265_p3, %p4262_p1 }
  0xc9   : > { %4270 = shalt.err (!%p4267_p2)
}
  0xca   : > { %s4271_s7 = scalar_lea.vmem %s756_s8, 16  ;;  %s4278_s21 = scalar_lea.vmem %s756_s8, 32 }
  0xcb   : > { %p4272_p5 = scmp.ne.s32.totalorder %s756_s8, %s4271_s7  ;;  %p4279_p10 = scmp.lt.s32.totalorder %s756_s8, %s756_s8 }
  0xcc   : > { %p4280_p4 = scmp.lt.s32.totalorder %s4278_s21, %s4271_s7 }
  0xcd   : > { %p4274_p7 = pnand %p4272_p5, %p4895_p8 }
  0xce   : > { %p4281_p11 = por %p4280_p4, %p4279_p10 }
  0xcf   : > { %p4275_p9 = pneg %p4274_p7 }
  0xd1   : > { %p4282_p12 = pnand %p4281_p11, %p4275_p9 }
  0xd3   : > { %4285 = shalt.err (!%p4282_p12)
}
  0xd4   : > { %3929 = dma.hbm_to_vmem [thread:$0]  (!%p4879_p6), %s5778_s15, 16, %s756_s8, [#allocation23]  }
  0xd5   : > { %s5779_s17 = sld [smem:[#allocation59_spill]] }
  0xdb   : > { %s4286_s27 = scalar_lea.hbm %s5779_s17, 16 }
  0xdc   : > { %p4287_p13 = scmp.ne.s32.totalorder %s5779_s17, %s4286_s27  ;;  %p4293_p3 = scmp.lt.u32.totalorder %s4286_s27, %s5779_s17 }
  0xde   : > { %p4289_p0 = pnand %p4287_p13, %p4895_p8 }
  0xe0   : > { %p4290_p1 = pneg %p4289_p0 }
  0xe2   : > { %p4295_p2 = pnand %p4293_p3, %p4290_p1 }
  0xe4   : > { %4298 = shalt.err (!%p4295_p2)
}
  0xe5   : > { %s4299_s7 = scalar_lea.vmem %s778_s24, 16  ;;  %s4306_s8 = scalar_lea.vmem %s778_s24, 32 }
  0xe6   : > { %p4300_p5 = scmp.ne.s32.totalorder %s778_s24, %s4299_s7  ;;  %p4307_p10 = scmp.lt.s32.totalorder %s778_s24, %s778_s24 }
  0xe7   : > { %p4308_p4 = scmp.lt.s32.totalorder %s4306_s8, %s4299_s7 }
  0xe8   : > { %p4302_p7 = pnand %p4300_p5, %p4895_p8 }
  0xe9   : > { %p4309_p11 = por %p4308_p4, %p4307_p10 }
  0xea   : > { %p4303_p9 = pneg %p4302_p7 }
  0xec   : > { %p4310_p12 = pnand %p4309_p11, %p4303_p9 }
  0xee   : > { %4313 = shalt.err (!%p4310_p12)
}
  0xef   : > { %3935 = dma.hbm_to_vmem [thread:$0]  (!%p4879_p6), %s5779_s17, 16, %s778_s24, [#allocation26]  }
  0xf0   : > { %s4681_s5 = smov [#allocation12]   ;;  %s4682_s19 = smov [#allocation15]  }
  0xf1   : > { %s671_s3 = sshll.u32 %s4681_s5, 4  ;;  %s693_s27 = sshll.u32 %s4682_s19, 4  ;;  %s672_s3 = int_to_ptr.vmem [resolvable:$true] %s671_s3  ;;  %s694_s27 = int_to_ptr.vmem [resolvable:$true] %s693_s27 }
  0xf2   : > { %s5780_s0 = sld [smem:[#allocation49_spill]] }
  0xf8   : > { %s4314_s20 = scalar_lea.hbm %s5780_s0, 16 }
  0xf9   : > { %p4315_p13 = scmp.ne.s32.totalorder %s5780_s0, %s4314_s20  ;;  %p4321_p3 = scmp.lt.u32.totalorder %s4314_s20, %s5780_s0 }
  0xfb   : > { %p4317_p0 = pnand %p4315_p13, %p4895_p8 }
  0xfd   : > { %p4318_p1 = pneg %p4317_p0 }
  0xff   : > { %p4323_p2 = pnand %p4321_p3, %p4318_p1 }
 0x101   : > { %4326 = shalt.err (!%p4323_p2)
}
 0x102   : > { %s4327_s24 = scalar_lea.vmem %s672_s3, 16  ;;  %s4334_s22 = scalar_lea.vmem %s672_s3, 32 }
 0x103   : > { %p4328_p5 = scmp.ne.s32.totalorder %s672_s3, %s4327_s24  ;;  %p4335_p10 = scmp.lt.s32.totalorder %s672_s3, %s672_s3 }
 0x104   : > { %p4336_p4 = scmp.lt.s32.totalorder %s4334_s22, %s4327_s24 }
 0x105   : > { %p4330_p7 = pnand %p4328_p5, %p4895_p8 }
 0x106   : > { %p4337_p11 = por %p4336_p4, %p4335_p10 }
 0x107   : > { %p4331_p9 = pneg %p4330_p7 }
 0x109   : > { %p4338_p12 = pnand %p4337_p11, %p4331_p9 }
 0x10b   : > { %4341 = shalt.err (!%p4338_p12)
}
 0x10c   : > { %3908 = dma.hbm_to_vmem [thread:$0]  (!%p4879_p6), %s5780_s0, 16, %s672_s3, [#allocation11]  }
 0x10d   : > { %s5781_s28 = sld [smem:[#allocation51_spill]] }
 0x113   : > { %s4342_s20 = scalar_lea.hbm %s5781_s28, 16 }
 0x114   : > { %p4343_p13 = scmp.ne.s32.totalorder %s5781_s28, %s4342_s20  ;;  %p4349_p3 = scmp.lt.u32.totalorder %s4342_s20, %s5781_s28 }
 0x116   : > { %p4345_p0 = pnand %p4343_p13, %p4895_p8 }
 0x118   : > { %p4346_p1 = pneg %p4345_p0 }
 0x11a   : > { %p4351_p2 = pnand %p4349_p3, %p4346_p1 }
 0x11c   : > { %4354 = shalt.err (!%p4351_p2)
}
 0x11d   : > { %s4355_s22 = scalar_lea.vmem %s694_s27, 16  ;;  %s4362_s3 = scalar_lea.vmem %s694_s27, 32 }
 0x11e   : > { %p4356_p5 = scmp.ne.s32.totalorder %s694_s27, %s4355_s22  ;;  %p4363_p10 = scmp.lt.s32.totalorder %s694_s27, %s694_s27 }
 0x11f   : > { %p4364_p4 = scmp.lt.s32.totalorder %s4362_s3, %s4355_s22 }
 0x120   : > { %p4358_p7 = pnand %p4356_p5, %p4895_p8 }
 0x121   : > { %p4365_p11 = por %p4364_p4, %p4363_p10 }
 0x122   : > { %p4359_p9 = pneg %p4358_p7 }
 0x124   : > { %p4366_p12 = pnand %p4365_p11, %p4359_p9 }
 0x126   : > { %4369 = shalt.err (!%p4366_p12)
}
 0x127   : > { %3914 = dma.hbm_to_vmem [thread:$0]  (!%p4879_p6), %s5781_s28, 16, %s694_s27, [#allocation14]  }
 0x128   : > { %s4683_s11 = smov [#allocation18]   ;;  %s5782_s12 = sld [smem:[#allocation54_spill]] }
 0x129   : > { %s717_s10 = sshll.u32 %s4683_s11, 4  ;;  %s718_s10 = int_to_ptr.vmem [resolvable:$true] %s717_s10 }
 0x12e   : > { %s4370_s8 = scalar_lea.hbm %s5782_s12, 512 }
 0x12f   : > { %p4371_p13 = scmp.ne.s32.totalorder %s5782_s12, %s4370_s8  ;;  %p4377_p3 = scmp.lt.u32.totalorder %s4370_s8, %s5782_s12 }
 0x131   : > { %p4373_p0 = pnand %p4371_p13, %p4895_p8 }
 0x133   : > { %p4374_p1 = pneg %p4373_p0 }
 0x135   : > { %p4379_p2 = pnand %p4377_p3, %p4374_p1 }
 0x137   : > { %4382 = shalt.err (!%p4379_p2)
}
 0x138   : > { %s4383_s27 = scalar_lea.vmem %s718_s10, 512  ;;  %p4391_p10 = scmp.lt.s32.totalorder %s718_s10, %s718_s10 }
 0x139   : > { %p4384_p5 = scmp.ne.s32.totalorder %s718_s10, %s4383_s27  ;;  %p4392_p4 = scmp.lt.s32.totalorder %s4383_s27, %s4383_s27 }
 0x13b   : > { %p4386_p7 = pnand %p4384_p5, %p4895_p8  ;;  %p4393_p11 = por %p4392_p4, %p4391_p10 }
 0x13d   : > { %p4387_p9 = pneg %p4386_p7 }
 0x13f   : > { %p4394_p12 = pnand %p4393_p11, %p4387_p9 }
 0x141   : > { %4397 = shalt.err (!%p4394_p12)
}
 0x142   : > { %s4684_s5 = smov 128   ;;  %s4685_s19 = smov 8  }
 0x143   : > { %3920 = dma.hbm_to_vmem [thread:$0]  (!%p4879_p6), %s5782_s12, 512, %s718_s10, [#allocation17], %s4684_s5, %s4684_s5, %s4685_s19  }
 0x144   : > { %s4686_s7 = smov [#allocation21]   ;;  %s4687_s21 = smov [#allocation24]  }
 0x145   : > { %s741_s8 = sshll.u32 %s4686_s7, 4  ;;  %s766_s24 = sshll.u32 %s4687_s21, 4  ;;  %s742_s8 = int_to_ptr.vmem [resolvable:$true] %s741_s8  ;;  %s5094_s24 = int_to_ptr.vmem [resolvable:$true] %s766_s24 }
 0x146   : > { %s5783_s14 = sld [smem:[#allocation56_spill]] }
 0x14c   : > { %s4398_s27 = scalar_lea.hbm %s5783_s14, 512 }
 0x14d   : > { %p4399_p13 = scmp.ne.s32.totalorder %s5783_s14, %s4398_s27  ;;  %p4405_p3 = scmp.lt.u32.totalorder %s4398_s27, %s5783_s14 }
 0x14f   : > { %p4401_p0 = pnand %p4399_p13, %p4895_p8 }
 0x151   : > { %p4402_p1 = pneg %p4401_p0 }
 0x153   : > { %p4407_p2 = pnand %p4405_p3, %p4402_p1 }
 0x155   : > { %4410 = shalt.err (!%p4407_p2)
}
 0x156   : > { %s4411_s20 = scalar_lea.vmem %s742_s8, 512  ;;  %p4419_p10 = scmp.lt.s32.totalorder %s742_s8, %s742_s8 }
 0x157   : > { %p4412_p5 = scmp.ne.s32.totalorder %s742_s8, %s4411_s20  ;;  %p4420_p4 = scmp.lt.s32.totalorder %s4411_s20, %s4411_s20 }
 0x159   : > { %p4414_p7 = pnand %p4412_p5, %p4895_p8  ;;  %p4421_p11 = por %p4420_p4, %p4419_p10 }
 0x15b   : > { %p4415_p9 = pneg %p4414_p7 }
 0x15d   : > { %p4422_p12 = pnand %p4421_p11, %p4415_p9 }
 0x15f   : > { %4425 = shalt.err (!%p4422_p12)
}
 0x160   : > { %3926 = dma.hbm_to_vmem [thread:$0]  (!%p4879_p6), %s5783_s14, 512, %s742_s8, [#allocation20], %s4684_s5, %s4684_s5, %s4685_s19  }
 0x161   : > { %s5784_s16 = sld [smem:[#allocation58_spill]] }
 0x167   : > { %s4426_s22 = scalar_lea.hbm %s5784_s16, 16 }
 0x168   : > { %p4427_p13 = scmp.ne.s32.totalorder %s5784_s16, %s4426_s22  ;;  %p4433_p3 = scmp.lt.u32.totalorder %s4426_s22, %s5784_s16 }
 0x16a   : > { %p4429_p0 = pnand %p4427_p13, %p4895_p8 }
 0x16c   : > { %p4430_p1 = pneg %p4429_p0 }
 0x16e   : > { %p4435_p2 = pnand %p4433_p3, %p4430_p1 }
 0x170   : > { %4438 = shalt.err (!%p4435_p2)
}
 0x171   : > { %s4439_s8 = scalar_lea.vmem %s5094_s24, 16  ;;  %s4446_s20 = scalar_lea.vmem %s5094_s24, 32 }
 0x172   : > { %p4440_p5 = scmp.ne.s32.totalorder %s5094_s24, %s4439_s8  ;;  %p4447_p10 = scmp.lt.s32.totalorder %s5094_s24, %s5094_s24 }
 0x173   : > { %p4448_p4 = scmp.lt.s32.totalorder %s4446_s20, %s4439_s8 }
 0x174   : > { %p4442_p7 = pnand %p4440_p5, %p4895_p8 }
 0x175   : > { %p4449_p11 = por %p4448_p4, %p4447_p10 }
 0x176   : > { %p4443_p9 = pneg %p4442_p7 }
 0x178   : > { %p4450_p12 = pnand %p4449_p11, %p4443_p9 }
 0x17a   : > { %4453 = shalt.err (!%p4450_p12)
}
 0x17b   : > { %3932 = dma.hbm_to_vmem [thread:$0]  (!%p4879_p6), %s5784_s16, 16, %s5094_s24, [#allocation23]  }
 0x17c   : > { %s4688_s7 = smov [#allocation27]   ;;  %s4454_s27 = scalar_lea.hbm %s5703_s18, 512 }
 0x17d   : > { %s787_s21 = sshll.u32 %s4688_s7, 4  ;;  %p4455_p13 = scmp.ne.s32.totalorder %s5703_s18, %s4454_s27  ;;  %s788_s21 = int_to_ptr.vmem [resolvable:$true] %s787_s21 }
 0x17e   : > { %p4461_p3 = scmp.lt.u32.totalorder %s4454_s27, %s5703_s18 }
 0x17f   : > { %p4457_p0 = pnand %p4455_p13, %p4895_p8 }
 0x181   : > { %p4458_p1 = pneg %p4457_p0 }
 0x183   : > { %p4463_p2 = pnand %p4461_p3, %p4458_p1 }
 0x185   : > { %4466 = shalt.err (!%p4463_p2)
}
 0x186   : > { %s4467_s24 = scalar_lea.vmem %s788_s21, 512  ;;  %p4475_p10 = scmp.lt.s32.totalorder %s788_s21, %s788_s21 }
 0x187   : > { %p4468_p5 = scmp.ne.s32.totalorder %s788_s21, %s4467_s24  ;;  %p4476_p4 = scmp.lt.s32.totalorder %s4467_s24, %s4467_s24 }
 0x189   : > { %p4470_p7 = pnand %p4468_p5, %p4895_p8  ;;  %p4477_p11 = por %p4476_p4, %p4475_p10 }
 0x18b   : > { %p4471_p9 = pneg %p4470_p7 }
 0x18d   : > { %p4478_p12 = pnand %p4477_p11, %p4471_p9 }
 0x18f   : > { %4481 = shalt.err (!%p4478_p12)
}
 0x190   : > { %3938 = dma.hbm_to_vmem [thread:$0]  (!%p4879_p6), %s5703_s18, 512, %s788_s21, [#allocation26], %s4684_s5, %s4684_s5, %s4685_s19  }
 0x191   : > { %s3405_s9 = sadd.s32 4294967294, %s4672_s30   ;;  %s5164_s4 = sadd.s32 1, %s4672_s30  }
 0x192   : > { %s61_s7 = sadd.s32 1, %s4668_s6  ;;  %s58_s22 = ssub.s32 %s4672_s30, %s5164_s4 }
 0x193   : > { %p68_p8 = scmp.ne.s32.totalorder %s4668_s6, %s4664_s2  ;;  %p59_p13 = scmp.eq.s32.totalorder %s58_s22, 0 }
 0x194   : > { %p69_p0 = scmp.eq.s32.totalorder %s4672_s30, 0  ;;  %p74_p1 = scmp.ne.s32.totalorder %s4664_s2, %s4660_s29 }
 0x195   : > { %p591_p3 = scmp.eq.s32.totalorder %s4861_s26, 1  ;;  %p5785_p5 = scmp.eq.s32.totalorder %s4861_s26, 0 }
 0x196   : > { %s5176_s3 = scalar_select %p59_p13, %s4668_s6, %s61_s7  }
 0x197   : > { %p70_p2 = por %p69_p0, %p68_p8  ;;  %p5180_p7 = por %p5785_p5, %p74_p1 }
 0x198   : > { %p5184_p6 = por %p591_p3, %p68_p8  ;;  %p597_p9 = scmp.eq.s32.totalorder %s3405_s9, 1 }
 0x199   : > { %s5786_s5 = scalar_select %p5180_p7, 1, 0 }
 0x19a   : > { %s5787_s19 = scalar_select %p5184_p6, 1, 0 }
 0x19b   : > { %p3966_p10 = scmp.lt.s32.totalorder %s4672_s30, 2  ;;  %s5190_s21 = sand.u32 1, %s4668_s6  }
 0x19c   : > { %p5192_p4 = por %p597_p9, %p74_p1  ;;  %s3421_s11 = sshll.u32 %s5190_s21, 3 }
 0x19d   : > { %s3422_s10 = sshll.u32 %s4672_s30, 7  ;;  %s5789_s24 = sld [smem:[#allocation42_spill]] }
 0x19e   : > { %s5788_s27 = scalar_select %p5192_p4, 1, 0 }
 0x19f   : > { %s820_s0 = scalar_lea.vmem [#allocation4], %s3421_s11  ;;  %p5203_p11 = pnand %p3966_p10, %p70_p2 }
 0x1a0   : > { %s827_s9 = sshll.u32 %s820_s0, 4  ;;  %s817_s12 = scalar_lea.sflag [#allocation5], %s5190_s21  ;;  %s5207_s9 = int_to_ptr.vmem [resolvable:$true] %s827_s9 }
 0x1a1   : > { %p4484_p8 = pneg %p5203_p11 }
 0x1a3   : > { %s5201_s13 = scalar_lea.hbm %s5789_s24, %s3422_s10  ;;  %s4487_s8 = scalar_lea.hbm %s5789_s24, 256 }
 0x1a4   : > { %s4482_s14 = scalar_lea.hbm %s5201_s13, 128  ;;  %p4488_p1 = scmp.lt.u32.totalorder %s5201_s13, %s5789_s24 }
 0x1a5   : > { %p4483_p12 = scmp.ne.s32.totalorder %s5201_s13, %s4482_s14  ;;  %p4489_p3 = scmp.lt.u32.totalorder %s4487_s8, %s4482_s14 }
 0x1a6   : > { %p4491_p5 = scmp.lt.u32.totalorder %s4482_s14, %s5201_s13 }
 0x1a7   : > { %p4485_p13 = pnand %p4484_p8, %p4483_p12  ;;  %p4490_p2 = por %p4489_p3, %p4488_p1 }
 0x1a9   : > { %p4486_p0 = pneg %p4485_p13  ;;  %p4492_p9 = por %p4491_p5, %p4490_p2 }
 0x1ab   : > { %p4493_p10 = pnand %p4492_p9, %p4486_p0 }
 0x1ad   : > { %4496 = shalt.err (!%p4493_p10)
}
 0x1ae   : > { %s4497_s22 = scalar_lea.vmem %s5207_s9, 128  ;;  %s4689_s11 = smov [#allocation4]  }
 0x1af   : > { %p4498_p12 = scmp.ne.s32.totalorder %s5207_s9, %s4497_s22  ;;  %s4502_s10 = sshll.u32 %s4689_s11, 4  ;;  %s4503_s10 = int_to_ptr.vmem [resolvable:$false] %s4502_s10 }
 0x1b0   : > { %s4504_s20 = scalar_lea.vmem %s4503_s10, 256  ;;  %p4505_p6 = scmp.lt.s32.totalorder %s5207_s9, %s4503_s10 }
 0x1b1   : > { %p4500_p13 = pnand %p4498_p12, %p4484_p8  ;;  %p4506_p1 = scmp.lt.s32.totalorder %s4504_s20, %s4497_s22 }
 0x1b3   : > { %p4501_p4 = pneg %p4500_p13  ;;  %p4507_p3 = por %p4506_p1, %p4505_p6 }
 0x1b5   : > { %p4508_p2 = pnand %p4507_p3, %p4501_p4 }
 0x1b7   : > { %4511 = shalt.err (!%p4508_p2)
}
 0x1b8   : > { %3942 = dma.hbm_to_vmem [thread:$0]  (!%p5203_p11), %s5201_s13, 128, %s5207_s9, %s817_s12  }
 0x1b9   : > { %s3423_s14 = sshll.u32 %s4672_s30, 4  ;;  %s5791_s11 = sld [smem:[#allocation44_spill]] }
 0x1ba   : > { %s845_s22 = scalar_lea.vmem [#allocation7], %s5190_s21  ;;  %s5792_s20 = sand.u32 1, %s4672_s30  }
 0x1bb   : > { %s852_s10 = sshll.u32 %s845_s22, 4  ;;  %s843_s16 = scalar_lea.sflag [#allocation8], %s5792_s20  ;;  %s853_s10 = int_to_ptr.vmem [resolvable:$true] %s852_s10 }
 0x1bf   : > { %s5240_s15 = scalar_lea.hbm %s5791_s11, %s3423_s14  ;;  %s4517_s9 = scalar_lea.hbm %s5791_s11, 32 }
 0x1c0   : > { %s4512_s17 = scalar_lea.hbm %s5240_s15, 16  ;;  %p4518_p5 = scmp.lt.u32.totalorder %s5240_s15, %s5791_s11 }
 0x1c1   : > { %p4513_p6 = scmp.ne.s32.totalorder %s5240_s15, %s4512_s17  ;;  %p4519_p9 = scmp.lt.u32.totalorder %s4517_s9, %s4512_s17 }
 0x1c2   : > { %p4521_p12 = scmp.lt.u32.totalorder %s4512_s17, %s5240_s15 }
 0x1c3   : > { %p4515_p4 = pnand %p4513_p6, %p4484_p8  ;;  %p4520_p10 = por %p4519_p9, %p4518_p5 }
 0x1c5   : > { %p4516_p0 = pneg %p4515_p4  ;;  %p4522_p13 = por %p4521_p12, %p4520_p10 }
 0x1c7   : > { %p4523_p1 = pnand %p4522_p13, %p4516_p0 }
 0x1c9   : > { %4526 = shalt.err (!%p4523_p1)
}
 0x1ca   : > { %s4527_s21 = scalar_lea.vmem %s853_s10, 16  ;;  %s4690_s0 = smov [#allocation7]  }
 0x1cb   : > { %p4528_p3 = scmp.ne.s32.totalorder %s853_s10, %s4527_s21  ;;  %s4532_s22 = sshll.u32 %s4690_s0, 4  ;;  %s4533_s22 = int_to_ptr.vmem [resolvable:$false] %s4532_s22 }
 0x1cc   : > { %s4534_s20 = scalar_lea.vmem %s4533_s22, 32  ;;  %p4535_p4 = scmp.lt.s32.totalorder %s853_s10, %s4533_s22 }
 0x1cd   : > { %p4530_p2 = pnand %p4528_p3, %p4484_p8  ;;  %p4536_p7 = scmp.lt.s32.totalorder %s4534_s20, %s4527_s21 }
 0x1cf   : > { %p4531_p6 = pneg %p4530_p2  ;;  %p4537_p5 = por %p4536_p7, %p4535_p4 }
 0x1d1   : > { %p4538_p9 = pnand %p4537_p5, %p4531_p6 }
 0x1d3   : > { %4541 = shalt.err (!%p4538_p9)
}
 0x1d4   : > { %3945 = dma.hbm_to_vmem [thread:$0]  (!%p5203_p11), %s5240_s15, 16, %s853_s10, %s843_s16  }
 0x1d5   : > { %p5793_p0 = scmp.ne.s32.totalorder %s5770_s1, 0 }
 0x1d6   : > { %s5267_s17 = sand.u32 (!%p5793_p0), 1, %s4664_s2   ;;  %p5794_p7 = scmp.ne.s32.totalorder (!%p5793_p0), %s5786_s5, 0 }
 0x1d7   : > { %861 = sbr.rel (%p5793_p0) target bundleno = 5850 (0x16da), region = 116  ;;  %s5270_s12 = sshll.u32 (!%p5793_p0), %s5267_s17, 3 }
 0x1d8   : > { %s864_s13 = scalar_lea.sflag (!%p5793_p0), [#allocation5], %s5267_s17  ;;  %s867_s9 = scalar_lea.vmem (!%p5793_p0), [#allocation4], %s5270_s12 }
 0x1de   : > { %4615 = dma.done.wait (%p5794_p7), %s864_s13, 128  }
 0x1df   : > { %4617 = vsyncadd (%p5794_p7), %s864_s13, 4294967168  ;;  %s872_s15 = sand.u32 1, %s4861_s26   ;;  %s875_s1 = scalar_lea.vmem [#allocation7], %s5267_s17 }
 0x1e0   : > { %s873_s16 = scalar_lea.sflag [#allocation8], %s872_s15 }
 0x1e1   : > { %4619 = dma.done.wait (%p5794_p7), %s873_s16, 16  }
 0x1e2   : > { %4621 = vsyncadd (%p5794_p7), %s873_s16, 4294967280  ;;  %p5795_p11 = scmp.eq.s32.totalorder %s4861_s26, 0 }
 0x1e4   : > { %4623 = dma.done.wait (%p5795_p11), [#allocation8], 128   ;;  %p5796_p8 = pmov %p5795_p11 }
 0x1e6   : > { %4625 = vsyncadd (%p5796_p8), [#allocation8], 4294967168  ;;  %p5797_p10 = pmov %p5796_p8 }
 0x1e7   : > { %p5798_p12 = pmov %p5796_p8 }
 0x1e8   : > { %4627 = dma.done.wait (%p5797_p10), [#allocation11], 32  }
 0x1e9   : > { %4629 = vsyncadd (%p5798_p12), [#allocation11], 4294967264  ;;  %p5799_p13 = pmov %p5796_p8 }
 0x1ea   : > { %p5800_p1 = pmov %p5796_p8 }
 0x1eb   : > { %4631 = dma.done.wait (%p5799_p13), [#allocation14], 32  }
 0x1ec   : > { %4633 = vsyncadd (%p5800_p1), [#allocation14], 4294967264  ;;  %p5801_p3 = pmov %p5800_p1 }
 0x1ed   : > { %p5802_p2 = pmov %p5800_p1 }
 0x1ee   : > { %4635 = dma.done.wait (%p5801_p3), [#allocation17], 528  }
 0x1ef   : > { %4637 = vsyncadd (%p5802_p2), [#allocation17], 4294966768  ;;  %p5803_p6 = pmov %p5800_p1 }
 0x1f0   : > { %p5804_p4 = pmov %p5800_p1 }
 0x1f1   : > { %4639 = dma.done.wait (%p5803_p6), [#allocation20], 528  }
 0x1f2   : > { %4641 = vsyncadd (%p5804_p4), [#allocation20], 4294966768  ;;  %p5805_p5 = pmov %p5800_p1 }
 0x1f3   : > { %p5806_p9 = pmov %p5800_p1 }
 0x1f4   : > { %4643 = dma.done.wait (%p5805_p5), [#allocation23], 32  }
 0x1f5   : > { %4645 = vsyncadd (%p5806_p9), [#allocation23], 4294967264  ;;  %p5807_p0 = pmov %p5800_p1 }
 0x1f7   : > { %4647 = dma.done.wait (%p5807_p0), [#allocation26], 528   ;;  %p5808_p7 = pmov %p5807_p0 }
 0x1f8   : > { %v4691_v0 = vmov 0.0|0.0   ;;  %vm4692_vm0 = vmmov 0   ;;  %v4693_v1 = vmov 0.0   ;;  %s5809_s10 = sld [smem:[#allocation46_spill]]  ;;  %v5333_v8 = vld [vmem:[%s867_s9] sm:$0xff]  ;;  %vm1036_vm1 = vcmask 261120  }
 0x1f9   : > { %4649 = vsyncadd (%p5808_p7), [#allocation26], 4294966768  ;;  %3761 = vmatprep.subr.bf16.mxu1 %v4691_v0  ;;  %3588 = vmatprep.mubr.msk.f32.mxu1 %vm4692_vm0, %v4693_v1  ;;  %v3444_v9 = vld [vmem:[#allocation10] ss:$0 sm:$0xff]  ;;  %s4694_s13 = smov 120   ;;  %s4695_s9 = smov 96  }
 0x1fa   : > { %3601 = vmatprep.subr.mxu0 %v4693_v1  ;;  %3603 = vmatprep.mubr.msk.f32.mxu0 %vm4692_vm0, %v4693_v1  ;;  %s5733_s15 = smov 80   ;;  %s5734_s16 = smov 88   ;;  %vm1113_vm2 = vcmask 64512   ;;  %v1016_v20 = vld [vmem:[#allocation9] sm:$0xff]  ;;  %v3443_v21 = vld [vmem:[%s875_s1] ss:$0 sm:$0xff] }
 0x1fb   : > { %s5730_s5 = smov 72   ;;  %s5738_s7 = smov 112   ;;  %v1024_v22 = vadd.f32 %v3443_v21, %v1016_v20  ;;  %vm1445_vm3 = vcmask 130112   ;;  %vm1616_vm4 = vcmask 195712   ;;  %vm1787_vm5 = vcmask 261312   ;;  %vm5463_vm6 = vmpackc.low %vm1113_vm2, %vm1113_vm2 }
 0x1fc   : > { %s5731_s14 = smov 104   ;;  %s4701_s1 = smov 56   ;;  %vm2160_vm7 = vcmask 130048   ;;  %vm3008_vm8 = vcmask 523264  }
 0x1fd   : > { %s4702_s8 = smov 64   ;;  %s4703_s21 = smov 48  }
 0x1fe   : > { %v1025_v2 = vld [vmem:[%s5809_s10] sm:$0xff]  ;;  %v1026_v3 = vld [vmem:[%s5809_s10 + $0x8] sm:$0xff]  ;;  %v1027_v4 = vld [vmem:[%s5809_s10 + $0x10] sm:$0xff]  ;;  %s4704_s0 = smov 40   ;;  %s5737_s22 = smov 8  }
 0x1ff   : > { %v3762_v5 = vpack.c.bf16 %v1026_v3, %v1025_v2  ;;  %v1028_v6 = vld [vmem:[%s5809_s10 + $0x18] sm:$0xff]  ;;  %s5736_s20 = smov 16   ;;  %p1008_p11 = scmp.lt.s32.totalorder %s4861_s26, 1 }
 0x200   : > { %v3765_v7 = vpack.c.bf16 %v1028_v6, %v1027_v4  ;;  %p5827_p10 = scmp.ne.s32.totalorder %s5787_s19, 0 }
 0x201   : > { %3763 = vmatpush3.bf16.msra.mxu1 %v3762_v5 }
 0x202   : > { %3764 = vmatprep.subr.bf16.mxu1 %v4691_v0 }
 0x205   : > { %3766 = vmatpush3.bf16.msra.mxu1 %v3765_v7 }
 0x206   : > { %3591 = vmatprep.subr.mxu1 %v4693_v1 }
 0x208   : > { %3589 = vmatmul.mubr.msk.f32.vlgmr.msra.gmra.mrb[0].mxu1 %vm1036_vm1, %v5333_v8 }
 0x209   : > { %3593 = vmatprep.mubr.msk.f32.mxu1 %vm4692_vm0, %v4693_v1 }
 0x2db   : > { %v1106_v10 = vpop.f32.mrb[0].mxu1 }
 0x2dc   : > { %v5340_v11 = vadd.f32 %v3444_v9, %v1106_v10  ;;  %v3590_v12 = vpop.f32.mrb[1].mxu1 }
 0x2de   : > { %1276 = vrot.lane.b32.xlu1 %v5340_v11, %s4694_s13  ;;  %1111 = vrot.lane.b32.xlu0 %v5340_v11, %s4695_s9 }
 0x2e2   : > { %1449 = vrot.lane.b32.xlu1 %v5340_v11, %s5733_s15  ;;  %1278 = vrot.lane.b32.xlu0 %v5340_v11, %s5734_s16  ;;  %s1009_s15 = scalar_select %p1008_p11, %s4861_s26, 1 }
 0x2e4   : > { %s3499_s16 = sshll.u32 %s1009_s15, 4  ;;  %s5821_s15 = smov 72  }
 0x2e6   : > { %1620 = vrot.lane.b32.xlu1 %v5340_v11, %s5730_s5  ;;  %1447 = vrot.lane.b32.xlu0 %v5340_v11, %s5738_s7  ;;  %s5817_s7 = smov 80   ;;  %s5822_s5 = smov 24  }
 0x2ea   : > { %1618 = vrot.lane.b32.xlu0 %v5340_v11, %s5731_s14  ;;  %s5824_s14 = sld [smem:[#allocation60_spill]] }
 0x350   : > { %v1277_v13 = vpop.permute.xlu1 %1276  ;;  %v1112_v14 = vpop.permute.xlu0 %1111 }
 0x351   : > { %3592 = vmatpush3.xpose.msk.msra.mxu1 %vm1113_vm2, %v1112_v14 }
 0x352   : > { %3596 = vmatprep.subr.mxu1 %v4693_v1 }
 0x354   : > { %3594 = vmatmul.mubr.msk.f32.vlgmr.msra.gmra.mrb[2].mxu1 %vm1113_vm2, %v5340_v11  ;;  %v1279_v15 = vpop.permute.xlu0 %1278  ;;  %v1450_v16 = vpop.permute.xlu1 %1449 }
 0x355   : > { %3602 = vmatpush3.xpose.msk.msra.mxu0 %vm1113_vm2, %v1279_v15  ;;  %3598 = vmatprep.mubr.msk.f32.mxu1 %vm4692_vm0, %v4693_v1 }
 0x356   : > { %3611 = vmatprep.subr.mxu0 %v4693_v1 }
 0x358   : > { %3604 = vmatmul.mubr.msk.f32.vlgmr.msra.gmra.mrb[0].mxu0 %vm1113_vm2, %v1277_v13  ;;  %v1448_v17 = vpop.permute.xlu0 %1447  ;;  %v1621_v18 = vpop.permute.xlu1 %1620 }
 0x359   : > { %3612 = vmatpush3.xpose.msk.msra.mxu0 %vm1113_vm2, %v1450_v16  ;;  %3613 = vmatprep.mubr.msk.f32.mxu0 %vm4692_vm0, %v4693_v1 }
 0x35a   : > { %3621 = vmatprep.subr.mxu0 %v4693_v1 }
 0x35c   : > { %3614 = vmatmul.mubr.msk.f32.vlgmr.msra.gmra.mrb[2].mxu0 %vm1113_vm2, %v1448_v17  ;;  %v1619_v19 = vpop.permute.xlu0 %1618 }
 0x35d   : > { %3622 = vmatpush3.xpose.msk.msra.mxu0 %vm1113_vm2, %v1621_v18  ;;  %3623 = vmatprep.mubr.msk.f32.mxu0 %vm4692_vm0, %v4693_v1 }
 0x35e   : > { %3767 = vmatprep.subr.bf16.mxu0 %v4691_v0 }
 0x360   : > { %3624 = vmatmul.mubr.msk.f32.vlgmr.msra.gmra.mrb[4].mxu0 %vm1113_vm2, %v1619_v19 }
 0x361   : > { %3639 = vmatprep.mubr.msk.f32.mxu0 %vm4692_vm0, %v4693_v1 }
 0x427   : > { %v1184_v23 = vpop.f32.mrb[2].mxu1 }
 0x428   : > { %v1185_v24 = vadd.f32 %v1184_v23, %v1024_v22  ;;  %v3595_v25 = vpop.f32.mrb[3].mxu1 }
 0x42a   : > { %v1188_v26 = vsel %vm1113_vm2, %v1185_v24, -inf }
 0x42b   : > { %v1350_v27 = vpop.f32.mrb[0].mxu0  ;;  %1189 = vmax.xlane.f32.xlu1 %v1188_v26 }
 0x42c   : > { %v1351_v28 = vadd.f32 %v1350_v27, %v1024_v22  ;;  %v3605_v29 = vpop.f32.mrb[1].mxu0 }
 0x42e   : > { %v1354_v30 = vsel %vm1113_vm2, %v1351_v28, -inf }
 0x42f   : > { %1355 = vmax.xlane.f32.xlu0 %v1354_v30  ;;  %v1521_v31 = vpop.f32.mrb[2].mxu0 }
 0x430   : > { %v1522_v32 = vadd.f32 %v1521_v31, %v1024_v22  ;;  %v3615_v33 = vpop.f32.mrb[3].mxu0 }
 0x432   : > { %v1525_v34 = vsel %vm1113_vm2, %v1522_v32, -inf }
 0x433   : > { %1526 = vmax.xlane.f32.xlu0 %v1525_v34  ;;  %v1692_v35 = vpop.f32.mrb[4].mxu0 }
 0x434   : > { %v1693_v36 = vadd.f32 %v1692_v35, %v1024_v22  ;;  %v3625_v37 = vpop.f32.mrb[5].mxu0 }
 0x436   : > { %v1696_v38 = vsel %vm1113_vm2, %v1693_v36, -inf }
 0x437   : > { %1697 = vmax.xlane.f32.xlu1 %v1696_v38  ;;  %v1989_v38 = vld [vmem:[#allocation18] sm:$0xff] }
 0x448   : > { %1365 = vrot.lane.b32.xlu1 %v5340_v11, %s4701_s1  ;;  %s5735_s1 = smov 24  }
 0x4b8   : > { %v1190_v39 = vpop.xlane.xlu1 %1189 }
 0x4b9   : > { %v1191_v40 = vsub.f32 %v1185_v24, %v1190_v39  ;;  %v1990_v39 = vld [vmem:[#allocation18 + $0x8] sm:$0xff] }
 0x4bb   : > { %v1192_v41 = vmul.f32 1.442695, %v1191_v40  ;;  %v3779_v40 = vpack.c.bf16 %v1990_v39, %v1989_v38 }
 0x4bc   : > { %v1356_v42 = vpop.xlane.xlu0 %1355 }
 0x4bd   : > { %4080 = vpow2.f32 %v1192_v41  ;;  %v1357_v43 = vsub.f32 %v1351_v28, %v1356_v42 }
 0x4bf   : > { %v1358_v44 = vmul.f32 1.442695, %v1357_v43 }
 0x4c0   : > { %v1527_v54 = vpop.xlane.xlu0 %1526 }
 0x4c1   : > { %4082 = vpow2.f32 %v1358_v44  ;;  %v1528_v55 = vsub.f32 %v1522_v32, %v1527_v54  ;;  %v3458_v32 = vld [vmem:[#allocation12] ss:$0 sm:$0xff] }
 0x4c3   : > { %v1529_v56 = vmul.f32 1.442695, %v1528_v55 }
 0x4c4   : > { %v1698_v45 = vpop.xlane.xlu1 %1697 }
 0x4c5   : > { %v1699_v46 = vsub.f32 %v1693_v36, %v1698_v45 }
 0x4c7   : > { %v4081_v47 = vpop.eup %4080  ;;  %v1700_v48 = vmul.f32 1.442695, %v1699_v46  ;;  %v1991_v46 = vld [vmem:[#allocation18 + $0x10] sm:$0xff] }
 0x4c8   : > { %v1194_v49 = vsel %vm1113_vm2, %v4081_v47, 0.0  ;;  %v1366_v59 = vpop.permute.xlu1 %1365 }
 0x4c9   : > { %4084 = vpow2.f32 %v1700_v48  ;;  %1195 = vadd.xlane.f32.xlu0 %v1194_v49 }
 0x4ca   : > { %4086 = vpow2.f32 %v1529_v56 }
 0x4cb   : > { %v4083_v50 = vpop.eup %4082 }
 0x4cc   : > { %v1360_v51 = vsel %vm1113_vm2, %v4083_v50, 0.0 }
 0x4cd   : > { %1361 = vadd.xlane.f32.xlu1 %v1360_v51 }
 0x4d3   : > { %v4085_v52 = vpop.eup %4084 }
 0x4d4   : > { %v1702_v53 = vsel %vm1113_vm2, %v4085_v52, 0.0  ;;  %v4087_v57 = vpop.eup %4086 }
 0x4d5   : > { %1703 = vadd.xlane.f32.xlu1 %v1702_v53  ;;  %v1531_v58 = vsel %vm1113_vm2, %v4087_v57, 0.0 }
 0x4df   : > { %1199 = vrot.lane.b32.xlu0 %v5340_v11, %s4702_s8  ;;  %s5810_s8 = sld [smem:[#allocation48_spill]] }
 0x4e5   : > { %v1790_v18 = vld [vmem:[%s5810_s8] sm:$0xff]  ;;  %v1791_v19 = vld [vmem:[%s5810_s8 + $0x8] sm:$0xff]  ;;  %v1792_v21 = vld [vmem:[%s5810_s8 + $0x10] sm:$0xff] }
 0x4e6   : > { %1536 = vrot.lane.b32.xlu1 %v5340_v11, %s4703_s21  ;;  %v3768_v20 = vpack.c.bf16 %v1791_v19, %v1790_v18  ;;  %v1793_v22 = vld [vmem:[%s5810_s8 + $0x18] sm:$0xff]  ;;  %s5811_s21 = sld [smem:[#allocation43_spill]] }
 0x4e7   : > { %v3771_v23 = vpack.c.bf16 %v1793_v22, %v1792_v21 }
 0x4e8   : > { %3769 = vmatpush3.bf16.msra.mxu0 %v3768_v20 }
 0x4e9   : > { %3770 = vmatprep.subr.bf16.mxu0 %v4691_v0 }
 0x4ec   : > { %3772 = vmatpush3.bf16.msra.mxu0 %v3771_v23 }
 0x4ed   : > { %3780 = vmatprep.subr.bf16.mxu0 %v3779_v40 }
 0x4fe   : > { %1532 = vadd.xlane.f32.xlu0 %v1531_v58 }
 0x514   : > { %1707 = vrot.lane.b32.xlu0 %v5340_v11, %s4704_s0  ;;  %s1012_s0 = scalar_lea.vmem %s5811_s21, %s3499_s16  ;;  %s1007_s16 = scalar_lea.vmem [#allocation29], %s5270_s12 }
 0x515   : > { %v1014_v48 = vld [vmem:[%s1012_s0] sm:$0xff]  ;;  %v1015_v49 = vld [vmem:[%s1012_s0 + $0x8] sm:$0xff]  ;;  %s5820_s0 = smov 16   ;;  %s3122_s21 = scalar_lea.sflag [#allocation30], %s5267_s17 }
 0x556   : > { %v1196_v60 = vpop.xlane.xlu0 %1195 }
 0x557   : > { %4088 = vrcp.f32 %v1196_v60  ;;  %v3460_v60 = vld [vmem:[#allocation13] ss:$0 sm:$0xff] }
 0x55a   : > { %v1200_v61 = vpop.permute.xlu0 %1199  ;;  %v1362_v62 = vpop.xlane.xlu1 %1361 }
 0x55b   : > { %4090 = vrcp.f32 %v1362_v62  ;;  %3597 = vmatpush3.msra.mxu1 %v1200_v61  ;;  %v3461_v62 = vld [vmem:[#allocation15] ss:$0 sm:$0xff] }
 0x55c   : > { %3606 = vmatprep.subr.mxu1 %v4693_v1 }
 0x561   : > { %v4089_v63 = vpop.eup %4088 }
 0x562   : > { %v1198_v2 = vmul.f32 %v4089_v63, %v4081_v47  ;;  %v1704_v3 = vpop.xlane.xlu1 %1703  ;;  %v1992_v47 = vld [vmem:[#allocation18 + $0x18] sm:$0xff] }
 0x564   : > { %3599 = vmatmul.mubr.msk.f32.vlgmr.msra.gmra.mrb[4].mxu1 %vm1113_vm2, %v1198_v2 }
 0x565   : > { %v4091_v4 = vpop.eup %4090  ;;  %3607 = vmatpush3.msra.mxu1 %v1366_v59  ;;  %3608 = vmatprep.mubr.msk.f32.mxu1 %vm4692_vm0, %v4693_v1 }
 0x566   : > { %v1364_v5 = vmul.f32 %v4091_v4, %v4083_v50  ;;  %v1537_v6 = vpop.permute.xlu1 %1536  ;;  %3616 = vmatprep.subr.mxu1 %v4693_v1 }
 0x568   : > { %3609 = vmatmul.mubr.msk.f32.vlgmr.msra.gmra.mrb[6].mxu1 %vm1113_vm2, %v1364_v5 }
 0x569   : > { %3617 = vmatpush3.msra.mxu1 %v1537_v6  ;;  %3618 = vmatprep.mubr.msk.f32.mxu1 %vm4692_vm0, %v4693_v1 }
 0x56a   : > { %3626 = vmatprep.subr.mxu1 %v4693_v1 }
 0x58b   : > { %v1533_v7 = vpop.xlane.xlu0 %1532 }
 0x58c   : > { %4092 = vrcp.f32 %v1533_v7 }
 0x58d   : > { %4094 = vrcp.f32 %v1704_v3  ;;  %v3464_v3 = vld [vmem:[#allocation19] ss:$0 sm:$0xff] }
 0x58f   : > { %v1708_v12 = vpop.permute.xlu0 %1707 }
 0x596   : > { %v4093_v9 = vpop.eup %4092 }
 0x597   : > { %v1535_v10 = vmul.f32 %v4093_v9, %v4087_v57  ;;  %v4095_v11 = vpop.eup %4094 }
 0x598   : > { %v1706_v13 = vmul.f32 %v4095_v11, %v4085_v52 }
 0x599   : > { %3619 = vmatmul.mubr.msk.f32.vlgmr.msra.gmra.mrb[8].mxu1 %vm1113_vm2, %v1535_v10 }
 0x59a   : > { %3627 = vmatpush3.msra.mxu1 %v1708_v12  ;;  %3628 = vmatprep.mubr.msk.f32.mxu1 %vm4692_vm0, %v4693_v1 }
 0x59b   : > { %3773 = vmatprep.subr.bf16.mxu1 %v4691_v0 }
 0x59d   : > { %3629 = vmatmul.mubr.msk.f32.vlgmr.msra.gmra.mrb[10].mxu1 %vm1113_vm2, %v1706_v13 }
 0x59e   : > { %3650 = vmatprep.mubr.msk.f32.mxu1 %vm4692_vm0, %v4693_v1 }
 0x637   : > { %v1271_v14 = vpop.f32.mrb[4].mxu1 }
 0x638   : > { %1275 = vst.msk [vmem:[#allocation2] sm:$0xff] %vm1113_vm2, %v1271_v14  ;;  %v3600_v15 = vpop.f32.mrb[5].mxu1 }
 0x639   : > { %v3462_v15 = vld [vmem:[#allocation16] ss:$0 sm:$0xff] }
 0x63b   : > { %v1437_v16 = vpop.f32.mrb[6].mxu1 }
 0x63c   : > { %1442 = vrot.lane.b32.xlu1 %v1437_v16, %s5737_s22  ;;  %v3610_v17 = vpop.f32.mrb[7].mxu1  ;;  %s5812_s22 = sld [smem:[#allocation52_spill]] }
 0x642   : > { %v1905_v50 = vld [vmem:[%s5812_s22] sm:$0xff]  ;;  %v1906_v51 = vld [vmem:[%s5812_s22 + $0x8] sm:$0xff]  ;;  %v1907_v53 = vld [vmem:[%s5812_s22 + $0x10] sm:$0xff] }
 0x643   : > { %v3774_v52 = vpack.c.bf16 %v1906_v51, %v1905_v50  ;;  %v1908_v54 = vld [vmem:[%s5812_s22 + $0x18] sm:$0xff] }
 0x644   : > { %v3777_v55 = vpack.c.bf16 %v1908_v54, %v1907_v53 }
 0x645   : > { %3775 = vmatpush3.bf16.msra.mxu1 %v3774_v52 }
 0x646   : > { %3776 = vmatprep.subr.bf16.mxu1 %v4691_v0 }
 0x649   : > { %3778 = vmatpush3.bf16.msra.mxu1 %v3777_v55 }
 0x64a   : > { %3787 = vmatprep.subr.bf16.mxu1 %v4691_v0 }
 0x66c   : > { %v1608_v24 = vpop.f32.mrb[8].mxu1 }
 0x66d   : > { %1613 = vrot.lane.b32.xlu0 %v1608_v24, %s5736_s20  ;;  %v3620_v25 = vpop.f32.mrb[9].mxu1  ;;  %s5818_s20 = smov 104  }
 0x670   : > { %v1779_v26 = vpop.f32.mrb[10].mxu1 }
 0x671   : > { %1784 = vrot.lane.b32.xlu1 %v1779_v26, %s5735_s1  ;;  %v3630_v27 = vpop.f32.mrb[11].mxu1  ;;  %s5819_s1 = smov 8  }
 0x6ae   : > { %v1443_v28 = vpop.permute.xlu1 %1442 }
 0x6af   : > { %1446 = vst.msk [vmem:[#allocation2] sm:$0xff] %vm1445_vm3, %v1443_v28 }
 0x6df   : > { %v1614_v29 = vpop.permute.xlu0 %1613 }
 0x6e0   : > { %1617 = vst.msk [vmem:[#allocation2] sm:$0xff] %vm1616_vm4, %v1614_v29 }
 0x6e3   : > { %v1785_v30 = vpop.permute.xlu1 %1784 }
 0x6e4   : > { %1788 = vst.msk [vmem:[#allocation2] sm:$0xff] %vm1787_vm5, %v1785_v30 }
 0x6eb   : > { %v1789_v31 = vld [vmem:[#allocation2] sm:$0xff] }
 0x6ec   : > { %3640 = vmatmul.mubr.msk.f32.vlgmr.msra.gmra.mrb[6].mxu0 %vm1036_vm1, %v1789_v31 }
 0x6ed   : > { %3782 = vmatpush3.bf16.msra.mxu0 %v3779_v40  ;;  %3661 = vmatprep.mubr.msk.f32.mxu0 %vm1036_vm1, %v1014_v48 }
 0x7bf   : > { %v1870_v33 = vpop.f32.mrb[6].mxu0 }
 0x7c0   : > { %v1871_v34 = vadd.f32 %v3458_v32, %v1870_v33  ;;  %v3641_v35 = vpop.f32.mrb[7].mxu0 }
 0x7c2   : > { %v1874_v36 = vadd.f32 %v1871_v34, %v5333_v8  ;;  %v3783_v8 = vpack.c.bf16 %v1992_v47, %v1991_v46 }
 0x7c4   : > { %v1875_v37 = vsel %vm1036_vm1, %v1874_v36, 0.0  ;;  %3784 = vmatprep.subr.bf16.mxu0 %v3783_v8 }
 0x7c5   : > { %1876 = vadd.xlane.f32.xlu0 %v1875_v37  ;;  %3786 = vmatpush3.bf16.msra.mxu0 %v3783_v8 }
 0x7c6   : > { %3791 = vmatprep.subr.bf16.mxu0 %v4691_v0 }
 0x7c8   : > { %3662 = vmatmul.mubr.msk.f32.vlgmr.msra.gmra.mrb[8].mxu0 %vm1036_vm1, %v1015_v49 }
 0x7c9   : > { %3675 = vmatprep.mubr.msk.f32.mxu0 %vm4692_vm0, %v4693_v1 }
 0x852   : > { %v1877_v41 = vpop.xlane.xlu0 %1876 }
 0x853   : > { %v1879_v42 = vmul.f32 0.03125, %v1877_v41 }
 0x855   : > { %v1880_v43 = vsub.f32 %v1874_v36, %v1879_v42 }
 0x857   : > { %v1881_v44 = vmul.f32 %v1880_v43, %v1880_v43 }
 0x859   : > { %v1882_v45 = vsel %vm1036_vm1, %v1881_v44, 0.0 }
 0x85a   : > { %1883 = vadd.xlane.f32.xlu1 %v1882_v45 }
 0x89b   : > { %v3663_v4 = vpop.f32.mrb[8].mxu0 }
 0x89c   : > { %v2078_v5 = vadd.f32 %v3663_v4, %v3464_v3  ;;  %v2072_v6 = vpop.f32.mrb[9].mxu0 }
 0x89d   : > { %v2073_v7 = vadd.f32 %v3464_v3, %v2072_v6 }
 0x89f   : > { %v5467_v10 = vpack.i.bf16 %v2078_v5, %v2073_v7  ;;  %v3788_v11 = vpack.c.bf16 %v2078_v5, %v2073_v7 }
 0x8a1   : > { %4046 = vrot.lane.b32.xlu0 %v5467_v10, %s4694_s13 }
 0x8e7   : > { %v1884_v56 = vpop.xlane.xlu1 %1883 }
 0x8e8   : > { %v1885_v57 = vmul.f32 0.03125, %v1884_v56 }
 0x8ea   : > { %v1886_v58 = vadd.f32 1e-05, %v1885_v57 }
 0x8ec   : > { %4096 = vrsqrt.f32 %v1886_v58 }
 0x8f6   : > { %v4097_v59 = vpop.eup %4096 }
 0x8f7   : > { %v1888_v61 = vmul.f32 %v4097_v59, %v1880_v43 }
 0x8f9   : > { %v1896_v63 = vmul.f32 %v3460_v60, %v1888_v61 }
 0x8fb   : > { %v5455_v2 = vadd.f32 %v3461_v62, %v1896_v63 }
 0x8fd   : > { %3651 = vmatmul.mubr.msk.f32.vlgmr.msra.gmra.mrb[12].mxu1 %vm1036_vm1, %v5455_v2 }
 0x8fe   : > { %3668 = vmatprep.mubr.msk.f32.mxu1 %vm4692_vm0, %v4693_v1  ;;  %3790 = vmatpush3.bf16.xpose.msk.msra.mxu1 %vm5463_vm6, %v3788_v11 }
 0x8ff   : > { %3794 = vmatprep.subr.bf16.mxu1 %v4691_v0 }
 0x913   : > { %v4047_v12 = vpop.permute.xlu0 %4046 }
 0x914   : > { %v4049_v13 = vunpack.i.h.bf16 %v4047_v12  ;;  %v4048_v14 = vunpack.i.l.bf16 %v4047_v12 }
 0x916   : > { %v3795_v17 = vpack.c.bf16 %v4049_v13, %v4048_v14 }
 0x9d0   : > { %v1985_v16 = vpop.f32.mrb[12].mxu1 }
 0x9d1   : > { %v5474_v18 = vadd.f32 %v3462_v15, %v1985_v16  ;;  %v3652_v19 = vpop.f32.mrb[13].mxu1 }
 0x9d3   : > { %2253 = vrot.lane.b32.xlu1 %v5474_v18, %s4694_s13  ;;  %3669 = vmatmul.mubr.msk.f32.vlgmr.msra.gmra.mrb[14].mxu1 %vm1113_vm2, %v5474_v18  ;;  %s5815_s13 = smov 112  }
 0x9d4   : > { %3797 = vmatpush3.bf16.xpose.msk.msra.mxu1 %vm5463_vm6, %v3795_v17  ;;  %3682 = vmatprep.mubr.msk.f32.mxu1 %vm4692_vm0, %v4693_v1 }
 0x9d5   : > { %3805 = vmatprep.subr.bf16.mxu1 %v4691_v0 }
 0xa45   : > { %v2254_v20 = vpop.permute.xlu1 %2253 }
 0xa46   : > { %3683 = vmatmul.mubr.msk.f32.vlgmr.msra.gmra.mrb[16].mxu1 %vm1113_vm2, %v2254_v20 }
 0xa47   : > { %3703 = vmatprep.mubr.msk.f32.mxu1 %vm4692_vm0, %v4693_v1 }
 0xaa6   : > { %v2156_v21 = vpop.f32.mrb[14].mxu1 }
 0xaa7   : > { %v3670_v22 = vpop.f32.mrb[15].mxu1  ;;  %v2161_v23 = vsel %vm2160_vm7, %v2156_v21, -inf }
 0xaa8   : > { %2162 = vmax.xlane.f32.xlu0 %v2161_v23 }
 0xb19   : > { %v2331_v24 = vpop.f32.mrb[16].mxu1 }
 0xb1a   : > { %v3684_v25 = vpop.f32.mrb[17].mxu1  ;;  %v2335_v26 = vsel %vm2160_vm7, %v2331_v24, -inf }
 0xb1b   : > { %2336 = vmax.xlane.f32.xlu1 %v2335_v26 }
 0xb2c   : > { %4051 = vrot.lane.b32.xlu1 %v5467_v10, %s4695_s9  ;;  %s5816_s9 = smov 88  }
 0xb30   : > { %4061 = vrot.lane.b32.xlu1 %v5467_v10, %s5815_s13 }
 0xb34   : > { %2433 = vrot.lane.b32.xlu1 %v5474_v18, %s5815_s13  ;;  %s5823_s13 = sld [smem:[#allocation61_spill]] }
 0xb35   : > { %v2163_v27 = vpop.xlane.xlu0 %2162 }
 0xb36   : > { %v2164_v28 = vsub.f32 %v2156_v21, %v2163_v27 }
 0xb38   : > { %v2165_v29 = vmul.f32 1.442695, %v2164_v28 }
 0xb3a   : > { %4098 = vpow2.f32 %v2165_v29 }
 0xb44   : > { %v4099_v30 = vpop.eup %4098 }
 0xb45   : > { %v2167_v31 = vsel %vm2160_vm7, %v4099_v30, 0.0 }
 0xb46   : > { %2168 = vadd.xlane.f32.xlu0 %v2167_v31 }
 0xba8   : > { %v2337_v32 = vpop.xlane.xlu1 %2336 }
 0xba9   : > { %v2338_v33 = vsub.f32 %v2331_v24, %v2337_v32 }
 0xbab   : > { %v2339_v34 = vmul.f32 1.442695, %v2338_v33 }
 0xbac   : > { %v4052_v35 = vpop.permute.xlu1 %4051 }
 0xbad   : > { %4100 = vpow2.f32 %v2339_v34  ;;  %v4054_v36 = vunpack.i.h.bf16 %v4052_v35  ;;  %v4053_v37 = vunpack.i.l.bf16 %v4052_v35 }
 0xbaf   : > { %v3792_v38 = vpack.c.bf16 %v4054_v36, %v4053_v37 }
 0xbb0   : > { %v4062_v48 = vpop.permute.xlu1 %4061 }
 0xbb1   : > { %3793 = vmatpush3.bf16.msra.mxu0 %v3792_v38  ;;  %v4064_v50 = vunpack.i.h.bf16 %v4062_v48  ;;  %v4063_v51 = vunpack.i.l.bf16 %v4062_v48  ;;  %v2796_v48 = vld [vmem:[#allocation21 + $0x10] sm:$0xff] }
 0xbb2   : > { %3798 = vmatprep.subr.bf16.mxu0 %v4691_v0 }
 0xbb3   : > { %v3802_v55 = vpack.c.bf16 %v4064_v50, %v4063_v51 }
 0xbb4   : > { %v2434_v56 = vpop.permute.xlu1 %2433 }
 0xbb7   : > { %v4101_v39 = vpop.eup %4100 }
 0xbb8   : > { %v2341_v40 = vsel %vm2160_vm7, %v4101_v39, 0.0 }
 0xbb9   : > { %2342 = vadd.xlane.f32.xlu0 %v2341_v40 }
 0xbcf   : > { %4056 = vrot.lane.b32.xlu0 %v5467_v10, %s5816_s9 }
 0xbd3   : > { %v2169_v41 = vpop.xlane.xlu0 %2168 }
 0xbd4   : > { %4102 = vrcp.f32 %v2169_v41 }
 0xbde   : > { %v4103_v42 = vpop.eup %4102 }
 0xbdf   : > { %v2171_v43 = vmul.f32 %v4103_v42, %v4099_v30 }
 0xbe1   : > { %2172 = vst.msk [vmem:[#allocation3] sm:$0xff] %vm2160_vm7, %v2171_v43  ;;  %3676 = vmatmul.mubr.msk.f32.vlgmr.msra.gmra.mrb[10].mxu0 %vm2160_vm7, %v2171_v43 }
 0xbe2   : > { %3689 = vmatprep.mubr.msk.f32.mxu0 %vm4692_vm0, %v4693_v1 }
 0xbe8   : > { %v2346_v53 = vld [vmem:[#allocation3] sm:$0xff] }
 0xc46   : > { %v2343_v44 = vpop.xlane.xlu0 %2342 }
 0xc47   : > { %4104 = vrcp.f32 %v2343_v44 }
 0xc4a   : > { %v4057_v45 = vpop.permute.xlu0 %4056 }
 0xc4b   : > { %v4059_v46 = vunpack.i.h.bf16 %v4057_v45  ;;  %v4058_v47 = vunpack.i.l.bf16 %v4057_v45 }
 0xc4d   : > { %v3799_v8 = vpack.c.bf16 %v4059_v46, %v4058_v47  ;;  %v2794_v46 = vld [vmem:[#allocation21] sm:$0xff]  ;;  %v2795_v47 = vld [vmem:[#allocation21 + $0x8] sm:$0xff] }
 0xc4f   : > { %3800 = vmatpush3.bf16.msra.mxu0 %v3799_v8  ;;  %v3816_v8 = vpack.c.bf16 %v2795_v47, %v2794_v46 }
 0xc50   : > { %3801 = vmatprep.subr.bf16.mxu0 %v4691_v0 }
 0xc51   : > { %v4105_v49 = vpop.eup %4104 }
 0xc52   : > { %v2345_v52 = vmul.f32 %v4105_v49, %v4101_v39  ;;  %v2797_v49 = vld [vmem:[#allocation21 + $0x18] sm:$0xff] }
 0xc53   : > { %v3819_v50 = vpack.c.bf16 %v2797_v49, %v2796_v48 }
 0xc54   : > { %v2347_v54 = vadd.f32 %v2346_v53, %v2345_v52  ;;  %3690 = vmatmul.mubr.msk.f32.vlgmr.msra.gmra.mrb[12].mxu0 %vm2160_vm7, %v2345_v52 }
 0xc55   : > { %3696 = vmatprep.mubr.msk.f32.mxu0 %vm4692_vm0, %v4693_v1 }
 0xc56   : > { %2348 = vst.msk [vmem:[#allocation3] sm:$0xff] %vm2160_vm7, %v2347_v54 }
 0xc58   : > { %3804 = vmatpush3.bf16.xpose.msk.msra.mxu0 %vm5463_vm6, %v3802_v55  ;;  %v3483_v55 = vld [vmem:[#allocation22] ss:$0 sm:$0xff] }
 0xc59   : > { %3812 = vmatprep.subr.bf16.mxu0 %v4691_v0 }
 0xc5d   : > { %v2526_v21 = vld [vmem:[#allocation3] sm:$0xff] }
 0xc5f   : > { %3697 = vmatmul.mubr.msk.f32.vlgmr.msra.gmra.mrb[14].mxu0 %vm1113_vm2, %v2434_v56 }
 0xc60   : > { %3717 = vmatprep.mubr.msk.f32.mxu0 %vm4692_vm0, %v4693_v1 }
 0xcb4   : > { %v2248_v57 = vpop.f32.mrb[10].mxu0 }
 0xcb5   : > { %2252 = vst.msk [vmem:[#allocation2] sm:$0xff] %vm1113_vm2, %v2248_v57  ;;  %v3677_v58 = vpop.f32.mrb[11].mxu0 }
 0xd27   : > { %v2424_v59 = vpop.f32.mrb[12].mxu0 }
 0xd28   : > { %v3691_v60 = vpop.f32.mrb[13].mxu0 }
 0xd32   : > { %v2511_v61 = vpop.f32.mrb[14].mxu0 }
 0xd33   : > { %v3698_v62 = vpop.f32.mrb[15].mxu0  ;;  %v2515_v63 = vsel %vm2160_vm7, %v2511_v61, -inf }
 0xd34   : > { %2516 = vmax.xlane.f32.xlu0 %v2515_v63 }
 0xd4a   : > { %4066 = vrot.lane.b32.xlu0 %v5467_v10, %s5817_s7  ;;  %s5825_s7 = sld [smem:[#allocation62_spill]] }
 0xd4e   : > { %2613 = vrot.lane.b32.xlu0 %v5474_v18, %s5818_s20 }
 0xdc1   : > { %v2517_v3 = vpop.xlane.xlu0 %2516 }
 0xdc2   : > { %v2518_v4 = vsub.f32 %v2511_v61, %v2517_v3 }
 0xdc4   : > { %v2519_v5 = vmul.f32 1.442695, %v2518_v4 }
 0xdc5   : > { %v4067_v6 = vpop.permute.xlu0 %4066 }
 0xdc6   : > { %4106 = vpow2.f32 %v2519_v5  ;;  %v4069_v7 = vunpack.i.h.bf16 %v4067_v6  ;;  %v4068_v11 = vunpack.i.l.bf16 %v4067_v6  ;;  %v2908_v5 = vld [vmem:[#allocation27] sm:$0xff]  ;;  %v2909_v6 = vld [vmem:[#allocation27 + $0x8] sm:$0xff] }
 0xdc8   : > { %v3806_v12 = vpack.c.bf16 %v4069_v7, %v4068_v11  ;;  %v3822_v7 = vpack.c.bf16 %v2909_v6, %v2908_v5  ;;  %v2911_v11 = vld [vmem:[#allocation27 + $0x18] sm:$0xff] }
 0xdc9   : > { %v2614_v24 = vpop.permute.xlu0 %2613 }
 0xdca   : > { %3807 = vmatpush3.bf16.msra.mxu1 %v3806_v12 }
 0xdcb   : > { %3808 = vmatprep.subr.bf16.mxu1 %v4691_v0 }
 0xdd0   : > { %v4107_v13 = vpop.eup %4106 }
 0xdd1   : > { %v2521_v14 = vsel %vm2160_vm7, %v4107_v13, 0.0 }
 0xdd2   : > { %2522 = vadd.xlane.f32.xlu1 %v2521_v14  ;;  %v2995_v14 = vld [vmem:[%s5823_s13 + $0x10] sm:$0xff] }
 0xde3   : > { %4071 = vrot.lane.b32.xlu1 %v5467_v10, %s5818_s20  ;;  %s5742_s20 = sshll.u32 %s4861_s26, 7 }
 0xe5f   : > { %v2523_v15 = vpop.xlane.xlu1 %2522 }
 0xe60   : > { %4108 = vrcp.f32 %v2523_v15 }
 0xe63   : > { %v4072_v16 = vpop.permute.xlu1 %4071 }
 0xe64   : > { %v4074_v17 = vunpack.i.h.bf16 %v4072_v16  ;;  %v4073_v18 = vunpack.i.l.bf16 %v4072_v16  ;;  %v2996_v16 = vld [vmem:[%s5823_s13 + $0x18] sm:$0xff] }
 0xe66   : > { %v3809_v22 = vpack.c.bf16 %v4074_v17, %v4073_v18  ;;  %v3831_v17 = vpack.c.bf16 %v2996_v16, %v2995_v14  ;;  %v2997_v18 = vld [vmem:[%s5823_s13 + $0x20] sm:$0xff] }
 0xe6a   : > { %v4109_v19 = vpop.eup %4108 }
 0xe6b   : > { %v2525_v20 = vmul.f32 %v4109_v19, %v4107_v13  ;;  %v2994_v13 = vld [vmem:[%s5823_s13 + $0x8] sm:$0xff] }
 0xe6c   : > { %v2998_v19 = vld [vmem:[%s5823_s13 + $0x28] sm:$0xff] }
 0xe6d   : > { %v2527_v23 = vadd.f32 %v2526_v21, %v2525_v20  ;;  %3704 = vmatmul.mubr.msk.f32.vlgmr.msra.gmra.mrb[18].mxu1 %vm2160_vm7, %v2525_v20  ;;  %v3834_v20 = vpack.c.bf16 %v2998_v19, %v2997_v18 }
 0xe6e   : > { %3811 = vmatpush3.bf16.xpose.msk.msra.mxu1 %vm5463_vm6, %v3809_v22  ;;  %3710 = vmatprep.mubr.msk.f32.mxu1 %vm4692_vm0, %v4693_v1 }
 0xe6f   : > { %2528 = vst.msk [vmem:[#allocation3] sm:$0xff] %vm2160_vm7, %v2527_v23  ;;  %3821 = vmatprep.subr.bf16.mxu1 %v4691_v0 }
 0xe75   : > { %3711 = vmatmul.mubr.msk.f32.vlgmr.msra.gmra.mrb[20].mxu1 %vm1113_vm2, %v2614_v24 }
 0xe76   : > { %3739 = vmatprep.mubr.msk.f32.mxu1 %vm4692_vm0, %v4693_v1  ;;  %v2706_v43 = vld [vmem:[#allocation3] sm:$0xff]  ;;  %3823 = vmatpush3.bf16.msra.mxu1 %v3822_v7 }
 0xe77   : > { %3824 = vmatprep.subr.bf16.mxu1 %v4691_v0 }
 0xf40   : > { %v2604_v25 = vpop.f32.mrb[18].mxu1 }
 0xf41   : > { %v3705_v26 = vpop.f32.mrb[19].mxu1 }
 0xf48   : > { %v2691_v27 = vpop.f32.mrb[20].mxu1 }
 0xf49   : > { %v3712_v28 = vpop.f32.mrb[21].mxu1  ;;  %v2695_v9 = vsel %vm2160_vm7, %v2691_v27, -inf }
 0xf4a   : > { %2696 = vmax.xlane.f32.xlu1 %v2695_v9 }
 0xf5b   : > { %2429 = vrot.lane.b32.xlu1 %v2424_v59, %s5819_s1 }
 0xf5f   : > { %2609 = vrot.lane.b32.xlu1 %v2604_v25, %s5820_s0  ;;  %v3485_v25 = vld [vmem:[#allocation24] ss:$0 sm:$0xff] }
 0xfd7   : > { %v2697_v29 = vpop.xlane.xlu1 %2696 }
 0xfd8   : > { %v2698_v30 = vsub.f32 %v2691_v27, %v2697_v29  ;;  %v3486_v27 = vld [vmem:[#allocation25] ss:$0 sm:$0xff]  ;;  %v2999_v29 = vld [vmem:[%s5823_s13 + $0x30] sm:$0xff] }
 0xfda   : > { %v2699_v31 = vmul.f32 1.442695, %v2698_v30 }
 0xfdb   : > { %v2430_v32 = vpop.permute.xlu1 %2429 }
 0xfdc   : > { %4110 = vpow2.f32 %v2699_v31  ;;  %2432 = vst.msk [vmem:[#allocation2] sm:$0xff] %vm1445_vm3, %v2430_v32  ;;  %v3487_v31 = vld [vmem:[%s5824_s14] ss:$0 sm:$0xff]  ;;  %s3148_s14 = sshll.u32 %s1007_s16, 4  ;;  %s3149_s14 = int_to_ptr.vmem [resolvable:$true] %s3148_s14 }
 0xfdd   : > { %s4542_s9 = scalar_lea.vmem %s3149_s14, 128 }
 0xfde   : > { %p4543_p8 = scmp.ne.s32.totalorder %s3149_s14, %s4542_s9 }
 0xfdf   : > { %v2610_v33 = vpop.permute.xlu1 %2609 }
 0xfe0   : > { %2612 = vst.msk [vmem:[#allocation2] sm:$0xff] %vm1616_vm4, %v2610_v33  ;;  %p4544_p12 = pnand %p4543_p8, %p5827_p10 }
 0xfe2   : > { %p4545_p13 = pneg %p4544_p12 }
 0xfe6   : > { %v4111_v34 = vpop.eup %4110 }
 0xfe7   : > { %v2701_v35 = vsel %vm2160_vm7, %v4111_v34, 0.0 }
 0xfe8   : > { %2702 = vadd.xlane.f32.xlu0 %v2701_v35 }
 0xffe   : > { %4076 = vrot.lane.b32.xlu0 %v5467_v10, %s5821_s15  ;;  %s5826_s15 = sld [smem:[#allocation66_spill]] }
0x1075   : > { %v2703_v36 = vpop.xlane.xlu0 %2702 }
0x1076   : > { %4112 = vrcp.f32 %v2703_v36  ;;  %v3489_v36 = vld [vmem:[%s5825_s7] ss:$0 sm:$0xff]  ;;  %s4708_s7 = smov [#allocation29]  }
0x1077   : > { %s4546_s8 = sshll.u32 %s4708_s7, 4  ;;  %s4547_s8 = int_to_ptr.vmem [resolvable:$false] %s4546_s8 }
0x1078   : > { %s4548_s10 = scalar_lea.vmem %s4547_s8, 256  ;;  %p4549_p1 = scmp.lt.s32.totalorder %s3149_s14, %s4547_s8 }
0x1079   : > { %v4077_v37 = vpop.permute.xlu0 %4076  ;;  %p4550_p3 = scmp.lt.s32.totalorder %s4548_s10, %s4542_s9 }
0x107a   : > { %v4079_v38 = vunpack.i.h.bf16 %v4077_v37  ;;  %v4078_v39 = vunpack.i.l.bf16 %v4077_v37 }
0x107b   : > { %p4551_p2 = por %p4550_p3, %p4549_p1 }
0x107c   : > { %v3813_v40 = vpack.c.bf16 %v4079_v38, %v4078_v39 }
0x107d   : > { %p4552_p6 = pnand %p4551_p2, %p4545_p13 }
0x107e   : > { %3814 = vmatpush3.bf16.msra.mxu0 %v3813_v40 }
0x107f   : > { %3815 = vmatprep.subr.bf16.mxu0 %v4691_v0 }
0x1080   : > { %v4113_v41 = vpop.eup %4112 }
0x1081   : > { %v2705_v42 = vmul.f32 %v4113_v41, %v4111_v34 }
0x1083   : > { %v2707_v44 = vadd.f32 %v2706_v43, %v2705_v42  ;;  %3718 = vmatmul.mubr.msk.f32.vlgmr.msra.gmra.mrb[16].mxu0 %vm2160_vm7, %v2705_v42 }
0x1084   : > { %3728 = vmatprep.mubr.msk.f32.mxu0 %vm4692_vm0, %v4693_v1  ;;  %3817 = vmatpush3.bf16.msra.mxu0 %v3816_v8 }
0x1085   : > { %2708 = vst.msk [vmem:[#allocation3] sm:$0xff] %vm2160_vm7, %v2707_v44  ;;  %3818 = vmatprep.subr.bf16.mxu0 %v4691_v0 }
0x1088   : > { %3820 = vmatpush3.bf16.msra.mxu0 %v3819_v50 }
0x1089   : > { %3827 = vmatprep.subr.bf16.mxu0 %v4691_v0 }
0x108c   : > { %v3113_v10 = vld [vmem:[#allocation3] sm:$0xff] }
0x108d   : > { %v3114_v45 = vmul.f32 0.25, %v3113_v10 }
0x108f   : > { %3115 = vst.msk [vmem:[%s1007_s16] sm:$0xff] %vm2160_vm7, %v3114_v45 }
0x1156   : > { %v2784_v51 = vpop.f32.mrb[16].mxu0 }
0x1157   : > { %2789 = vrot.lane.b32.xlu0 %v2784_v51, %s5822_s5  ;;  %v3719_v52 = vpop.f32.mrb[17].mxu0  ;;  %s5606_s5 = scalar_lea.hbm %s5826_s15, %s5742_s20 }
0x11c9   : > { %v2790_v53 = vpop.permute.xlu0 %2789 }
0x11ca   : > { %2792 = vst.msk [vmem:[#allocation2] sm:$0xff] %vm1787_vm5, %v2790_v53 }
0x11d1   : > { %v2793_v54 = vld [vmem:[#allocation2] sm:$0xff] }
0x11d2   : > { %3729 = vmatmul.mubr.msk.f32.vlgmr.msra.gmra.mrb[18].mxu0 %vm1036_vm1, %v2793_v54 }
0x11d3   : > { %3758 = vmatprep.mubr.msk.f32.mxu0 %vm4692_vm0, %v4693_v1  ;;  %v2910_v1 = vld [vmem:[#allocation27 + $0x10] sm:$0xff] }
0x11d4   : > { %v3825_v12 = vpack.c.bf16 %v2911_v11, %v2910_v1 }
0x11d6   : > { %3826 = vmatpush3.bf16.msra.mxu1 %v3825_v12 }
0x12a5   : > { %v2874_v56 = vpop.f32.mrb[18].mxu0 }
0x12a6   : > { %v2875_v57 = vadd.f32 %v3483_v55, %v2874_v56  ;;  %v3730_v58 = vpop.f32.mrb[19].mxu0 }
0x12a8   : > { %v2878_v59 = vadd.f32 %v2875_v57, %v5455_v2  ;;  %v2993_v2 = vld [vmem:[%s5823_s13] sm:$0xff] }
0x12a9   : > { %v3828_v15 = vpack.c.bf16 %v2994_v13, %v2993_v2 }
0x12aa   : > { %v2879_v60 = vsel %vm1036_vm1, %v2878_v59, 0.0 }
0x12ab   : > { %2880 = vadd.xlane.f32.xlu1 %v2879_v60  ;;  %3829 = vmatpush3.bf16.msra.mxu0 %v3828_v15 }
0x12ac   : > { %3830 = vmatprep.subr.bf16.mxu0 %v4691_v0 }
0x12af   : > { %3832 = vmatpush3.bf16.msra.mxu0 %v3831_v17 }
0x12b0   : > { %3833 = vmatprep.subr.bf16.mxu0 %v4691_v0 }
0x12b3   : > { %3835 = vmatpush3.bf16.msra.mxu0 %v3834_v20 }
0x12b4   : > { %3836 = vmatprep.subr.bf16.mxu0 %v4691_v0  ;;  %v3000_v0 = vld [vmem:[%s5823_s13 + $0x38] sm:$0xff] }
0x12b5   : > { %v3837_v30 = vpack.c.bf16 %v3000_v0, %v2999_v29 }
0x12b7   : > { %3838 = vmatpush3.bf16.msra.mxu0 %v3837_v30 }
0x1338   : > { %v2881_v61 = vpop.xlane.xlu1 %2880 }
0x1339   : > { %v2882_v62 = vmul.f32 0.03125, %v2881_v61 }
0x133b   : > { %v2883_v63 = vsub.f32 %v2878_v59, %v2882_v62 }
0x133d   : > { %v2884_v3 = vmul.f32 %v2883_v63, %v2883_v63 }
0x133f   : > { %v2885_v4 = vsel %vm1036_vm1, %v2884_v3, 0.0 }
0x1340   : > { %2886 = vadd.xlane.f32.xlu0 %v2885_v4 }
0x13cd   : > { %v2887_v21 = vpop.xlane.xlu0 %2886 }
0x13ce   : > { %v2888_v22 = vmul.f32 0.03125, %v2887_v21 }
0x13d0   : > { %v2889_v23 = vadd.f32 1e-05, %v2888_v22 }
0x13d2   : > { %4114 = vrsqrt.f32 %v2889_v23 }
0x13dc   : > { %v4115_v24 = vpop.eup %4114 }
0x13dd   : > { %v2891_v26 = vmul.f32 %v4115_v24, %v2883_v63 }
0x13df   : > { %v2899_v28 = vmul.f32 %v3485_v25, %v2891_v26 }
0x13e1   : > { %v2907_v9 = vadd.f32 %v3486_v27, %v2899_v28 }
0x13e3   : > { %3740 = vmatmul.mubr.msk.f32.vlgmr.msra.gmra.mrb[22].mxu1 %vm1036_vm1, %v2907_v9 }
0x14b6   : > { %v2988_v32 = vpop.f32.mrb[22].mxu1 }
0x14b7   : > { %v2989_v33 = vadd.f32 %v3487_v31, %v2988_v32  ;;  %v3741_v34 = vpop.f32.mrb[23].mxu1 }
0x14b9   : > { %v2992_v35 = vmax.f32 %v2989_v33, 0.0 }
0x14bb   : > { %3759 = vmatmul.mubr.msk.f32.vlgmr.msra.gmra.mrb[20].mxu0 %vm3008_vm8, %v2992_v35 }
0x158e   : > { %v3078_v37 = vpop.f32.mrb[20].mxu0 }
0x158f   : > { %v3079_v38 = vadd.f32 %v3489_v36, %v3078_v37  ;;  %v3760_v39 = vpop.f32.mrb[21].mxu0 }
0x1591   : > { %v3082_v40 = vadd.f32 %v3079_v38, %v2907_v9 }
0x1593   : > { %v3083_v41 = vsel %vm1036_vm1, %v3082_v40, 0.0 }
0x1594   : > { %3084 = vadd.xlane.f32.xlu0 %v3083_v41 }
0x1621   : > { %v3085_v42 = vpop.xlane.xlu0 %3084 }
0x1622   : > { %v3086_v43 = vmul.f32 0.03125, %v3085_v42 }
0x1624   : > { %v3087_v44 = vsub.f32 %v3082_v40, %v3086_v43 }
0x1626   : > { %v3088_v10 = vmul.f32 %v3087_v44, %v3087_v44 }
0x1628   : > { %v3089_v45 = vsel %vm1036_vm1, %v3088_v10, 0.0 }
0x1629   : > { %3090 = vadd.xlane.f32.xlu1 %v3089_v45 }
0x162a   : > { %4555 = shalt.err (!%p4552_p6)
}
0x162b   : > { %s4556_s16 = scalar_lea.hbm %s5606_s5, 128  ;;  %s4560_s7 = scalar_lea.hbm %s5826_s15, 256 }
0x162c   : > { %p4557_p4 = scmp.ne.s32.totalorder %s5606_s5, %s4556_s16  ;;  %p4561_p0 = scmp.lt.u32.totalorder %s5606_s5, %s5826_s15 }
0x162d   : > { %p4562_p7 = scmp.lt.u32.totalorder %s4560_s7, %s4556_s16  ;;  %p4564_p8 = scmp.lt.u32.totalorder %s4556_s16, %s5606_s5 }
0x162e   : > { %p4558_p5 = pnand %p4557_p4, %p5827_p10 }
0x162f   : > { %p4563_p11 = por %p4562_p7, %p4561_p0 }
0x1630   : > { %p4559_p9 = pneg %p4558_p5 }
0x1631   : > { %p4565_p12 = por %p4564_p8, %p4563_p11 }
0x1633   : > { %p4566_p13 = pnand %p4565_p12, %p4559_p9 }
0x1635   : > { %4569 = shalt.err (!%p4566_p13)
}
0x1636   : > { %3896 = dma.vmem_to_hbm [thread:$0]  (%p5827_p10), %s3149_s14, 128, %s5606_s5, %s3122_s21  }
0x1637   : > { %s5828_s9 = sld [smem:[#allocation63_spill]]  ;;  %s5829_s0 = sld [smem:[#allocation64_spill]] }
0x1638   : > { %s1000_s7 = scalar_lea.vmem [#allocation28], %s5270_s12  ;;  %s5830_s5 = sshll.u32 %s4861_s26, 7 }
0x1639   : > { %s3135_s8 = sshll.u32 %s1000_s7, 4  ;;  %s5831_s11 = sld [smem:[#allocation65_spill]]  ;;  %s5642_s8 = int_to_ptr.vmem [resolvable:$true] %s3135_s8 }
0x163a   : > { %s3117_s10 = scalar_lea.sflag [#allocation6], %s5267_s17  ;;  %s4570_s20 = scalar_lea.vmem %s5642_s8, 128 }
0x163b   : > { %p4571_p1 = scmp.ne.s32.totalorder %s5642_s8, %s4570_s20  ;;  %s4709_s12 = smov [#allocation28]  }
0x163c   : > { %s4574_s26 = sshll.u32 %s4709_s12, 4  ;;  %s4575_s26 = int_to_ptr.vmem [resolvable:$false] %s4574_s26 }
0x163d   : > { %v3491_v49 = vld [vmem:[%s5828_s9] ss:$0 sm:$0xff]  ;;  %p4572_p3 = pnand %p4571_p1, %p5827_p10  ;;  %s4576_s9 = scalar_lea.vmem %s4575_s26, 256 }
0x163e   : > { %v3492_v51 = vld [vmem:[%s5829_s0] ss:$0 sm:$0xff]  ;;  %p4577_p6 = scmp.lt.s32.totalorder %s5642_s8, %s4575_s26  ;;  %p4578_p4 = scmp.lt.s32.totalorder %s4576_s9, %s4570_s20 }
0x163f   : > { %s5640_s13 = scalar_lea.hbm %s5831_s11, %s5830_s5  ;;  %p4573_p2 = pneg %p4572_p3 }
0x1640   : > { %p4579_p5 = por %p4578_p4, %p4577_p6 }
0x1642   : > { %p4580_p9 = pnand %p4579_p5, %p4573_p2 }
0x16b6   : > { %v3091_v46 = vpop.xlane.xlu1 %3090 }
0x16b7   : > { %v3092_v47 = vmul.f32 0.03125, %v3091_v46 }
0x16b9   : > { %v3093_v8 = vadd.f32 1e-05, %v3092_v47 }
0x16bb   : > { %4116 = vrsqrt.f32 %v3093_v8 }
0x16c5   : > { %v4117_v48 = vpop.eup %4116 }
0x16c6   : > { %v3095_v50 = vmul.f32 %v4117_v48, %v3087_v44 }
0x16c8   : > { %v3103_v52 = vmul.f32 %v3491_v49, %v3095_v50 }
0x16ca   : > { %v3111_v53 = vadd.f32 %v3492_v51, %v3103_v52 }
0x16cc   : > { %3112 = vst.msk [vmem:[%s1000_s7] sm:$0xff] %vm1036_vm1, %v3111_v53 }
0x16cd   : > { %4583 = shalt.err (!%p4580_p9)
}
0x16ce   : > { %s4584_s17 = scalar_lea.hbm %s5640_s13, 128  ;;  %s4588_s0 = scalar_lea.hbm %s5831_s11, 256 }
0x16cf   : > { %p4585_p0 = scmp.ne.s32.totalorder %s5640_s13, %s4584_s17  ;;  %p4589_p8 = scmp.lt.u32.totalorder %s5640_s13, %s5831_s11 }
0x16d0   : > { %p4590_p12 = scmp.lt.u32.totalorder %s4588_s0, %s4584_s17  ;;  %p4592_p1 = scmp.lt.u32.totalorder %s4584_s17, %s5640_s13 }
0x16d1   : > { %p4586_p7 = pnand %p4585_p0, %p5827_p10 }
0x16d2   : > { %p4591_p13 = por %p4590_p12, %p4589_p8 }
0x16d3   : > { %p4587_p11 = pneg %p4586_p7 }
0x16d4   : > { %p4593_p3 = por %p4592_p1, %p4591_p13 }
0x16d6   : > { %p4594_p2 = pnand %p4593_p3, %p4587_p11 }
0x16d8   : > { %4597 = shalt.err (!%p4594_p2)
}
0x16d9   : > { %3895 = dma.vmem_to_hbm [thread:$0]  (%p5827_p10), %s5642_s8, 128, %s5640_s13, %s3117_s10  }
0x16da PF: > { %s3160_s14 = sand.u32 1, %s4660_s29   ;;  %p5832_p6 = scmp.ne.s32.totalorder %s5788_s27, 0 }
0x16db   : > { %p5833_p4 = scmp.ge.s32.totalorder %s4672_s30, 2  ;;  %s3161_s21 = scalar_lea.sflag [#allocation6], %s3160_s14 }
0x16dd   : > { %p3947_p5 = pnand %p5833_p4, %p5832_p6 }
0x16df   : > { %4651 = dma.done.wait (!%p3947_p5), %s3161_s21, 128  }
0x16e0   : > { %4653 = vsyncadd (!%p3947_p5), %s3161_s21, 4294967168  ;;  %s3170_s20 = scalar_lea.sflag [#allocation30], %s3160_s14 }
0x16e1   : > { %4655 = dma.done.wait (!%p3947_p5), %s3170_s20, 128  }
0x16e2   : > { %4657 = vsyncadd (!%p3947_p5), %s3170_s20, 4294967168  ;;  %p51_p10 = scmp.ge.s32.totalorder %s5164_s4, 4   ;;  %s5834_s29 = smov %s4664_s2 }
0x16e3   : > { %s5835_s2 = smov %s4668_s6  ;;  %s5836_s6 = smov %s5176_s3 }
0x16e4   : > { %s5837_s30 = smov %s5164_s4  ;;  %53 = sbr.rel (!%p51_p10) target bundleno = 41 (0x29), region = 246 }
0x16eb   :  { %3175 = vsyncpa [#allocation5], 1 }
0x16ec   :  { %3177 = vsyncpa [#allocation5 + $0x1], 1 }
0x16ed   :  { %3178 = vsyncpa [#allocation8], 1 }
0x16ee   :  { %3180 = vsyncpa [#allocation8 + $0x1], 1 }
0x16ef   :  { %3181 = vsyncpa [#allocation11], 1 }
0x16f0   :  { %3182 = vsyncpa [#allocation14], 1 }
0x16f1   :  { %3183 = vsyncpa [#allocation17], 1 }
0x16f2   :  { %3184 = vsyncpa [#allocation20], 1 }
0x16f3   :  { %3185 = vsyncpa [#allocation23], 1 }
0x16f4   :  { %3186 = vsyncpa [#allocation26], 1 }
0x16f5   :  { %3187 = vsyncpa [#allocation6], 1 }
0x16f6   :  { %3189 = vsyncpa [#allocation6 + $0x1], 1 }
0x16f7   :  { %3190 = vsyncpa [#allocation30], 1 }
0x16f8   :  { %3192 = vsyncpa [#allocation30 + $0x1], 1 }

// kernel: tpu_custom_call.1
= control target key start
LH: loop header
LB: loop body
LE: loop exit
PB: predicated region body
PF: predicated region fallthrough
CT: control target
= control target key end

     0   :  { %s5685_s0 = inlined_call_operand.hbm [shape: f32[2,8,32], index: 0, kind: input, shape index: {}]   ;;  %s5686_s1 = inlined_call_operand.vmem [shape: f32[2,16,32], index: 1, kind: input, shape index: {}]   ;;  %s5687_s2 = inlined_call_operand.hbm [shape: f32[2,1,8], index: 2, kind: input, shape index: {}]   ;;  %s5688_s3 = inlined_call_operand.hbm [shape: f32[8,8], index: 3, kind: input, shape index: {}]   ;;  %s5689_s4 = inlined_call_operand.vmem [shape: f32[32,96], index: 4, kind: input, shape index: {}]   ;;  %s5690_s5 = inlined_call_operand.hbm [shape: f32[1,96], index: 5, kind: input, shape index: {}]   ;;  %s5691_s6 = inlined_call_operand.vmem [shape: f32[32,32], index: 6, kind: input, shape index: {}]   ;;  %s5692_s7 = inlined_call_operand.hbm [shape: f32[1,32], index: 7, kind: input, shape index: {}]   ;;  %s5693_s8 = inlined_call_operand.hbm [shape: f32[1,32], index: 8, kind: input, shape index: {}]   ;;  %s5694_s9 = inlined_call_operand.hbm [shape: f32[1,32], index: 9, kind: input, shape index: {}]   ;;  %s5695_s10 = inlined_call_operand.vmem [shape: f32[32,32], index: 10, kind: input, shape index: {}]   ;;  %s5696_s11 = inlined_call_operand.hbm [shape: f32[1,32], index: 11, kind: input, shape index: {}]   ;;  %s5697_s12 = inlined_call_operand.hbm [shape: f32[32,64], index: 12, kind: input, shape index: {}]   ;;  %s5698_s13 = inlined_call_operand.hbm [shape: f32[1,64], index: 13, kind: input, shape index: {}]   ;;  %s5699_s14 = inlined_call_operand.hbm [shape: f32[32,32], index: 14, kind: input, shape index: {}]   ;;  %s5700_s15 = inlined_call_operand.hbm [shape: f32[1,32], index: 15, kind: input, shape index: {}]   ;;  %s5701_s16 = inlined_call_operand.hbm [shape: f32[1,32], index: 16, kind: input, shape index: {}]   ;;  %s5702_s17 = inlined_call_operand.hbm [shape: f32[1,32], index: 17, kind: input, shape index: {}]   ;;  %s5703_s18 = inlined_call_operand.hbm [shape: f32[32,64], index: 18, kind: input, shape index: {}]   ;;  %s5704_s19 = inlined_call_operand.vmem [shape: f32[1,64], index: 19, kind: input, shape index: {}]   ;;  %s5705_s20 = inlined_call_operand.vmem [shape: f32[64,32], index: 20, kind: input, shape index: {}]   ;;  %s5706_s21 = inlined_call_operand.vmem [shape: f32[1,32], index: 21, kind: input, shape index: {}]   ;;  %s5707_s22 = inlined_call_operand.vmem [shape: f32[1,32], index: 22, kind: input, shape index: {}]   ;;  %s5708_s23 = inlined_call_operand.vmem [shape: f32[1,32], index: 23, kind: input, shape index: {}]   ;;  %s5709_s24 = inlined_call_operand.hbm [shape: f32[2,8,32], index: 24, kind: output, shape index: {0}]   ;;  %s5710_s25 = inlined_call_operand.hbm [shape: f32[2,8,16], index: 25, kind: output, shape index: {1}]  }
   0x1   :  { %5745 = sst [smem:[#allocation42_spill]] %s5685_s0 }
   0x2   :  { %5746 = sst [smem:[#allocation43_spill]] %s5686_s1 }
   0x3   :  { %5747 = sst [smem:[#allocation44_spill]] %s5687_s2 }
   0x4   :  { %5748 = sst [smem:[#allocation45_spill]] %s5688_s3 }
   0x5   :  { %5749 = sst [smem:[#allocation46_spill]] %s5689_s4 }
   0x6   :  { %5750 = sst [smem:[#allocation47_spill]] %s5690_s5 }
   0x7   :  { %5751 = sst [smem:[#allocation48_spill]] %s5691_s6 }
   0x8   :  { %5752 = sst [smem:[#allocation49_spill]] %s5692_s7 }
   0x9   :  { %5753 = sst [smem:[#allocation50_spill]] %s5693_s8 }
   0xa   :  { %5754 = sst [smem:[#allocation51_spill]] %s5694_s9 }
   0xb   :  { %5755 = sst [smem:[#allocation52_spill]] %s5695_s10 }
   0xc   :  { %5756 = sst [smem:[#allocation53_spill]] %s5696_s11 }
   0xd   :  { %5757 = sst [smem:[#allocation54_spill]] %s5697_s12 }
   0xe   :  { %5758 = sst [smem:[#allocation55_spill]] %s5698_s13 }
   0xf   :  { %5759 = sst [smem:[#allocation56_spill]] %s5699_s14 }
  0x10   :  { %5760 = sst [smem:[#allocation57_spill]] %s5700_s15 }
  0x11   :  { %5761 = sst [smem:[#allocation58_spill]] %s5701_s16 }
  0x12   :  { %5762 = sst [smem:[#allocation59_spill]] %s5702_s17 }
  0x13   :  { %5763 = sst [smem:[#allocation60_spill]] %s5704_s19 }
  0x14   :  { %5764 = sst [smem:[#allocation61_spill]] %s5705_s20 }
  0x15   :  { %5765 = sst [smem:[#allocation62_spill]] %s5706_s21 }
  0x16   :  { %5766 = sst [smem:[#allocation63_spill]] %s5707_s22 }
  0x17   :  { %5767 = sst [smem:[#allocation64_spill]] %s5708_s23 }
  0x18   :  { %5768 = sst [smem:[#allocation65_spill]] %s5709_s24 }
  0x19   :  { %5769 = sst [smem:[#allocation66_spill]] %s5710_s25 }
  0x1a   :  { %31 = vsyncpa [#allocation5], 0 }
  0x1b   :  { %33 = vsyncpa [#allocation5 + $0x1], 0 }
  0x1c   :  { %34 = vsyncpa [#allocation8], 0 }
  0x1d   :  { %36 = vsyncpa [#allocation8 + $0x1], 0 }
  0x1e   :  { %37 = vsyncpa [#allocation11], 0 }
  0x1f   :  { %38 = vsyncpa [#allocation14], 0 }
  0x20   :  { %39 = vsyncpa [#allocation17], 0 }
  0x21   :  { %40 = vsyncpa [#allocation20], 0 }
  0x22   :  { %41 = vsyncpa [#allocation23], 0 }
  0x23   :  { %42 = vsyncpa [#allocation26], 0 }
  0x24   :  { %43 = vsyncpa [#allocation6], 0 }
  0x25   :  { %45 = vsyncpa [#allocation6 + $0x1], 0 }
  0x26   :  { %46 = vsyncpa [#allocation30], 0 }
  0x27   :  { %48 = vsyncpa [#allocation30 + $0x1], 0  ;;  %s4840_s29 = smov 0   ;;  %s4842_s2 = smov 0  }
  0x28   :  { %s4844_s6 = smov 0   ;;  %s4846_s30 = smov 0  }
  0x29 LB: > { %s4674_s7 = smov [#allocation9]   ;;  %s4861_s26 = sadd.s32 4294967295, %s4672_s30   ;;  %s4672_s30 = sphi %s4846_s30, %s5837_s30   ;;  %s4668_s6 = sphi %s4844_s6, %s5836_s6   ;;  %s4664_s2 = sphi %s4842_s2, %s5835_s2   ;;  %s4660_s29 = sphi %s4840_s29, %s5834_s29  }
  0x2a   : > { %s643_s3 = sshll.u32 %s4674_s7, 4  ;;  %p3406_p0 = scmp.ge.s32.totalorder %s4672_s30, 1  ;;  %s4866_s3 = int_to_ptr.vmem [resolvable:$true] %s643_s3 }
  0x2b   : > { %p5725_p1 = scmp.eq.s32.totalorder %s4861_s26, 0  ;;  %p630_p2 = scmp.lt.s32.totalorder %s4672_s30, 3 }
  0x2c   : > { %s4675_s8 = smov [#allocation10]   ;;  %s4676_s4 = smov [#allocation13]  }
  0x2d   : > { %p4868_p3 = pnand %p3406_p0, %p630_p2  ;;  %s657_s27 = sshll.u32 %s4675_s8, 4  ;;  %s4875_s27 = int_to_ptr.vmem [resolvable:$true] %s657_s27 }
  0x2e   : > { %s682_s28 = sshll.u32 %s4676_s4, 4  ;;  %s4677_s5 = smov [#allocation16]   ;;  %s4883_s28 = int_to_ptr.vmem [resolvable:$true] %s682_s28 }
  0x2f   : > { %s5770_s1 = scalar_select %p4868_p3, 1, 0 }
  0x30   : > { %p3899_p5 = pneg %p4868_p3  ;;  %s4885_s0 = sshll.u32 %s4677_s5, 4  ;;  %s708_s0 = int_to_ptr.vmem [resolvable:$true] %s4885_s0 }
  0x31   : > { %s5772_s23 = sld [smem:[#allocation45_spill]] }
  0x32   : > { %p4879_p6 = pnand %p3899_p5, %p5725_p1 }
  0x34   : > { %p4895_p8 = pneg %p4879_p6 }
  0x37   : > { %s4118_s22 = scalar_lea.hbm %s5772_s23, 128 }
  0x38   : > { %p4119_p7 = scmp.ne.s32.totalorder %s5772_s23, %s4118_s22  ;;  %p4125_p11 = scmp.lt.u32.totalorder %s4118_s22, %s5772_s23 }
  0x3a   : > { %p4121_p9 = pnand %p4895_p8, %p4119_p7 }
  0x3c   : > { %p4122_p10 = pneg %p4121_p9 }
  0x3e   : > { %p4127_p12 = pnand %p4125_p11, %p4122_p10 }
  0x40   : > { %4130 = shalt.err (!%p4127_p12)
}
  0x41   : > { %s4131_s24 = scalar_lea.vmem %s4866_s3, 128  ;;  %p4139_p5 = scmp.lt.s32.totalorder %s4866_s3, %s4866_s3 }
  0x42   : > { %p4132_p13 = scmp.ne.s32.totalorder %s4866_s3, %s4131_s24  ;;  %p4140_p4 = scmp.lt.s32.totalorder %s4131_s24, %s4131_s24 }
  0x44   : > { %p4134_p0 = pnand %p4132_p13, %p4895_p8  ;;  %p4141_p7 = por %p4140_p4, %p4139_p5 }
  0x46   : > { %p4135_p2 = pneg %p4134_p0 }
  0x48   : > { %p4142_p9 = pnand %p4141_p7, %p4135_p2 }
  0x4a   : > { %4145 = shalt.err (!%p4142_p9)
}
  0x4b   : > { %3902 = dma.hbm_to_vmem [thread:$0]  (!%p4879_p6), %s5772_s23, 128, %s4866_s3, [#allocation8]  }
  0x4c   : > { %s5774_s8 = sld [smem:[#allocation47_spill]] }
  0x52   : > { %s4146_s5 = scalar_lea.hbm %s5774_s8, 16 }
  0x53   : > { %p4147_p10 = scmp.ne.s32.totalorder %s5774_s8, %s4146_s5  ;;  %p4153_p12 = scmp.lt.u32.totalorder %s4146_s5, %s5774_s8 }
  0x55   : > { %p4149_p4 = pnand %p4147_p10, %p4895_p8 }
  0x57   : > { %p4150_p11 = pneg %p4149_p4 }
  0x59   : > { %p4155_p13 = pnand %p4153_p12, %p4150_p11 }
  0x5b   : > { %4158 = shalt.err (!%p4155_p13)
}
  0x5c   : > { %s4159_s3 = scalar_lea.vmem %s4875_s27, 16  ;;  %s4166_s19 = scalar_lea.vmem %s4875_s27, 32 }
  0x5d   : > { %p4160_p0 = scmp.ne.s32.totalorder %s4875_s27, %s4159_s3  ;;  %p4167_p7 = scmp.lt.s32.totalorder %s4875_s27, %s4875_s27 }
  0x5e   : > { %p4168_p9 = scmp.lt.s32.totalorder %s4166_s19, %s4159_s3 }
  0x5f   : > { %p4162_p2 = pnand %p4160_p0, %p4895_p8 }
  0x60   : > { %p4169_p10 = por %p4168_p9, %p4167_p7 }
  0x61   : > { %p4163_p5 = pneg %p4162_p2 }
  0x63   : > { %p4170_p4 = pnand %p4169_p10, %p4163_p5 }
  0x65   : > { %4173 = shalt.err (!%p4170_p4)
}
  0x66   : > { %3905 = dma.hbm_to_vmem [thread:$0]  (!%p4879_p6), %s5774_s8, 16, %s4875_s27, [#allocation11]  }
  0x67   : > { %s5775_s25 = sld [smem:[#allocation50_spill]] }
  0x6d   : > { %s4174_s7 = scalar_lea.hbm %s5775_s25, 16 }
  0x6e   : > { %p4175_p11 = scmp.ne.s32.totalorder %s5775_s25, %s4174_s7  ;;  %p4181_p0 = scmp.lt.u32.totalorder %s4174_s7, %s5775_s25 }
  0x70   : > { %p4177_p12 = pnand %p4175_p11, %p4895_p8 }
  0x72   : > { %p4178_p13 = pneg %p4177_p12 }
  0x74   : > { %p4183_p2 = pnand %p4181_p0, %p4178_p13 }
  0x76   : > { %4186 = shalt.err (!%p4183_p2)
}
  0x77   : > { %s4187_s27 = scalar_lea.vmem %s4883_s28, 16  ;;  %s4194_s10 = scalar_lea.vmem %s4883_s28, 32 }
  0x78   : > { %p4188_p5 = scmp.ne.s32.totalorder %s4883_s28, %s4187_s27  ;;  %p4195_p10 = scmp.lt.s32.totalorder %s4883_s28, %s4883_s28 }
  0x79   : > { %p4196_p4 = scmp.lt.s32.totalorder %s4194_s10, %s4187_s27 }
  0x7a   : > { %p4190_p7 = pnand %p4188_p5, %p4895_p8 }
  0x7b   : > { %p4197_p11 = por %p4196_p4, %p4195_p10 }
  0x7c   : > { %p4191_p9 = pneg %p4190_p7 }
  0x7e   : > { %p4198_p12 = pnand %p4197_p11, %p4191_p9 }
  0x80   : > { %4201 = shalt.err (!%p4198_p12)
}
  0x81   : > { %3911 = dma.hbm_to_vmem [thread:$0]  (!%p4879_p6), %s5775_s25, 16, %s4883_s28, [#allocation14]  }
  0x82   : > { %s4678_s22 = smov [#allocation19]   ;;  %s5776_s11 = sld [smem:[#allocation53_spill]] }
  0x83   : > { %s731_s7 = sshll.u32 %s4678_s22, 4  ;;  %s732_s7 = int_to_ptr.vmem [resolvable:$true] %s731_s7 }
  0x88   : > { %s4202_s3 = scalar_lea.hbm %s5776_s11, 16 }
  0x89   : > { %p4203_p13 = scmp.ne.s32.totalorder %s5776_s11, %s4202_s3  ;;  %p4209_p5 = scmp.lt.u32.totalorder %s4202_s3, %s5776_s11 }
  0x8b   : > { %p4205_p0 = pnand %p4203_p13, %p4895_p8 }
  0x8d   : > { %p4206_p2 = pneg %p4205_p0 }
  0x8f   : > { %p4211_p7 = pnand %p4209_p5, %p4206_p2 }
  0x91   : > { %4214 = shalt.err (!%p4211_p7)
}
  0x92   : > { %s4215_s28 = scalar_lea.vmem %s708_s0, 16  ;;  %s4222_s20 = scalar_lea.vmem %s708_s0, 32 }
  0x93   : > { %p4216_p9 = scmp.ne.s32.totalorder %s708_s0, %s4215_s28  ;;  %p4223_p11 = scmp.lt.s32.totalorder %s708_s0, %s708_s0 }
  0x94   : > { %p4224_p12 = scmp.lt.s32.totalorder %s4222_s20, %s4215_s28 }
  0x95   : > { %p4218_p10 = pnand %p4216_p9, %p4895_p8 }
  0x96   : > { %p4225_p1 = por %p4224_p12, %p4223_p11 }
  0x97   : > { %p4219_p4 = pneg %p4218_p10 }
  0x99   : > { %p4226_p3 = pnand %p4225_p1, %p4219_p4 }
  0x9b   : > { %4229 = shalt.err (!%p4226_p3)
}
  0x9c   : > { %3917 = dma.hbm_to_vmem [thread:$0]  (!%p4879_p6), %s5776_s11, 16, %s708_s0, [#allocation17]  }
  0x9d   : > { %s5777_s13 = sld [smem:[#allocation55_spill]] }
  0xa3   : > { %s4230_s24 = scalar_lea.hbm %s5777_s13, 16 }
  0xa4   : > { %p4231_p13 = scmp.ne.s32.totalorder %s5777_s13, %s4230_s24  ;;  %p4237_p3 = scmp.lt.u32.totalorder %s4230_s24, %s5777_s13 }
  0xa6   : > { %p4233_p0 = pnand %p4231_p13, %p4895_p8 }
  0xa8   : > { %p4234_p1 = pneg %p4233_p0 }
  0xaa   : > { %p4239_p2 = pnand %p4237_p3, %p4234_p1 }
  0xac   : > { %4242 = shalt.err (!%p4239_p2)
}
  0xad   : > { %s4243_s28 = scalar_lea.vmem %s732_s7, 16  ;;  %s4250_s0 = scalar_lea.vmem %s732_s7, 32 }
  0xae   : > { %p4244_p5 = scmp.ne.s32.totalorder %s732_s7, %s4243_s28  ;;  %p4251_p10 = scmp.lt.s32.totalorder %s732_s7, %s732_s7 }
  0xaf   : > { %p4252_p4 = scmp.lt.s32.totalorder %s4250_s0, %s4243_s28 }
  0xb0   : > { %p4246_p7 = pnand %p4244_p5, %p4895_p8 }
  0xb1   : > { %p4253_p11 = por %p4252_p4, %p4251_p10 }
  0xb2   : > { %p4247_p9 = pneg %p4246_p7 }
  0xb4   : > { %p4254_p12 = pnand %p4253_p11, %p4247_p9 }
  0xb6   : > { %4257 = shalt.err (!%p4254_p12)
}
  0xb7   : > { %3923 = dma.hbm_to_vmem [thread:$0]  (!%p4879_p6), %s5777_s13, 16, %s732_s7, [#allocation20]  }
  0xb8   : > { %s4679_s22 = smov [#allocation22]   ;;  %s4680_s5 = smov [#allocation25]  }
  0xb9   : > { %s755_s8 = sshll.u32 %s4679_s22, 4  ;;  %s777_s24 = sshll.u32 %s4680_s5, 4  ;;  %s756_s8 = int_to_ptr.vmem [resolvable:$true] %s755_s8  ;;  %s778_s24 = int_to_ptr.vmem [resolvable:$true] %s777_s24 }
  0xba   : > { %s5778_s15 = sld [smem:[#allocation57_spill]] }
  0xc0   : > { %s4258_s27 = scalar_lea.hbm %s5778_s15, 16 }
  0xc1   : > { %p4259_p13 = scmp.ne.s32.totalorder %s5778_s15, %s4258_s27  ;;  %p4265_p3 = scmp.lt.u32.totalorder %s4258_s27, %s5778_s15 }
  0xc3   : > { %p4261_p0 = pnand %p4259_p13, %p4895_p8 }
  0xc5   : > { %p4262_p1 = pneg %p4261_p0 }
  0xc7   : > { %p4267_p2 = pnand %p4265_p3, %p4262_p1 }
  0xc9   : > { %4270 = shalt.err (!%p4267_p2)
}
  0xca   : > { %s4271_s7 = scalar_lea.vmem %s756_s8, 16  ;;  %s4278_s21 = scalar_lea.vmem %s756_s8, 32 }
  0xcb   : > { %p4272_p5 = scmp.ne.s32.totalorder %s756_s8, %s4271_s7  ;;  %p4279_p10 = scmp.lt.s32.totalorder %s756_s8, %s756_s8 }
  0xcc   : > { %p4280_p4 = scmp.lt.s32.totalorder %s4278_s21, %s4271_s7 }
  0xcd   : > { %p4274_p7 = pnand %p4272_p5, %p4895_p8 }
  0xce   : > { %p4281_p11 = por %p4280_p4, %p4279_p10 }
  0xcf   : > { %p4275_p9 = pneg %p4274_p7 }
  0xd1   : > { %p4282_p12 = pnand %p4281_p11, %p4275_p9 }
  0xd3   : > { %4285 = shalt.err (!%p4282_p12)
}
  0xd4   : > { %3929 = dma.hbm_to_vmem [thread:$0]  (!%p4879_p6), %s5778_s15, 16, %s756_s8, [#allocation23]  }
  0xd5   : > { %s5779_s17 = sld [smem:[#allocation59_spill]] }
  0xdb   : > { %s4286_s27 = scalar_lea.hbm %s5779_s17, 16 }
  0xdc   : > { %p4287_p13 = scmp.ne.s32.totalorder %s5779_s17, %s4286_s27  ;;  %p4293_p3 = scmp.lt.u32.totalorder %s4286_s27, %s5779_s17 }
  0xde   : > { %p4289_p0 = pnand %p4287_p13, %p4895_p8 }
  0xe0   : > { %p4290_p1 = pneg %p4289_p0 }
  0xe2   : > { %p4295_p2 = pnand %p4293_p3, %p4290_p1 }
  0xe4   : > { %4298 = shalt.err (!%p4295_p2)
}
  0xe5   : > { %s4299_s7 = scalar_lea.vmem %s778_s24, 16  ;;  %s4306_s8 = scalar_lea.vmem %s778_s24, 32 }
  0xe6   : > { %p4300_p5 = scmp.ne.s32.totalorder %s778_s24, %s4299_s7  ;;  %p4307_p10 = scmp.lt.s32.totalorder %s778_s24, %s778_s24 }
  0xe7   : > { %p4308_p4 = scmp.lt.s32.totalorder %s4306_s8, %s4299_s7 }
  0xe8   : > { %p4302_p7 = pnand %p4300_p5, %p4895_p8 }
  0xe9   : > { %p4309_p11 = por %p4308_p4, %p4307_p10 }
  0xea   : > { %p4303_p9 = pneg %p4302_p7 }
  0xec   : > { %p4310_p12 = pnand %p4309_p11, %p4303_p9 }
  0xee   : > { %4313 = shalt.err (!%p4310_p12)
}
  0xef   : > { %3935 = dma.hbm_to_vmem [thread:$0]  (!%p4879_p6), %s5779_s17, 16, %s778_s24, [#allocation26]  }
  0xf0   : > { %s4681_s5 = smov [#allocation12]   ;;  %s4682_s19 = smov [#allocation15]  }
  0xf1   : > { %s671_s3 = sshll.u32 %s4681_s5, 4  ;;  %s693_s27 = sshll.u32 %s4682_s19, 4  ;;  %s672_s3 = int_to_ptr.vmem [resolvable:$true] %s671_s3  ;;  %s694_s27 = int_to_ptr.vmem [resolvable:$true] %s693_s27 }
  0xf2   : > { %s5780_s0 = sld [smem:[#allocation49_spill]] }
  0xf8   : > { %s4314_s20 = scalar_lea.hbm %s5780_s0, 16 }
  0xf9   : > { %p4315_p13 = scmp.ne.s32.totalorder %s5780_s0, %s4314_s20  ;;  %p4321_p3 = scmp.lt.u32.totalorder %s4314_s20, %s5780_s0 }
  0xfb   : > { %p4317_p0 = pnand %p4315_p13, %p4895_p8 }
  0xfd   : > { %p4318_p1 = pneg %p4317_p0 }
  0xff   : > { %p4323_p2 = pnand %p4321_p3, %p4318_p1 }
 0x101   : > { %4326 = shalt.err (!%p4323_p2)
}
 0x102   : > { %s4327_s24 = scalar_lea.vmem %s672_s3, 16  ;;  %s4334_s22 = scalar_lea.vmem %s672_s3, 32 }
 0x103   : > { %p4328_p5 = scmp.ne.s32.totalorder %s672_s3, %s4327_s24  ;;  %p4335_p10 = scmp.lt.s32.totalorder %s672_s3, %s672_s3 }
 0x104   : > { %p4336_p4 = scmp.lt.s32.totalorder %s4334_s22, %s4327_s24 }
 0x105   : > { %p4330_p7 = pnand %p4328_p5, %p4895_p8 }
 0x106   : > { %p4337_p11 = por %p4336_p4, %p4335_p10 }
 0x107   : > { %p4331_p9 = pneg %p4330_p7 }
 0x109   : > { %p4338_p12 = pnand %p4337_p11, %p4331_p9 }
 0x10b   : > { %4341 = shalt.err (!%p4338_p12)
}
 0x10c   : > { %3908 = dma.hbm_to_vmem [thread:$0]  (!%p4879_p6), %s5780_s0, 16, %s672_s3, [#allocation11]  }
 0x10d   : > { %s5781_s28 = sld [smem:[#allocation51_spill]] }
 0x113   : > { %s4342_s20 = scalar_lea.hbm %s5781_s28, 16 }
 0x114   : > { %p4343_p13 = scmp.ne.s32.totalorder %s5781_s28, %s4342_s20  ;;  %p4349_p3 = scmp.lt.u32.totalorder %s4342_s20, %s5781_s28 }
 0x116   : > { %p4345_p0 = pnand %p4343_p13, %p4895_p8 }
 0x118   : > { %p4346_p1 = pneg %p4345_p0 }
 0x11a   : > { %p4351_p2 = pnand %p4349_p3, %p4346_p1 }
 0x11c   : > { %4354 = shalt.err (!%p4351_p2)
}
 0x11d   : > { %s4355_s22 = scalar_lea.vmem %s694_s27, 16  ;;  %s4362_s3 = scalar_lea.vmem %s694_s27, 32 }
 0x11e   : > { %p4356_p5 = scmp.ne.s32.totalorder %s694_s27, %s4355_s22  ;;  %p4363_p10 = scmp.lt.s32.totalorder %s694_s27, %s694_s27 }
 0x11f   : > { %p4364_p4 = scmp.lt.s32.totalorder %s4362_s3, %s4355_s22 }
 0x120   : > { %p4358_p7 = pnand %p4356_p5, %p4895_p8 }
 0x121   : > { %p4365_p11 = por %p4364_p4, %p4363_p10 }
 0x122   : > { %p4359_p9 = pneg %p4358_p7 }
 0x124   : > { %p4366_p12 = pnand %p4365_p11, %p4359_p9 }
 0x126   : > { %4369 = shalt.err (!%p4366_p12)
}
 0x127   : > { %3914 = dma.hbm_to_vmem [thread:$0]  (!%p4879_p6), %s5781_s28, 16, %s694_s27, [#allocation14]  }
 0x128   : > { %s4683_s11 = smov [#allocation18]   ;;  %s5782_s12 = sld [smem:[#allocation54_spill]] }
 0x129   : > { %s717_s10 = sshll.u32 %s4683_s11, 4  ;;  %s718_s10 = int_to_ptr.vmem [resolvable:$true] %s717_s10 }
 0x12e   : > { %s4370_s8 = scalar_lea.hbm %s5782_s12, 512 }
 0x12f   : > { %p4371_p13 = scmp.ne.s32.totalorder %s5782_s12, %s4370_s8  ;;  %p4377_p3 = scmp.lt.u32.totalorder %s4370_s8, %s5782_s12 }
 0x131   : > { %p4373_p0 = pnand %p4371_p13, %p4895_p8 }
 0x133   : > { %p4374_p1 = pneg %p4373_p0 }
 0x135   : > { %p4379_p2 = pnand %p4377_p3, %p4374_p1 }
 0x137   : > { %4382 = shalt.err (!%p4379_p2)
}
 0x138   : > { %s4383_s27 = scalar_lea.vmem %s718_s10, 512  ;;  %p4391_p10 = scmp.lt.s32.totalorder %s718_s10, %s718_s10 }
 0x139   : > { %p4384_p5 = scmp.ne.s32.totalorder %s718_s10, %s4383_s27  ;;  %p4392_p4 = scmp.lt.s32.totalorder %s4383_s27, %s4383_s27 }
 0x13b   : > { %p4386_p7 = pnand %p4384_p5, %p4895_p8  ;;  %p4393_p11 = por %p4392_p4, %p4391_p10 }
 0x13d   : > { %p4387_p9 = pneg %p4386_p7 }
 0x13f   : > { %p4394_p12 = pnand %p4393_p11, %p4387_p9 }
 0x141   : > { %4397 = shalt.err (!%p4394_p12)
}
 0x142   : > { %s4684_s5 = smov 128   ;;  %s4685_s19 = smov 8  }
 0x143   : > { %3920 = dma.hbm_to_vmem [thread:$0]  (!%p4879_p6), %s5782_s12, 512, %s718_s10, [#allocation17], %s4684_s5, %s4684_s5, %s4685_s19  }
 0x144   : > { %s4686_s7 = smov [#allocation21]   ;;  %s4687_s21 = smov [#allocation24]  }
 0x145   : > { %s741_s8 = sshll.u32 %s4686_s7, 4  ;;  %s766_s24 = sshll.u32 %s4687_s21, 4  ;;  %s742_s8 = int_to_ptr.vmem [resolvable:$true] %s741_s8  ;;  %s5094_s24 = int_to_ptr.vmem [resolvable:$true] %s766_s24 }
 0x146   : > { %s5783_s14 = sld [smem:[#allocation56_spill]] }
 0x14c   : > { %s4398_s27 = scalar_lea.hbm %s5783_s14, 512 }
 0x14d   : > { %p4399_p13 = scmp.ne.s32.totalorder %s5783_s14, %s4398_s27  ;;  %p4405_p3 = scmp.lt.u32.totalorder %s4398_s27, %s5783_s14 }
 0x14f   : > { %p4401_p0 = pnand %p4399_p13, %p4895_p8 }
 0x151   : > { %p4402_p1 = pneg %p4401_p0 }
 0x153   : > { %p4407_p2 = pnand %p4405_p3, %p4402_p1 }
 0x155   : > { %4410 = shalt.err (!%p4407_p2)
}
 0x156   : > { %s4411_s20 = scalar_lea.vmem %s742_s8, 512  ;;  %p4419_p10 = scmp.lt.s32.totalorder %s742_s8, %s742_s8 }
 0x157   : > { %p4412_p5 = scmp.ne.s32.totalorder %s742_s8, %s4411_s20  ;;  %p4420_p4 = scmp.lt.s32.totalorder %s4411_s20, %s4411_s20 }
 0x159   : > { %p4414_p7 = pnand %p4412_p5, %p4895_p8  ;;  %p4421_p11 = por %p4420_p4, %p4419_p10 }
 0x15b   : > { %p4415_p9 = pneg %p4414_p7 }
 0x15d   : > { %p4422_p12 = pnand %p4421_p11, %p4415_p9 }
 0x15f   : > { %4425 = shalt.err (!%p4422_p12)
}
 0x160   : > { %3926 = dma.hbm_to_vmem [thread:$0]  (!%p4879_p6), %s5783_s14, 512, %s742_s8, [#allocation20], %s4684_s5, %s4684_s5, %s4685_s19  }
 0x161   : > { %s5784_s16 = sld [smem:[#allocation58_spill]] }
 0x167   : > { %s4426_s22 = scalar_lea.hbm %s5784_s16, 16 }
 0x168   : > { %p4427_p13 = scmp.ne.s32.totalorder %s5784_s16, %s4426_s22  ;;  %p4433_p3 = scmp.lt.u32.totalorder %s4426_s22, %s5784_s16 }
 0x16a   : > { %p4429_p0 = pnand %p4427_p13, %p4895_p8 }
 0x16c   : > { %p4430_p1 = pneg %p4429_p0 }
 0x16e   : > { %p4435_p2 = pnand %p4433_p3, %p4430_p1 }
 0x170   : > { %4438 = shalt.err (!%p4435_p2)
}
 0x171   : > { %s4439_s8 = scalar_lea.vmem %s5094_s24, 16  ;;  %s4446_s20 = scalar_lea.vmem %s5094_s24, 32 }
 0x172   : > { %p4440_p5 = scmp.ne.s32.totalorder %s5094_s24, %s4439_s8  ;;  %p4447_p10 = scmp.lt.s32.totalorder %s5094_s24, %s5094_s24 }
 0x173   : > { %p4448_p4 = scmp.lt.s32.totalorder %s4446_s20, %s4439_s8 }
 0x174   : > { %p4442_p7 = pnand %p4440_p5, %p4895_p8 }
 0x175   : > { %p4449_p11 = por %p4448_p4, %p4447_p10 }
 0x176   : > { %p4443_p9 = pneg %p4442_p7 }
 0x178   : > { %p4450_p12 = pnand %p4449_p11, %p4443_p9 }
 0x17a   : > { %4453 = shalt.err (!%p4450_p12)
}
 0x17b   : > { %3932 = dma.hbm_to_vmem [thread:$0]  (!%p4879_p6), %s5784_s16, 16, %s5094_s24, [#allocation23]  }
 0x17c   : > { %s4688_s7 = smov [#allocation27]   ;;  %s4454_s27 = scalar_lea.hbm %s5703_s18, 512 }
 0x17d   : > { %s787_s21 = sshll.u32 %s4688_s7, 4  ;;  %p4455_p13 = scmp.ne.s32.totalorder %s5703_s18, %s4454_s27  ;;  %s788_s21 = int_to_ptr.vmem [resolvable:$true] %s787_s21 }
 0x17e   : > { %p4461_p3 = scmp.lt.u32.totalorder %s4454_s27, %s5703_s18 }
 0x17f   : > { %p4457_p0 = pnand %p4455_p13, %p4895_p8 }
 0x181   : > { %p4458_p1 = pneg %p4457_p0 }
 0x183   : > { %p4463_p2 = pnand %p4461_p3, %p4458_p1 }
 0x185   : > { %4466 = shalt.err (!%p4463_p2)
}
 0x186   : > { %s4467_s24 = scalar_lea.vmem %s788_s21, 512  ;;  %p4475_p10 = scmp.lt.s32.totalorder %s788_s21, %s788_s21 }
 0x187   : > { %p4468_p5 = scmp.ne.s32.totalorder %s788_s21, %s4467_s24  ;;  %p4476_p4 = scmp.lt.s32.totalorder %s4467_s24, %s4467_s24 }
 0x189   : > { %p4470_p7 = pnand %p4468_p5, %p4895_p8  ;;  %p4477_p11 = por %p4476_p4, %p4475_p10 }
 0x18b   : > { %p4471_p9 = pneg %p4470_p7 }
 0x18d   : > { %p4478_p12 = pnand %p4477_p11, %p4471_p9 }
 0x18f   : > { %4481 = shalt.err (!%p4478_p12)
}
 0x190   : > { %3938 = dma.hbm_to_vmem [thread:$0]  (!%p4879_p6), %s5703_s18, 512, %s788_s21, [#allocation26], %s4684_s5, %s4684_s5, %s4685_s19  }
 0x191   : > { %s3405_s9 = sadd.s32 4294967294, %s4672_s30   ;;  %s5164_s4 = sadd.s32 1, %s4672_s30  }
 0x192   : > { %s61_s7 = sadd.s32 1, %s4668_s6  ;;  %s58_s22 = ssub.s32 %s4672_s30, %s5164_s4 }
 0x193   : > { %p68_p8 = scmp.ne.s32.totalorder %s4668_s6, %s4664_s2  ;;  %p59_p13 = scmp.eq.s32.totalorder %s58_s22, 0 }
 0x194   : > { %p69_p0 = scmp.eq.s32.totalorder %s4672_s30, 0  ;;  %p74_p1 = scmp.ne.s32.totalorder %s4664_s2, %s4660_s29 }
 0x195   : > { %p591_p3 = scmp.eq.s32.totalorder %s4861_s26, 1  ;;  %p5785_p5 = scmp.eq.s32.totalorder %s4861_s26, 0 }
 0x196   : > { %s5176_s3 = scalar_select %p59_p13, %s4668_s6, %s61_s7  }
 0x197   : > { %p70_p2 = por %p69_p0, %p68_p8  ;;  %p5180_p7 = por %p5785_p5, %p74_p1 }
 0x198   : > { %p5184_p6 = por %p591_p3, %p68_p8  ;;  %p597_p9 = scmp.eq.s32.totalorder %s3405_s9, 1 }
 0x199   : > { %s5786_s5 = scalar_select %p5180_p7, 1, 0 }
 0x19a   : > { %s5787_s19 = scalar_select %p5184_p6, 1, 0 }
 0x19b   : > { %p3966_p10 = scmp.lt.s32.totalorder %s4672_s30, 2  ;;  %s5190_s21 = sand.u32 1, %s4668_s6  }
 0x19c   : > { %p5192_p4 = por %p597_p9, %p74_p1  ;;  %s3421_s11 = sshll.u32 %s5190_s21, 3 }
 0x19d   : > { %s3422_s10 = sshll.u32 %s4672_s30, 7  ;;  %s5789_s24 = sld [smem:[#allocation42_spill]] }
 0x19e   : > { %s5788_s27 = scalar_select %p5192_p4, 1, 0 }
 0x19f   : > { %s820_s0 = scalar_lea.vmem [#allocation4], %s3421_s11  ;;  %p5203_p11 = pnand %p3966_p10, %p70_p2 }
 0x1a0   : > { %s827_s9 = sshll.u32 %s820_s0, 4  ;;  %s817_s12 = scalar_lea.sflag [#allocation5], %s5190_s21  ;;  %s5207_s9 = int_to_ptr.vmem [resolvable:$true] %s827_s9 }
 0x1a1   : > { %p4484_p8 = pneg %p5203_p11 }
 0x1a3   : > { %s5201_s13 = scalar_lea.hbm %s5789_s24, %s3422_s10  ;;  %s4487_s8 = scalar_lea.hbm %s5789_s24, 256 }
 0x1a4   : > { %s4482_s14 = scalar_lea.hbm %s5201_s13, 128  ;;  %p4488_p1 = scmp.lt.u32.totalorder %s5201_s13, %s5789_s24 }
 0x1a5   : > { %p4483_p12 = scmp.ne.s32.totalorder %s5201_s13, %s4482_s14  ;;  %p4489_p3 = scmp.lt.u32.totalorder %s4487_s8, %s4482_s14 }
 0x1a6   : > { %p4491_p5 = scmp.lt.u32.totalorder %s4482_s14, %s5201_s13 }
 0x1a7   : > { %p4485_p13 = pnand %p4484_p8, %p4483_p12  ;;  %p4490_p2 = por %p4489_p3, %p4488_p1 }
 0x1a9   : > { %p4486_p0 = pneg %p4485_p13  ;;  %p4492_p9 = por %p4491_p5, %p4490_p2 }
 0x1ab   : > { %p4493_p10 = pnand %p4492_p9, %p4486_p0 }
 0x1ad   : > { %4496 = shalt.err (!%p4493_p10)
}
 0x1ae   : > { %s4497_s22 = scalar_lea.vmem %s5207_s9, 128  ;;  %s4689_s11 = smov [#allocation4]  }
 0x1af   : > { %p4498_p12 = scmp.ne.s32.totalorder %s5207_s9, %s4497_s22  ;;  %s4502_s10 = sshll.u32 %s4689_s11, 4  ;;  %s4503_s10 = int_to_ptr.vmem [resolvable:$false] %s4502_s10 }
 0x1b0   : > { %s4504_s20 = scalar_lea.vmem %s4503_s10, 256  ;;  %p4505_p6 = scmp.lt.s32.totalorder %s5207_s9, %s4503_s10 }
 0x1b1   : > { %p4500_p13 = pnand %p4498_p12, %p4484_p8  ;;  %p4506_p1 = scmp.lt.s32.totalorder %s4504_s20, %s4497_s22 }
 0x1b3   : > { %p4501_p4 = pneg %p4500_p13  ;;  %p4507_p3 = por %p4506_p1, %p4505_p6 }
 0x1b5   : > { %p4508_p2 = pnand %p4507_p3, %p4501_p4 }
 0x1b7   : > { %4511 = shalt.err (!%p4508_p2)
}
 0x1b8   : > { %3942 = dma.hbm_to_vmem [thread:$0]  (!%p5203_p11), %s5201_s13, 128, %s5207_s9, %s817_s12  }
 0x1b9   : > { %s3423_s14 = sshll.u32 %s4672_s30, 4  ;;  %s5791_s11 = sld [smem:[#allocation44_spill]] }
 0x1ba   : > { %s845_s22 = scalar_lea.vmem [#allocation7], %s5190_s21  ;;  %s5792_s20 = sand.u32 1, %s4672_s30  }
 0x1bb   : > { %s852_s10 = sshll.u32 %s845_s22, 4  ;;  %s843_s16 = scalar_lea.sflag [#allocation8], %s5792_s20  ;;  %s853_s10 = int_to_ptr.vmem [resolvable:$true] %s852_s10 }
 0x1bf   : > { %s5240_s15 = scalar_lea.hbm %s5791_s11, %s3423_s14  ;;  %s4517_s9 = scalar_lea.hbm %s5791_s11, 32 }
 0x1c0   : > { %s4512_s17 = scalar_lea.hbm %s5240_s15, 16  ;;  %p4518_p5 = scmp.lt.u32.totalorder %s5240_s15, %s5791_s11 }
 0x1c1   : > { %p4513_p6 = scmp.ne.s32.totalorder %s5240_s15, %s4512_s17  ;;  %p4519_p9 = scmp.lt.u32.totalorder %s4517_s9, %s4512_s17 }
 0x1c2   : > { %p4521_p12 = scmp.lt.u32.totalorder %s4512_s17, %s5240_s15 }
 0x1c3   : > { %p4515_p4 = pnand %p4513_p6, %p4484_p8  ;;  %p4520_p10 = por %p4519_p9, %p4518_p5 }
 0x1c5   : > { %p4516_p0 = pneg %p4515_p4  ;;  %p4522_p13 = por %p4521_p12, %p4520_p10 }
 0x1c7   : > { %p4523_p1 = pnand %p4522_p13, %p4516_p0 }
 0x1c9   : > { %4526 = shalt.err (!%p4523_p1)
}
 0x1ca   : > { %s4527_s21 = scalar_lea.vmem %s853_s10, 16  ;;  %s4690_s0 = smov [#allocation7]  }
 0x1cb   : > { %p4528_p3 = scmp.ne.s32.totalorder %s853_s10, %s4527_s21  ;;  %s4532_s22 = sshll.u32 %s4690_s0, 4  ;;  %s4533_s22 = int_to_ptr.vmem [resolvable:$false] %s4532_s22 }
 0x1cc   : > { %s4534_s20 = scalar_lea.vmem %s4533_s22, 32  ;;  %p4535_p4 = scmp.lt.s32.totalorder %s853_s10, %s4533_s22 }
 0x1cd   : > { %p4530_p2 = pnand %p4528_p3, %p4484_p8  ;;  %p4536_p7 = scmp.lt.s32.totalorder %s4534_s20, %s4527_s21 }
 0x1cf   : > { %p4531_p6 = pneg %p4530_p2  ;;  %p4537_p5 = por %p4536_p7, %p4535_p4 }
 0x1d1   : > { %p4538_p9 = pnand %p4537_p5, %p4531_p6 }
 0x1d3   : > { %4541 = shalt.err (!%p4538_p9)
}
 0x1d4   : > { %3945 = dma.hbm_to_vmem [thread:$0]  (!%p5203_p11), %s5240_s15, 16, %s853_s10, %s843_s16  }
 0x1d5   : > { %p5793_p0 = scmp.ne.s32.totalorder %s5770_s1, 0 }
 0x1d6   : > { %s5267_s17 = sand.u32 (!%p5793_p0), 1, %s4664_s2   ;;  %p5794_p7 = scmp.ne.s32.totalorder (!%p5793_p0), %s5786_s5, 0 }
 0x1d7   : > { %861 = sbr.rel (%p5793_p0) target bundleno = 5850 (0x16da), region = 116  ;;  %s5270_s12 = sshll.u32 (!%p5793_p0), %s5267_s17, 3 }
 0x1d8   : > { %s864_s13 = scalar_lea.sflag (!%p5793_p0), [#allocation5], %s5267_s17  ;;  %s867_s9 = scalar_lea.vmem (!%p5793_p0), [#allocation4], %s5270_s12 }
 0x1de   : > { %4615 = dma.done.wait (%p5794_p7), %s864_s13, 128  }
 0x1df   : > { %4617 = vsyncadd (%p5794_p7), %s864_s13, 4294967168  ;;  %s872_s15 = sand.u32 1, %s4861_s26   ;;  %s875_s1 = scalar_lea.vmem [#allocation7], %s5267_s17 }
 0x1e0   : > { %s873_s16 = scalar_lea.sflag [#allocation8], %s872_s15 }
 0x1e1   : > { %4619 = dma.done.wait (%p5794_p7), %s873_s16, 16  }
 0x1e2   : > { %4621 = vsyncadd (%p5794_p7), %s873_s16, 4294967280  ;;  %p5795_p11 = scmp.eq.s32.totalorder %s4861_s26, 0 }
 0x1e4   : > { %4623 = dma.done.wait (%p5795_p11), [#allocation8], 128   ;;  %p5796_p8 = pmov %p5795_p11 }
 0x1e6   : > { %4625 = vsyncadd (%p5796_p8), [#allocation8], 4294967168  ;;  %p5797_p10 = pmov %p5796_p8 }
 0x1e7   : > { %p5798_p12 = pmov %p5796_p8 }
 0x1e8   : > { %4627 = dma.done.wait (%p5797_p10), [#allocation11], 32  }
 0x1e9   : > { %4629 = vsyncadd (%p5798_p12), [#allocation11], 4294967264  ;;  %p5799_p13 = pmov %p5796_p8 }
 0x1ea   : > { %p5800_p1 = pmov %p5796_p8 }
 0x1eb   : > { %4631 = dma.done.wait (%p5799_p13), [#allocation14], 32  }
 0x1ec   : > { %4633 = vsyncadd (%p5800_p1), [#allocation14], 4294967264  ;;  %p5801_p3 = pmov %p5800_p1 }
 0x1ed   : > { %p5802_p2 = pmov %p5800_p1 }
 0x1ee   : > { %4635 = dma.done.wait (%p5801_p3), [#allocation17], 528  }
 0x1ef   : > { %4637 = vsyncadd (%p5802_p2), [#allocation17], 4294966768  ;;  %p5803_p6 = pmov %p5800_p1 }
 0x1f0   : > { %p5804_p4 = pmov %p5800_p1 }
 0x1f1   : > { %4639 = dma.done.wait (%p5803_p6), [#allocation20], 528  }
 0x1f2   : > { %4641 = vsyncadd (%p5804_p4), [#allocation20], 4294966768  ;;  %p5805_p5 = pmov %p5800_p1 }
 0x1f3   : > { %p5806_p9 = pmov %p5800_p1 }
 0x1f4   : > { %4643 = dma.done.wait (%p5805_p5), [#allocation23], 32  }
 0x1f5   : > { %4645 = vsyncadd (%p5806_p9), [#allocation23], 4294967264  ;;  %p5807_p0 = pmov %p5800_p1 }
 0x1f7   : > { %4647 = dma.done.wait (%p5807_p0), [#allocation26], 528   ;;  %p5808_p7 = pmov %p5807_p0 }
 0x1f8   : > { %v4691_v0 = vmov 0.0|0.0   ;;  %vm4692_vm0 = vmmov 0   ;;  %v4693_v1 = vmov 0.0   ;;  %s5809_s10 = sld [smem:[#allocation46_spill]]  ;;  %v5333_v8 = vld [vmem:[%s867_s9] sm:$0xff]  ;;  %vm1036_vm1 = vcmask 261120  }
 0x1f9   : > { %4649 = vsyncadd (%p5808_p7), [#allocation26], 4294966768  ;;  %3761 = vmatprep.subr.bf16.mxu1 %v4691_v0  ;;  %3588 = vmatprep.mubr.msk.f32.mxu1 %vm4692_vm0, %v4693_v1  ;;  %v3444_v9 = vld [vmem:[#allocation10] ss:$0 sm:$0xff]  ;;  %s4694_s13 = smov 120   ;;  %s4695_s9 = smov 96  }
 0x1fa   : > { %3601 = vmatprep.subr.mxu0 %v4693_v1  ;;  %3603 = vmatprep.mubr.msk.f32.mxu0 %vm4692_vm0, %v4693_v1  ;;  %s5733_s15 = smov 80   ;;  %s5734_s16 = smov 88   ;;  %vm1113_vm2 = vcmask 64512   ;;  %v1016_v20 = vld [vmem:[#allocation9] sm:$0xff]  ;;  %v3443_v21 = vld [vmem:[%s875_s1] ss:$0 sm:$0xff] }
 0x1fb   : > { %s5730_s5 = smov 72   ;;  %s5738_s7 = smov 112   ;;  %v1024_v22 = vadd.f32 %v3443_v21, %v1016_v20  ;;  %vm1445_vm3 = vcmask 130112   ;;  %vm1616_vm4 = vcmask 195712   ;;  %vm1787_vm5 = vcmask 261312   ;;  %vm5463_vm6 = vmpackc.low %vm1113_vm2, %vm1113_vm2 }
 0x1fc   : > { %s5731_s14 = smov 104   ;;  %s4701_s1 = smov 56   ;;  %vm2160_vm7 = vcmask 130048   ;;  %vm3008_vm8 = vcmask 523264  }
 0x1fd   : > { %s4702_s8 = smov 64   ;;  %s4703_s21 = smov 48  }
 0x1fe   : > { %v1025_v2 = vld [vmem:[%s5809_s10] sm:$0xff]  ;;  %v1026_v3 = vld [vmem:[%s5809_s10 + $0x8] sm:$0xff]  ;;  %v1027_v4 = vld [vmem:[%s5809_s10 + $0x10] sm:$0xff]  ;;  %s4704_s0 = smov 40   ;;  %s5737_s22 = smov 8  }
 0x1ff   : > { %v3762_v5 = vpack.c.bf16 %v1026_v3, %v1025_v2  ;;  %v1028_v6 = vld [vmem:[%s5809_s10 + $0x18] sm:$0xff]  ;;  %s5736_s20 = smov 16   ;;  %p1008_p11 = scmp.lt.s32.totalorder %s4861_s26, 1 }
 0x200   : > { %v3765_v7 = vpack.c.bf16 %v1028_v6, %v1027_v4  ;;  %p5827_p10 = scmp.ne.s32.totalorder %s5787_s19, 0 }
 0x201   : > { %3763 = vmatpush3.bf16.msra.mxu1 %v3762_v5 }
 0x202   : > { %3764 = vmatprep.subr.bf16.mxu1 %v4691_v0 }
 0x205   : > { %3766 = vmatpush3.bf16.msra.mxu1 %v3765_v7 }
 0x206   : > { %3591 = vmatprep.subr.mxu1 %v4693_v1 }
 0x208   : > { %3589 = vmatmul.mubr.msk.f32.vlgmr.msra.gmra.mrb[0].mxu1 %vm1036_vm1, %v5333_v8 }
 0x209   : > { %3593 = vmatprep.mubr.msk.f32.mxu1 %vm4692_vm0, %v4693_v1 }
 0x2db   : > { %v1106_v10 = vpop.f32.mrb[0].mxu1 }
 0x2dc   : > { %v5340_v11 = vadd.f32 %v3444_v9, %v1106_v10  ;;  %v3590_v12 = vpop.f32.mrb[1].mxu1 }
 0x2de   : > { %1276 = vrot.lane.b32.xlu1 %v5340_v11, %s4694_s13  ;;  %1111 = vrot.lane.b32.xlu0 %v5340_v11, %s4695_s9 }
 0x2e2   : > { %1449 = vrot.lane.b32.xlu1 %v5340_v11, %s5733_s15  ;;  %1278 = vrot.lane.b32.xlu0 %v5340_v11, %s5734_s16  ;;  %s1009_s15 = scalar_select %p1008_p11, %s4861_s26, 1 }
 0x2e4   : > { %s3499_s16 = sshll.u32 %s1009_s15, 4  ;;  %s5821_s15 = smov 72  }
 0x2e6   : > { %1620 = vrot.lane.b32.xlu1 %v5340_v11, %s5730_s5  ;;  %1447 = vrot.lane.b32.xlu0 %v5340_v11, %s5738_s7  ;;  %s5817_s7 = smov 80   ;;  %s5822_s5 = smov 24  }
 0x2ea   : > { %1618 = vrot.lane.b32.xlu0 %v5340_v11, %s5731_s14  ;;  %s5824_s14 = sld [smem:[#allocation60_spill]] }
 0x350   : > { %v1277_v13 = vpop.permute.xlu1 %1276  ;;  %v1112_v14 = vpop.permute.xlu0 %1111 }
 0x351   : > { %3592 = vmatpush3.xpose.msk.msra.mxu1 %vm1113_vm2, %v1112_v14 }
 0x352   : > { %3596 = vmatprep.subr.mxu1 %v4693_v1 }
 0x354   : > { %3594 = vmatmul.mubr.msk.f32.vlgmr.msra.gmra.mrb[2].mxu1 %vm1113_vm2, %v5340_v11  ;;  %v1279_v15 = vpop.permute.xlu0 %1278  ;;  %v1450_v16 = vpop.permute.xlu1 %1449 }
 0x355   : > { %3602 = vmatpush3.xpose.msk.msra.mxu0 %vm1113_vm2, %v1279_v15  ;;  %3598 = vmatprep.mubr.msk.f32.mxu1 %vm4692_vm0, %v4693_v1 }
 0x356   : > { %3611 = vmatprep.subr.mxu0 %v4693_v1 }
 0x358   : > { %3604 = vmatmul.mubr.msk.f32.vlgmr.msra.gmra.mrb[0].mxu0 %vm1113_vm2, %v1277_v13  ;;  %v1448_v17 = vpop.permute.xlu0 %1447  ;;  %v1621_v18 = vpop.permute.xlu1 %1620 }
 0x359   : > { %3612 = vmatpush3.xpose.msk.msra.mxu0 %vm1113_vm2, %v1450_v16  ;;  %3613 = vmatprep.mubr.msk.f32.mxu0 %vm4692_vm0, %v4693_v1 }
 0x35a   : > { %3621 = vmatprep.subr.mxu0 %v4693_v1 }
 0x35c   : > { %3614 = vmatmul.mubr.msk.f32.vlgmr.msra.gmra.mrb[2].mxu0 %vm1113_vm2, %v1448_v17  ;;  %v1619_v19 = vpop.permute.xlu0 %1618 }
 0x35d   : > { %3622 = vmatpush3.xpose.msk.msra.mxu0 %vm1113_vm2, %v1621_v18  ;;  %3623 = vmatprep.mubr.msk.f32.mxu0 %vm4692_vm0, %v4693_v1 }
 0x35e   : > { %3767 = vmatprep.subr.bf16.mxu0 %v4691_v0 }
 0x360   : > { %3624 = vmatmul.mubr.msk.f32.vlgmr.msra.gmra.mrb[4].mxu0 %vm1113_vm2, %v1619_v19 }
 0x361   : > { %3639 = vmatprep.mubr.msk.f32.mxu0 %vm4692_vm0, %v4693_v1 }
 0x427   : > { %v1184_v23 = vpop.f32.mrb[2].mxu1 }
 0x428   : > { %v1185_v24 = vadd.f32 %v1184_v23, %v1024_v22  ;;  %v3595_v25 = vpop.f32.mrb[3].mxu1 }
 0x42a   : > { %v1188_v26 = vsel %vm1113_vm2, %v1185_v24, -inf }
 0x42b   : > { %v1350_v27 = vpop.f32.mrb[0].mxu0  ;;  %1189 = vmax.xlane.f32.xlu1 %v1188_v26 }
 0x42c   : > { %v1351_v28 = vadd.f32 %v1350_v27, %v1024_v22  ;;  %v3605_v29 = vpop.f32.mrb[1].mxu0 }
 0x42e   : > { %v1354_v30 = vsel %vm1113_vm2, %v1351_v28, -inf }
 0x42f   : > { %1355 = vmax.xlane.f32.xlu0 %v1354_v30  ;;  %v1521_v31 = vpop.f32.mrb[2].mxu0 }
 0x430   : > { %v1522_v32 = vadd.f32 %v1521_v31, %v1024_v22  ;;  %v3615_v33 = vpop.f32.mrb[3].mxu0 }
 0x432   : > { %v1525_v34 = vsel %vm1113_vm2, %v1522_v32, -inf }
 0x433   : > { %1526 = vmax.xlane.f32.xlu0 %v1525_v34  ;;  %v1692_v35 = vpop.f32.mrb[4].mxu0 }
 0x434   : > { %v1693_v36 = vadd.f32 %v1692_v35, %v1024_v22  ;;  %v3625_v37 = vpop.f32.mrb[5].mxu0 }
 0x436   : > { %v1696_v38 = vsel %vm1113_vm2, %v1693_v36, -inf }
 0x437   : > { %1697 = vmax.xlane.f32.xlu1 %v1696_v38  ;;  %v1989_v38 = vld [vmem:[#allocation18] sm:$0xff] }
 0x448   : > { %1365 = vrot.lane.b32.xlu1 %v5340_v11, %s4701_s1  ;;  %s5735_s1 = smov 24  }
 0x4b8   : > { %v1190_v39 = vpop.xlane.xlu1 %1189 }
 0x4b9   : > { %v1191_v40 = vsub.f32 %v1185_v24, %v1190_v39  ;;  %v1990_v39 = vld [vmem:[#allocation18 + $0x8] sm:$0xff] }
 0x4bb   : > { %v1192_v41 = vmul.f32 1.442695, %v1191_v40  ;;  %v3779_v40 = vpack.c.bf16 %v1990_v39, %v1989_v38 }
 0x4bc   : > { %v1356_v42 = vpop.xlane.xlu0 %1355 }
 0x4bd   : > { %4080 = vpow2.f32 %v1192_v41  ;;  %v1357_v43 = vsub.f32 %v1351_v28, %v1356_v42 }
 0x4bf   : > { %v1358_v44 = vmul.f32 1.442695, %v1357_v43 }
 0x4c0   : > { %v1527_v54 = vpop.xlane.xlu0 %1526 }
 0x4c1   : > { %4082 = vpow2.f32 %v1358_v44  ;;  %v1528_v55 = vsub.f32 %v1522_v32, %v1527_v54  ;;  %v3458_v32 = vld [vmem:[#allocation12] ss:$0 sm:$0xff] }
 0x4c3   : > { %v1529_v56 = vmul.f32 1.442695, %v1528_v55 }
 0x4c4   : > { %v1698_v45 = vpop.xlane.xlu1 %1697 }
 0x4c5   : > { %v1699_v46 = vsub.f32 %v1693_v36, %v1698_v45 }
 0x4c7   : > { %v4081_v47 = vpop.eup %4080  ;;  %v1700_v48 = vmul.f32 1.442695, %v1699_v46  ;;  %v1991_v46 = vld [vmem:[#allocation18 + $0x10] sm:$0xff] }
 0x4c8   : > { %v1194_v49 = vsel %vm1113_vm2, %v4081_v47, 0.0  ;;  %v1366_v59 = vpop.permute.xlu1 %1365 }
 0x4c9   : > { %4084 = vpow2.f32 %v1700_v48  ;;  %1195 = vadd.xlane.f32.xlu0 %v1194_v49 }
 0x4ca   : > { %4086 = vpow2.f32 %v1529_v56 }
 0x4cb   : > { %v4083_v50 = vpop.eup %4082 }
 0x4cc   : > { %v1360_v51 = vsel %vm1113_vm2, %v4083_v50, 0.0 }
 0x4cd   : > { %1361 = vadd.xlane.f32.xlu1 %v1360_v51 }
 0x4d3   : > { %v4085_v52 = vpop.eup %4084 }
 0x4d4   : > { %v1702_v53 = vsel %vm1113_vm2, %v4085_v52, 0.0  ;;  %v4087_v57 = vpop.eup %4086 }
 0x4d5   : > { %1703 = vadd.xlane.f32.xlu1 %v1702_v53  ;;  %v1531_v58 = vsel %vm1113_vm2, %v4087_v57, 0.0 }
 0x4df   : > { %1199 = vrot.lane.b32.xlu0 %v5340_v11, %s4702_s8  ;;  %s5810_s8 = sld [smem:[#allocation48_spill]] }
 0x4e5   : > { %v1790_v18 = vld [vmem:[%s5810_s8] sm:$0xff]  ;;  %v1791_v19 = vld [vmem:[%s5810_s8 + $0x8] sm:$0xff]  ;;  %v1792_v21 = vld [vmem:[%s5810_s8 + $0x10] sm:$0xff] }
 0x4e6   : > { %1536 = vrot.lane.b32.xlu1 %v5340_v11, %s4703_s21  ;;  %v3768_v20 = vpack.c.bf16 %v1791_v19, %v1790_v18  ;;  %v1793_v22 = vld [vmem:[%s5810_s8 + $0x18] sm:$0xff]  ;;  %s5811_s21 = sld [smem:[#allocation43_spill]] }
 0x4e7   : > { %v3771_v23 = vpack.c.bf16 %v1793_v22, %v1792_v21 }
 0x4e8   : > { %3769 = vmatpush3.bf16.msra.mxu0 %v3768_v20 }
 0x4e9   : > { %3770 = vmatprep.subr.bf16.mxu0 %v4691_v0 }
 0x4ec   : > { %3772 = vmatpush3.bf16.msra.mxu0 %v3771_v23 }
 0x4ed   : > { %3780 = vmatprep.subr.bf16.mxu0 %v3779_v40 }
 0x4fe   : > { %1532 = vadd.xlane.f32.xlu0 %v1531_v58 }
 0x514   : > { %1707 = vrot.lane.b32.xlu0 %v5340_v11, %s4704_s0  ;;  %s1012_s0 = scalar_lea.vmem %s5811_s21, %s3499_s16  ;;  %s1007_s16 = scalar_lea.vmem [#allocation29], %s5270_s12 }
 0x515   : > { %v1014_v48 = vld [vmem:[%s1012_s0] sm:$0xff]  ;;  %v1015_v49 = vld [vmem:[%s1012_s0 + $0x8] sm:$0xff]  ;;  %s5820_s0 = smov 16   ;;  %s3122_s21 = scalar_lea.sflag [#allocation30], %s5267_s17 }
 0x556   : > { %v1196_v60 = vpop.xlane.xlu0 %1195 }
 0x557   : > { %4088 = vrcp.f32 %v1196_v60  ;;  %v3460_v60 = vld [vmem:[#allocation13] ss:$0 sm:$0xff] }
 0x55a   : > { %v1200_v61 = vpop.permute.xlu0 %1199  ;;  %v1362_v62 = vpop.xlane.xlu1 %1361 }
 0x55b   : > { %4090 = vrcp.f32 %v1362_v62  ;;  %3597 = vmatpush3.msra.mxu1 %v1200_v61  ;;  %v3461_v62 = vld [vmem:[#allocation15] ss:$0 sm:$0xff] }
 0x55c   : > { %3606 = vmatprep.subr.mxu1 %v4693_v1 }
 0x561   : > { %v4089_v63 = vpop.eup %4088 }
 0x562   : > { %v1198_v2 = vmul.f32 %v4089_v63, %v4081_v47  ;;  %v1704_v3 = vpop.xlane.xlu1 %1703  ;;  %v1992_v47 = vld [vmem:[#allocation18 + $0x18] sm:$0xff] }
 0x564   : > { %3599 = vmatmul.mubr.msk.f32.vlgmr.msra.gmra.mrb[4].mxu1 %vm1113_vm2, %v1198_v2 }
 0x565   : > { %v4091_v4 = vpop.eup %4090  ;;  %3607 = vmatpush3.msra.mxu1 %v1366_v59  ;;  %3608 = vmatprep.mubr.msk.f32.mxu1 %vm4692_vm0, %v4693_v1 }
 0x566   : > { %v1364_v5 = vmul.f32 %v4091_v4, %v4083_v50  ;;  %v1537_v6 = vpop.permute.xlu1 %1536  ;;  %3616 = vmatprep.subr.mxu1 %v4693_v1 }
 0x568   : > { %3609 = vmatmul.mubr.msk.f32.vlgmr.msra.gmra.mrb[6].mxu1 %vm1113_vm2, %v1364_v5 }
 0x569   : > { %3617 = vmatpush3.msra.mxu1 %v1537_v6  ;;  %3618 = vmatprep.mubr.msk.f32.mxu1 %vm4692_vm0, %v4693_v1 }
 0x56a   : > { %3626 = vmatprep.subr.mxu1 %v4693_v1 }
 0x58b   : > { %v1533_v7 = vpop.xlane.xlu0 %1532 }
 0x58c   : > { %4092 = vrcp.f32 %v1533_v7 }
 0x58d   : > { %4094 = vrcp.f32 %v1704_v3  ;;  %v3464_v3 = vld [vmem:[#allocation19] ss:$0 sm:$0xff] }
 0x58f   : > { %v1708_v12 = vpop.permute.xlu0 %1707 }
 0x596   : > { %v4093_v9 = vpop.eup %4092 }
 0x597   : > { %v1535_v10 = vmul.f32 %v4093_v9, %v4087_v57  ;;  %v4095_v11 = vpop.eup %4094 }
 0x598   : > { %v1706_v13 = vmul.f32 %v4095_v11, %v4085_v52 }
 0x599   : > { %3619 = vmatmul.mubr.msk.f32.vlgmr.msra.gmra.mrb[8].mxu1 %vm1113_vm2, %v1535_v10 }
 0x59a   : > { %3627 = vmatpush3.msra.mxu1 %v1708_v12  ;;  %3628 = vmatprep.mubr.msk.f32.mxu1 %vm4692_vm0, %v4693_v1 }
 0x59b   : > { %3773 = vmatprep.subr.bf16.mxu1 %v4691_v0 }
 0x59d   : > { %3629 = vmatmul.mubr.msk.f32.vlgmr.msra.gmra.mrb[10].mxu1 %vm1113_vm2, %v1706_v13 }
 0x59e   : > { %3650 = vmatprep.mubr.msk.f32.mxu1 %vm4692_vm0, %v4693_v1 }
 0x637   : > { %v1271_v14 = vpop.f32.mrb[4].mxu1 }
 0x638   : > { %1275 = vst.msk [vmem:[#allocation2] sm:$0xff] %vm1113_vm2, %v1271_v14  ;;  %v3600_v15 = vpop.f32.mrb[5].mxu1 }
 0x639   : > { %v3462_v15 = vld [vmem:[#allocation16] ss:$0 sm:$0xff] }
 0x63b   : > { %v1437_v16 = vpop.f32.mrb[6].mxu1 }
 0x63c   : > { %1442 = vrot.lane.b32.xlu1 %v1437_v16, %s5737_s22  ;;  %v3610_v17 = vpop.f32.mrb[7].mxu1  ;;  %s5812_s22 = sld [smem:[#allocation52_spill]] }
 0x642   : > { %v1905_v50 = vld [vmem:[%s5812_s22] sm:$0xff]  ;;  %v1906_v51 = vld [vmem:[%s5812_s22 + $0x8] sm:$0xff]  ;;  %v1907_v53 = vld [vmem:[%s5812_s22 + $0x10] sm:$0xff] }
 0x643   : > { %v3774_v52 = vpack.c.bf16 %v1906_v51, %v1905_v50  ;;  %v1908_v54 = vld [vmem:[%s5812_s22 + $0x18] sm:$0xff] }
 0x644   : > { %v3777_v55 = vpack.c.bf16 %v1908_v54, %v1907_v53 }
 0x645   : > { %3775 = vmatpush3.bf16.msra.mxu1 %v3774_v52 }
 0x646   : > { %3776 = vmatprep.subr.bf16.mxu1 %v4691_v0 }
 0x649   : > { %3778 = vmatpush3.bf16.msra.mxu1 %v3777_v55 }
 0x64a   : > { %3787 = vmatprep.subr.bf16.mxu1 %v4691_v0 }
 0x66c   : > { %v1608_v24 = vpop.f32.mrb[8].mxu1 }
 0x66d   : > { %1613 = vrot.lane.b32.xlu0 %v1608_v24, %s5736_s20  ;;  %v3620_v25 = vpop.f32.mrb[9].mxu1  ;;  %s5818_s20 = smov 104  }
 0x670   : > { %v1779_v26 = vpop.f32.mrb[10].mxu1 }
 0x671   : > { %1784 = vrot.lane.b32.xlu1 %v1779_v26, %s5735_s1  ;;  %v3630_v27 = vpop.f32.mrb[11].mxu1  ;;  %s5819_s1 = smov 8  }
 0x6ae   : > { %v1443_v28 = vpop.permute.xlu1 %1442 }
 0x6af   : > { %1446 = vst.msk [vmem:[#allocation2] sm:$0xff] %vm1445_vm3, %v1443_v28 }
 0x6df   : > { %v1614_v29 = vpop.permute.xlu0 %1613 }
 0x6e0   : > { %1617 = vst.msk [vmem:[#allocation2] sm:$0xff] %vm1616_vm4, %v1614_v29 }
 0x6e3   : > { %v1785_v30 = vpop.permute.xlu1 %1784 }
 0x6e4   : > { %1788 = vst.msk [vmem:[#allocation2] sm:$0xff] %vm1787_vm5, %v1785_v30 }
 0x6eb   : > { %v1789_v31 = vld [vmem:[#allocation2] sm:$0xff] }
 0x6ec   : > { %3640 = vmatmul.mubr.msk.f32.vlgmr.msra.gmra.mrb[6].mxu0 %vm1036_vm1, %v1789_v31 }
 0x6ed   : > { %3782 = vmatpush3.bf16.msra.mxu0 %v3779_v40  ;;  %3661 = vmatprep.mubr.msk.f32.mxu0 %vm1036_vm1, %v1014_v48 }
 0x7bf   : > { %v1870_v33 = vpop.f32.mrb[6].mxu0 }
 0x7c0   : > { %v1871_v34 = vadd.f32 %v3458_v32, %v1870_v33  ;;  %v3641_v35 = vpop.f32.mrb[7].mxu0 }
 0x7c2   : > { %v1874_v36 = vadd.f32 %v1871_v34, %v5333_v8  ;;  %v3783_v8 = vpack.c.bf16 %v1992_v47, %v1991_v46 }
 0x7c4   : > { %v1875_v37 = vsel %vm1036_vm1, %v1874_v36, 0.0  ;;  %3784 = vmatprep.subr.bf16.mxu0 %v3783_v8 }
 0x7c5   : > { %1876 = vadd.xlane.f32.xlu0 %v1875_v37  ;;  %3786 = vmatpush3.bf16.msra.mxu0 %v3783_v8 }
 0x7c6   : > { %3791 = vmatprep.subr.bf16.mxu0 %v4691_v0 }
 0x7c8   : > { %3662 = vmatmul.mubr.msk.f32.vlgmr.msra.gmra.mrb[8].mxu0 %vm1036_vm1, %v1015_v49 }
 0x7c9   : > { %3675 = vmatprep.mubr.msk.f32.mxu0 %vm4692_vm0, %v4693_v1 }
 0x852   : > { %v1877_v41 = vpop.xlane.xlu0 %1876 }
 0x853   : > { %v1879_v42 = vmul.f32 0.03125, %v1877_v41 }
 0x855   : > { %v1880_v43 = vsub.f32 %v1874_v36, %v1879_v42 }
 0x857   : > { %v1881_v44 = vmul.f32 %v1880_v43, %v1880_v43 }
 0x859   : > { %v1882_v45 = vsel %vm1036_vm1, %v1881_v44, 0.0 }
 0x85a   : > { %1883 = vadd.xlane.f32.xlu1 %v1882_v45 }
 0x89b   : > { %v3663_v4 = vpop.f32.mrb[8].mxu0 }
 0x89c   : > { %v2078_v5 = vadd.f32 %v3663_v4, %v3464_v3  ;;  %v2072_v6 = vpop.f32.mrb[9].mxu0 }
 0x89d   : > { %v2073_v7 = vadd.f32 %v3464_v3, %v2072_v6 }
 0x89f   : > { %v5467_v10 = vpack.i.bf16 %v2078_v5, %v2073_v7  ;;  %v3788_v11 = vpack.c.bf16 %v2078_v5, %v2073_v7 }
 0x8a1   : > { %4046 = vrot.lane.b32.xlu0 %v5467_v10, %s4694_s13 }
 0x8e7   : > { %v1884_v56 = vpop.xlane.xlu1 %1883 }
 0x8e8   : > { %v1885_v57 = vmul.f32 0.03125, %v1884_v56 }
 0x8ea   : > { %v1886_v58 = vadd.f32 1e-05, %v1885_v57 }
 0x8ec   : > { %4096 = vrsqrt.f32 %v1886_v58 }
 0x8f6   : > { %v4097_v59 = vpop.eup %4096 }
 0x8f7   : > { %v1888_v61 = vmul.f32 %v4097_v59, %v1880_v43 }
 0x8f9   : > { %v1896_v63 = vmul.f32 %v3460_v60, %v1888_v61 }
 0x8fb   : > { %v5455_v2 = vadd.f32 %v3461_v62, %v1896_v63 }
 0x8fd   : > { %3651 = vmatmul.mubr.msk.f32.vlgmr.msra.gmra.mrb[12].mxu1 %vm1036_vm1, %v5455_v2 }
 0x8fe   : > { %3668 = vmatprep.mubr.msk.f32.mxu1 %vm4692_vm0, %v4693_v1  ;;  %3790 = vmatpush3.bf16.xpose.msk.msra.mxu1 %vm5463_vm6, %v3788_v11 }
 0x8ff   : > { %3794 = vmatprep.subr.bf16.mxu1 %v4691_v0 }
 0x913   : > { %v4047_v12 = vpop.permute.xlu0 %4046 }
 0x914   : > { %v4049_v13 = vunpack.i.h.bf16 %v4047_v12  ;;  %v4048_v14 = vunpack.i.l.bf16 %v4047_v12 }
 0x916   : > { %v3795_v17 = vpack.c.bf16 %v4049_v13, %v4048_v14 }
 0x9d0   : > { %v1985_v16 = vpop.f32.mrb[12].mxu1 }
 0x9d1   : > { %v5474_v18 = vadd.f32 %v3462_v15, %v1985_v16  ;;  %v3652_v19 = vpop.f32.mrb[13].mxu1 }
 0x9d3   : > { %2253 = vrot.lane.b32.xlu1 %v5474_v18, %s4694_s13  ;;  %3669 = vmatmul.mubr.msk.f32.vlgmr.msra.gmra.mrb[14].mxu1 %vm1113_vm2, %v5474_v18  ;;  %s5815_s13 = smov 112  }
 0x9d4   : > { %3797 = vmatpush3.bf16.xpose.msk.msra.mxu1 %vm5463_vm6, %v3795_v17  ;;  %3682 = vmatprep.mubr.msk.f32.mxu1 %vm4692_vm0, %v4693_v1 }
 0x9d5   : > { %3805 = vmatprep.subr.bf16.mxu1 %v4691_v0 }
 0xa45   : > { %v2254_v20 = vpop.permute.xlu1 %2253 }
 0xa46   : > { %3683 = vmatmul.mubr.msk.f32.vlgmr.msra.gmra.mrb[16].mxu1 %vm1113_vm2, %v2254_v20 }
 0xa47   : > { %3703 = vmatprep.mubr.msk.f32.mxu1 %vm4692_vm0, %v4693_v1 }
 0xaa6   : > { %v2156_v21 = vpop.f32.mrb[14].mxu1 }
 0xaa7   : > { %v3670_v22 = vpop.f32.mrb[15].mxu1  ;;  %v2161_v23 = vsel %vm2160_vm7, %v2156_v21, -inf }
 0xaa8   : > { %2162 = vmax.xlane.f32.xlu0 %v2161_v23 }
 0xb19   : > { %v2331_v24 = vpop.f32.mrb[16].mxu1 }
 0xb1a   : > { %v3684_v25 = vpop.f32.mrb[17].mxu1  ;;  %v2335_v26 = vsel %vm2160_vm7, %v2331_v24, -inf }
 0xb1b   : > { %2336 = vmax.xlane.f32.xlu1 %v2335_v26 }
 0xb2c   : > { %4051 = vrot.lane.b32.xlu1 %v5467_v10, %s4695_s9  ;;  %s5816_s9 = smov 88  }
 0xb30   : > { %4061 = vrot.lane.b32.xlu1 %v5467_v10, %s5815_s13 }
 0xb34   : > { %2433 = vrot.lane.b32.xlu1 %v5474_v18, %s5815_s13  ;;  %s5823_s13 = sld [smem:[#allocation61_spill]] }
 0xb35   : > { %v2163_v27 = vpop.xlane.xlu0 %2162 }
 0xb36   : > { %v2164_v28 = vsub.f32 %v2156_v21, %v2163_v27 }
 0xb38   : > { %v2165_v29 = vmul.f32 1.442695, %v2164_v28 }
 0xb3a   : > { %4098 = vpow2.f32 %v2165_v29 }
 0xb44   : > { %v4099_v30 = vpop.eup %4098 }
 0xb45   : > { %v2167_v31 = vsel %vm2160_vm7, %v4099_v30, 0.0 }
 0xb46   : > { %2168 = vadd.xlane.f32.xlu0 %v2167_v31 }
 0xba8   : > { %v2337_v32 = vpop.xlane.xlu1 %2336 }
 0xba9   : > { %v2338_v33 = vsub.f32 %v2331_v24, %v2337_v32 }
 0xbab   : > { %v2339_v34 = vmul.f32 1.442695, %v2338_v33 }
 0xbac   : > { %v4052_v35 = vpop.permute.xlu1 %4051 }
 0xbad   : > { %4100 = vpow2.f32 %v2339_v34  ;;  %v4054_v36 = vunpack.i.h.bf16 %v4052_v35  ;;  %v4053_v37 = vunpack.i.l.bf16 %v4052_v35 }
 0xbaf   : > { %v3792_v38 = vpack.c.bf16 %v4054_v36, %v4053_v37 }
 0xbb0   : > { %v4062_v48 = vpop.permute.xlu1 %4061 }
 0xbb1   : > { %3793 = vmatpush3.bf16.msra.mxu0 %v3792_v38  ;;  %v4064_v50 = vunpack.i.h.bf16 %v4062_v48  ;;  %v4063_v51 = vunpack.i.l.bf16 %v4062_v48  ;;  %v2796_v48 = vld [vmem:[#allocation21 + $0x10] sm:$0xff] }
 0xbb2   : > { %3798 = vmatprep.subr.bf16.mxu0 %v4691_v0 }
 0xbb3   : > { %v3802_v55 = vpack.c.bf16 %v4064_v50, %v4063_v51 }
 0xbb4   : > { %v2434_v56 = vpop.permute.xlu1 %2433 }
 0xbb7   : > { %v4101_v39 = vpop.eup %4100 }
 0xbb8   : > { %v2341_v40 = vsel %vm2160_vm7, %v4101_v39, 0.0 }
 0xbb9   : > { %2342 = vadd.xlane.f32.xlu0 %v2341_v40 }
 0xbcf   : > { %4056 = vrot.lane.b32.xlu0 %v5467_v10, %s5816_s9 }
 0xbd3   : > { %v2169_v41 = vpop.xlane.xlu0 %2168 }
 0xbd4   : > { %4102 = vrcp.f32 %v2169_v41 }
 0xbde   : > { %v4103_v42 = vpop.eup %4102 }
 0xbdf   : > { %v2171_v43 = vmul.f32 %v4103_v42, %v4099_v30 }
 0xbe1   : > { %2172 = vst.msk [vmem:[#allocation3] sm:$0xff] %vm2160_vm7, %v2171_v43  ;;  %3676 = vmatmul.mubr.msk.f32.vlgmr.msra.gmra.mrb[10].mxu0 %vm2160_vm7, %v2171_v43 }
 0xbe2   : > { %3689 = vmatprep.mubr.msk.f32.mxu0 %vm4692_vm0, %v4693_v1 }
 0xbe8   : > { %v2346_v53 = vld [vmem:[#allocation3] sm:$0xff] }
 0xc46   : > { %v2343_v44 = vpop.xlane.xlu0 %2342 }
 0xc47   : > { %4104 = vrcp.f32 %v2343_v44 }
 0xc4a   : > { %v4057_v45 = vpop.permute.xlu0 %4056 }
 0xc4b   : > { %v4059_v46 = vunpack.i.h.bf16 %v4057_v45  ;;  %v4058_v47 = vunpack.i.l.bf16 %v4057_v45 }
 0xc4d   : > { %v3799_v8 = vpack.c.bf16 %v4059_v46, %v4058_v47  ;;  %v2794_v46 = vld [vmem:[#allocation21] sm:$0xff]  ;;  %v2795_v47 = vld [vmem:[#allocation21 + $0x8] sm:$0xff] }
 0xc4f   : > { %3800 = vmatpush3.bf16.msra.mxu0 %v3799_v8  ;;  %v3816_v8 = vpack.c.bf16 %v2795_v47, %v2794_v46 }
 0xc50   : > { %3801 = vmatprep.subr.bf16.mxu0 %v4691_v0 }
 0xc51   : > { %v4105_v49 = vpop.eup %4104 }
 0xc52   : > { %v2345_v52 = vmul.f32 %v4105_v49, %v4101_v39  ;;  %v2797_v49 = vld [vmem:[#allocation21 + $0x18] sm:$0xff] }
 0xc53   : > { %v3819_v50 = vpack.c.bf16 %v2797_v49, %v2796_v48 }
 0xc54   : > { %v2347_v54 = vadd.f32 %v2346_v53, %v2345_v52  ;;  %3690 = vmatmul.mubr.msk.f32.vlgmr.msra.gmra.mrb[12].mxu0 %vm2160_vm7, %v2345_v52 }
 0xc55   : > { %3696 = vmatprep.mubr.msk.f32.mxu0 %vm4692_vm0, %v4693_v1 }
 0xc56   : > { %2348 = vst.msk [vmem:[#allocation3] sm:$0xff] %vm2160_vm7, %v2347_v54 }
 0xc58   : > { %3804 = vmatpush3.bf16.xpose.msk.msra.mxu0 %vm5463_vm6, %v3802_v55  ;;  %v3483_v55 = vld [vmem:[#allocation22] ss:$0 sm:$0xff] }
 0xc59   : > { %3812 = vmatprep.subr.bf16.mxu0 %v4691_v0 }
 0xc5d   : > { %v2526_v21 = vld [vmem:[#allocation3] sm:$0xff] }
 0xc5f   : > { %3697 = vmatmul.mubr.msk.f32.vlgmr.msra.gmra.mrb[14].mxu0 %vm1113_vm2, %v2434_v56 }
 0xc60   : > { %3717 = vmatprep.mubr.msk.f32.mxu0 %vm4692_vm0, %v4693_v1 }
 0xcb4   : > { %v2248_v57 = vpop.f32.mrb[10].mxu0 }
 0xcb5   : > { %2252 = vst.msk [vmem:[#allocation2] sm:$0xff] %vm1113_vm2, %v2248_v57  ;;  %v3677_v58 = vpop.f32.mrb[11].mxu0 }
 0xd27   : > { %v2424_v59 = vpop.f32.mrb[12].mxu0 }
 0xd28   : > { %v3691_v60 = vpop.f32.mrb[13].mxu0 }
 0xd32   : > { %v2511_v61 = vpop.f32.mrb[14].mxu0 }
 0xd33   : > { %v3698_v62 = vpop.f32.mrb[15].mxu0  ;;  %v2515_v63 = vsel %vm2160_vm7, %v2511_v61, -inf }
 0xd34   : > { %2516 = vmax.xlane.f32.xlu0 %v2515_v63 }
 0xd4a   : > { %4066 = vrot.lane.b32.xlu0 %v5467_v10, %s5817_s7  ;;  %s5825_s7 = sld [smem:[#allocation62_spill]] }
 0xd4e   : > { %2613 = vrot.lane.b32.xlu0 %v5474_v18, %s5818_s20 }
 0xdc1   : > { %v2517_v3 = vpop.xlane.xlu0 %2516 }
 0xdc2   : > { %v2518_v4 = vsub.f32 %v2511_v61, %v2517_v3 }
 0xdc4   : > { %v2519_v5 = vmul.f32 1.442695, %v2518_v4 }
 0xdc5   : > { %v4067_v6 = vpop.permute.xlu0 %4066 }
 0xdc6   : > { %4106 = vpow2.f32 %v2519_v5  ;;  %v4069_v7 = vunpack.i.h.bf16 %v4067_v6  ;;  %v4068_v11 = vunpack.i.l.bf16 %v4067_v6  ;;  %v2908_v5 = vld [vmem:[#allocation27] sm:$0xff]  ;;  %v2909_v6 = vld [vmem:[#allocation27 + $0x8] sm:$0xff] }
 0xdc8   : > { %v3806_v12 = vpack.c.bf16 %v4069_v7, %v4068_v11  ;;  %v3822_v7 = vpack.c.bf16 %v2909_v6, %v2908_v5  ;;  %v2911_v11 = vld [vmem:[#allocation27 + $0x18] sm:$0xff] }
 0xdc9   : > { %v2614_v24 = vpop.permute.xlu0 %2613 }
 0xdca   : > { %3807 = vmatpush3.bf16.msra.mxu1 %v3806_v12 }
 0xdcb   : > { %3808 = vmatprep.subr.bf16.mxu1 %v4691_v0 }
 0xdd0   : > { %v4107_v13 = vpop.eup %4106 }
 0xdd1   : > { %v2521_v14 = vsel %vm2160_vm7, %v4107_v13, 0.0 }
 0xdd2   : > { %2522 = vadd.xlane.f32.xlu1 %v2521_v14  ;;  %v2995_v14 = vld [vmem:[%s5823_s13 + $0x10] sm:$0xff] }
 0xde3   : > { %4071 = vrot.lane.b32.xlu1 %v5467_v10, %s5818_s20  ;;  %s5742_s20 = sshll.u32 %s4861_s26, 7 }
 0xe5f   : > { %v2523_v15 = vpop.xlane.xlu1 %2522 }
 0xe60   : > { %4108 = vrcp.f32 %v2523_v15 }
 0xe63   : > { %v4072_v16 = vpop.permute.xlu1 %4071 }
 0xe64   : > { %v4074_v17 = vunpack.i.h.bf16 %v4072_v16  ;;  %v4073_v18 = vunpack.i.l.bf16 %v4072_v16  ;;  %v2996_v16 = vld [vmem:[%s5823_s13 + $0x18] sm:$0xff] }
 0xe66   : > { %v3809_v22 = vpack.c.bf16 %v4074_v17, %v4073_v18  ;;  %v3831_v17 = vpack.c.bf16 %v2996_v16, %v2995_v14  ;;  %v2997_v18 = vld [vmem:[%s5823_s13 + $0x20] sm:$0xff] }
 0xe6a   : > { %v4109_v19 = vpop.eup %4108 }
 0xe6b   : > { %v2525_v20 = vmul.f32 %v4109_v19, %v4107_v13  ;;  %v2994_v13 = vld [vmem:[%s5823_s13 + $0x8] sm:$0xff] }
 0xe6c   : > { %v2998_v19 = vld [vmem:[%s5823_s13 + $0x28] sm:$0xff] }
 0xe6d   : > { %v2527_v23 = vadd.f32 %v2526_v21, %v2525_v20  ;;  %3704 = vmatmul.mubr.msk.f32.vlgmr.msra.gmra.mrb[18].mxu1 %vm2160_vm7, %v2525_v20  ;;  %v3834_v20 = vpack.c.bf16 %v2998_v19, %v2997_v18 }
 0xe6e   : > { %3811 = vmatpush3.bf16.xpose.msk.msra.mxu1 %vm5463_vm6, %v3809_v22  ;;  %3710 = vmatprep.mubr.msk.f32.mxu1 %vm4692_vm0, %v4693_v1 }
 0xe6f   : > { %2528 = vst.msk [vmem:[#allocation3] sm:$0xff] %vm2160_vm7, %v2527_v23  ;;  %3821 = vmatprep.subr.bf16.mxu1 %v4691_v0 }
 0xe75   : > { %3711 = vmatmul.mubr.msk.f32.vlgmr.msra.gmra.mrb[20].mxu1 %vm1113_vm2, %v2614_v24 }
 0xe76   : > { %3739 = vmatprep.mubr.msk.f32.mxu1 %vm4692_vm0, %v4693_v1  ;;  %v2706_v43 = vld [vmem:[#allocation3] sm:$0xff]  ;;  %3823 = vmatpush3.bf16.msra.mxu1 %v3822_v7 }
 0xe77   : > { %3824 = vmatprep.subr.bf16.mxu1 %v4691_v0 }
 0xf40   : > { %v2604_v25 = vpop.f32.mrb[18].mxu1 }
 0xf41   : > { %v3705_v26 = vpop.f32.mrb[19].mxu1 }
 0xf48   : > { %v2691_v27 = vpop.f32.mrb[20].mxu1 }
 0xf49   : > { %v3712_v28 = vpop.f32.mrb[21].mxu1  ;;  %v2695_v9 = vsel %vm2160_vm7, %v2691_v27, -inf }
 0xf4a   : > { %2696 = vmax.xlane.f32.xlu1 %v2695_v9 }
 0xf5b   : > { %2429 = vrot.lane.b32.xlu1 %v2424_v59, %s5819_s1 }
 0xf5f   : > { %2609 = vrot.lane.b32.xlu1 %v2604_v25, %s5820_s0  ;;  %v3485_v25 = vld [vmem:[#allocation24] ss:$0 sm:$0xff] }
 0xfd7   : > { %v2697_v29 = vpop.xlane.xlu1 %2696 }
 0xfd8   : > { %v2698_v30 = vsub.f32 %v2691_v27, %v2697_v29  ;;  %v3486_v27 = vld [vmem:[#allocation25] ss:$0 sm:$0xff]  ;;  %v2999_v29 = vld [vmem:[%s5823_s13 + $0x30] sm:$0xff] }
 0xfda   : > { %v2699_v31 = vmul.f32 1.442695, %v2698_v30 }
 0xfdb   : > { %v2430_v32 = vpop.permute.xlu1 %2429 }
 0xfdc   : > { %4110 = vpow2.f32 %v2699_v31  ;;  %2432 = vst.msk [vmem:[#allocation2] sm:$0xff] %vm1445_vm3, %v2430_v32  ;;  %v3487_v31 = vld [vmem:[%s5824_s14] ss:$0 sm:$0xff]  ;;  %s3148_s14 = sshll.u32 %s1007_s16, 4  ;;  %s3149_s14 = int_to_ptr.vmem [resolvable:$true] %s3148_s14 }
 0xfdd   : > { %s4542_s9 = scalar_lea.vmem %s3149_s14, 128 }
 0xfde   : > { %p4543_p8 = scmp.ne.s32.totalorder %s3149_s14, %s4542_s9 }
 0xfdf   : > { %v2610_v33 = vpop.permute.xlu1 %2609 }
 0xfe0   : > { %2612 = vst.msk [vmem:[#allocation2] sm:$0xff] %vm1616_vm4, %v2610_v33  ;;  %p4544_p12 = pnand %p4543_p8, %p5827_p10 }
 0xfe2   : > { %p4545_p13 = pneg %p4544_p12 }
 0xfe6   : > { %v4111_v34 = vpop.eup %4110 }
 0xfe7   : > { %v2701_v35 = vsel %vm2160_vm7, %v4111_v34, 0.0 }
 0xfe8   : > { %2702 = vadd.xlane.f32.xlu0 %v2701_v35 }
 0xffe   : > { %4076 = vrot.lane.b32.xlu0 %v5467_v10, %s5821_s15  ;;  %s5826_s15 = sld [smem:[#allocation66_spill]] }
0x1075   : > { %v2703_v36 = vpop.xlane.xlu0 %2702 }
0x1076   : > { %4112 = vrcp.f32 %v2703_v36  ;;  %v3489_v36 = vld [vmem:[%s5825_s7] ss:$0 sm:$0xff]  ;;  %s4708_s7 = smov [#allocation29]  }
0x1077   : > { %s4546_s8 = sshll.u32 %s4708_s7, 4  ;;  %s4547_s8 = int_to_ptr.vmem [resolvable:$false] %s4546_s8 }
0x1078   : > { %s4548_s10 = scalar_lea.vmem %s4547_s8, 256  ;;  %p4549_p1 = scmp.lt.s32.totalorder %s3149_s14, %s4547_s8 }
0x1079   : > { %v4077_v37 = vpop.permute.xlu0 %4076  ;;  %p4550_p3 = scmp.lt.s32.totalorder %s4548_s10, %s4542_s9 }
0x107a   : > { %v4079_v38 = vunpack.i.h.bf16 %v4077_v37  ;;  %v4078_v39 = vunpack.i.l.bf16 %v4077_v37 }
0x107b   : > { %p4551_p2 = por %p4550_p3, %p4549_p1 }
0x107c   : > { %v3813_v40 = vpack.c.bf16 %v4079_v38, %v4078_v39 }
0x107d   : > { %p4552_p6 = pnand %p4551_p2, %p4545_p13 }
0x107e   : > { %3814 = vmatpush3.bf16.msra.mxu0 %v3813_v40 }
0x107f   : > { %3815 = vmatprep.subr.bf16.mxu0 %v4691_v0 }
0x1080   : > { %v4113_v41 = vpop.eup %4112 }
0x1081   : > { %v2705_v42 = vmul.f32 %v4113_v41, %v4111_v34 }
0x1083   : > { %v2707_v44 = vadd.f32 %v2706_v43, %v2705_v42  ;;  %3718 = vmatmul.mubr.msk.f32.vlgmr.msra.gmra.mrb[16].mxu0 %vm2160_vm7, %v2705_v42 }
0x1084   : > { %3728 = vmatprep.mubr.msk.f32.mxu0 %vm4692_vm0, %v4693_v1  ;;  %3817 = vmatpush3.bf16.msra.mxu0 %v3816_v8 }
0x1085   : > { %2708 = vst.msk [vmem:[#allocation3] sm:$0xff] %vm2160_vm7, %v2707_v44  ;;  %3818 = vmatprep.subr.bf16.mxu0 %v4691_v0 }
0x1088   : > { %3820 = vmatpush3.bf16.msra.mxu0 %v3819_v50 }
0x1089   : > { %3827 = vmatprep.subr.bf16.mxu0 %v4691_v0 }
0x108c   : > { %v3113_v10 = vld [vmem:[#allocation3] sm:$0xff] }
0x108d   : > { %v3114_v45 = vmul.f32 0.25, %v3113_v10 }
0x108f   : > { %3115 = vst.msk [vmem:[%s1007_s16] sm:$0xff] %vm2160_vm7, %v3114_v45 }
0x1156   : > { %v2784_v51 = vpop.f32.mrb[16].mxu0 }
0x1157   : > { %2789 = vrot.lane.b32.xlu0 %v2784_v51, %s5822_s5  ;;  %v3719_v52 = vpop.f32.mrb[17].mxu0  ;;  %s5606_s5 = scalar_lea.hbm %s5826_s15, %s5742_s20 }
0x11c9   : > { %v2790_v53 = vpop.permute.xlu0 %2789 }
0x11ca   : > { %2792 = vst.msk [vmem:[#allocation2] sm:$0xff] %vm1787_vm5, %v2790_v53 }
0x11d1   : > { %v2793_v54 = vld [vmem:[#allocation2] sm:$0xff] }
0x11d2   : > { %3729 = vmatmul.mubr.msk.f32.vlgmr.msra.gmra.mrb[18].mxu0 %vm1036_vm1, %v2793_v54 }
0x11d3   : > { %3758 = vmatprep.mubr.msk.f32.mxu0 %vm4692_vm0, %v4693_v1  ;;  %v2910_v1 = vld [vmem:[#allocation27 + $0x10] sm:$0xff] }
0x11d4   : > { %v3825_v12 = vpack.c.bf16 %v2911_v11, %v2910_v1 }
0x11d6   : > { %3826 = vmatpush3.bf16.msra.mxu1 %v3825_v12 }
0x12a5   : > { %v2874_v56 = vpop.f32.mrb[18].mxu0 }
0x12a6   : > { %v2875_v57 = vadd.f32 %v3483_v55, %v2874_v56  ;;  %v3730_v58 = vpop.f32.mrb[19].mxu0 }
0x12a8   : > { %v2878_v59 = vadd.f32 %v2875_v57, %v5455_v2  ;;  %v2993_v2 = vld [vmem:[%s5823_s13] sm:$0xff] }
0x12a9   : > { %v3828_v15 = vpack.c.bf16 %v2994_v13, %v2993_v2 }
0x12aa   : > { %v2879_v60 = vsel %vm1036_vm1, %v2878_v59, 0.0 }
0x12ab   : > { %2880 = vadd.xlane.f32.xlu1 %v2879_v60  ;;  %3829 = vmatpush3.bf16.msra.mxu0 %v3828_v15 }
0x12ac   : > { %3830 = vmatprep.subr.bf16.mxu0 %v4691_v0 }
0x12af   : > { %3832 = vmatpush3.bf16.msra.mxu0 %v3831_v17 }
0x12b0   : > { %3833 = vmatprep.subr.bf16.mxu0 %v4691_v0 }
0x12b3   : > { %3835 = vmatpush3.bf16.msra.mxu0 %v3834_v20 }
0x12b4   : > { %3836 = vmatprep.subr.bf16.mxu0 %v4691_v0  ;;  %v3000_v0 = vld [vmem:[%s5823_s13 + $0x38] sm:$0xff] }
0x12b5   : > { %v3837_v30 = vpack.c.bf16 %v3000_v0, %v2999_v29 }
0x12b7   : > { %3838 = vmatpush3.bf16.msra.mxu0 %v3837_v30 }
0x1338   : > { %v2881_v61 = vpop.xlane.xlu1 %2880 }
0x1339   : > { %v2882_v62 = vmul.f32 0.03125, %v2881_v61 }
0x133b   : > { %v2883_v63 = vsub.f32 %v2878_v59, %v2882_v62 }
0x133d   : > { %v2884_v3 = vmul.f32 %v2883_v63, %v2883_v63 }
0x133f   : > { %v2885_v4 = vsel %vm1036_vm1, %v2884_v3, 0.0 }
0x1340   : > { %2886 = vadd.xlane.f32.xlu0 %v2885_v4 }
0x13cd   : > { %v2887_v21 = vpop.xlane.xlu0 %2886 }
0x13ce   : > { %v2888_v22 = vmul.f32 0.03125, %v2887_v21 }
0x13d0   : > { %v2889_v23 = vadd.f32 1e-05, %v2888_v22 }
0x13d2   : > { %4114 = vrsqrt.f32 %v2889_v23 }
0x13dc   : > { %v4115_v24 = vpop.eup %4114 }
0x13dd   : > { %v2891_v26 = vmul.f32 %v4115_v24, %v2883_v63 }
0x13df   : > { %v2899_v28 = vmul.f32 %v3485_v25, %v2891_v26 }
0x13e1   : > { %v2907_v9 = vadd.f32 %v3486_v27, %v2899_v28 }
0x13e3   : > { %3740 = vmatmul.mubr.msk.f32.vlgmr.msra.gmra.mrb[22].mxu1 %vm1036_vm1, %v2907_v9 }
0x14b6   : > { %v2988_v32 = vpop.f32.mrb[22].mxu1 }
0x14b7   : > { %v2989_v33 = vadd.f32 %v3487_v31, %v2988_v32  ;;  %v3741_v34 = vpop.f32.mrb[23].mxu1 }
0x14b9   : > { %v2992_v35 = vmax.f32 %v2989_v33, 0.0 }
0x14bb   : > { %3759 = vmatmul.mubr.msk.f32.vlgmr.msra.gmra.mrb[20].mxu0 %vm3008_vm8, %v2992_v35 }
0x158e   : > { %v3078_v37 = vpop.f32.mrb[20].mxu0 }
0x158f   : > { %v3079_v38 = vadd.f32 %v3489_v36, %v3078_v37  ;;  %v3760_v39 = vpop.f32.mrb[21].mxu0 }
0x1591   : > { %v3082_v40 = vadd.f32 %v3079_v38, %v2907_v9 }
0x1593   : > { %v3083_v41 = vsel %vm1036_vm1, %v3082_v40, 0.0 }
0x1594   : > { %3084 = vadd.xlane.f32.xlu0 %v3083_v41 }
0x1621   : > { %v3085_v42 = vpop.xlane.xlu0 %3084 }
0x1622   : > { %v3086_v43 = vmul.f32 0.03125, %v3085_v42 }
0x1624   : > { %v3087_v44 = vsub.f32 %v3082_v40, %v3086_v43 }
0x1626   : > { %v3088_v10 = vmul.f32 %v3087_v44, %v3087_v44 }
0x1628   : > { %v3089_v45 = vsel %vm1036_vm1, %v3088_v10, 0.0 }
0x1629   : > { %3090 = vadd.xlane.f32.xlu1 %v3089_v45 }
0x162a   : > { %4555 = shalt.err (!%p4552_p6)
}
0x162b   : > { %s4556_s16 = scalar_lea.hbm %s5606_s5, 128  ;;  %s4560_s7 = scalar_lea.hbm %s5826_s15, 256 }
0x162c   : > { %p4557_p4 = scmp.ne.s32.totalorder %s5606_s5, %s4556_s16  ;;  %p4561_p0 = scmp.lt.u32.totalorder %s5606_s5, %s5826_s15 }
0x162d   : > { %p4562_p7 = scmp.lt.u32.totalorder %s4560_s7, %s4556_s16  ;;  %p4564_p8 = scmp.lt.u32.totalorder %s4556_s16, %s5606_s5 }
0x162e   : > { %p4558_p5 = pnand %p4557_p4, %p5827_p10 }
0x162f   : > { %p4563_p11 = por %p4562_p7, %p4561_p0 }
0x1630   : > { %p4559_p9 = pneg %p4558_p5 }
0x1631   : > { %p4565_p12 = por %p4564_p8, %p4563_p11 }
0x1633   : > { %p4566_p13 = pnand %p4565_p12, %p4559_p9 }
0x1635   : > { %4569 = shalt.err (!%p4566_p13)
}
0x1636   : > { %3896 = dma.vmem_to_hbm [thread:$0]  (%p5827_p10), %s3149_s14, 128, %s5606_s5, %s3122_s21  }
0x1637   : > { %s5828_s9 = sld [smem:[#allocation63_spill]]  ;;  %s5829_s0 = sld [smem:[#allocation64_spill]] }
0x1638   : > { %s1000_s7 = scalar_lea.vmem [#allocation28], %s5270_s12  ;;  %s5830_s5 = sshll.u32 %s4861_s26, 7 }
0x1639   : > { %s3135_s8 = sshll.u32 %s1000_s7, 4  ;;  %s5831_s11 = sld [smem:[#allocation65_spill]]  ;;  %s5642_s8 = int_to_ptr.vmem [resolvable:$true] %s3135_s8 }
0x163a   : > { %s3117_s10 = scalar_lea.sflag [#allocation6], %s5267_s17  ;;  %s4570_s20 = scalar_lea.vmem %s5642_s8, 128 }
0x163b   : > { %p4571_p1 = scmp.ne.s32.totalorder %s5642_s8, %s4570_s20  ;;  %s4709_s12 = smov [#allocation28]  }
0x163c   : > { %s4574_s26 = sshll.u32 %s4709_s12, 4  ;;  %s4575_s26 = int_to_ptr.vmem [resolvable:$false] %s4574_s26 }
0x163d   : > { %v3491_v49 = vld [vmem:[%s5828_s9] ss:$0 sm:$0xff]  ;;  %p4572_p3 = pnand %p4571_p1, %p5827_p10  ;;  %s4576_s9 = scalar_lea.vmem %s4575_s26, 256 }
0x163e   : > { %v3492_v51 = vld [vmem:[%s5829_s0] ss:$0 sm:$0xff]  ;;  %p4577_p6 = scmp.lt.s32.totalorder %s5642_s8, %s4575_s26  ;;  %p4578_p4 = scmp.lt.s32.totalorder %s4576_s9, %s4570_s20 }
0x163f   : > { %s5640_s13 = scalar_lea.hbm %s5831_s11, %s5830_s5  ;;  %p4573_p2 = pneg %p4572_p3 }
0x1640   : > { %p4579_p5 = por %p4578_p4, %p4577_p6 }
0x1642   : > { %p4580_p9 = pnand %p4579_p5, %p4573_p2 }
0x16b6   : > { %v3091_v46 = vpop.xlane.xlu1 %3090 }
0x16b7   : > { %v3092_v47 = vmul.f32 0.03125, %v3091_v46 }
0x16b9   : > { %v3093_v8 = vadd.f32 1e-05, %v3092_v47 }
0x16bb   : > { %4116 = vrsqrt.f32 %v3093_v8 }
0x16c5   : > { %v4117_v48 = vpop.eup %4116 }
0x16c6   : > { %v3095_v50 = vmul.f32 %v4117_v48, %v3087_v44 }
0x16c8   : > { %v3103_v52 = vmul.f32 %v3491_v49, %v3095_v50 }
0x16ca   : > { %v3111_v53 = vadd.f32 %v3492_v51, %v3103_v52 }
0x16cc   : > { %3112 = vst.msk [vmem:[%s1000_s7] sm:$0xff] %vm1036_vm1, %v3111_v53 }
0x16cd   : > { %4583 = shalt.err (!%p4580_p9)
}
0x16ce   : > { %s4584_s17 = scalar_lea.hbm %s5640_s13, 128  ;;  %s4588_s0 = scalar_lea.hbm %s5831_s11, 256 }
0x16cf   : > { %p4585_p0 = scmp.ne.s32.totalorder %s5640_s13, %s4584_s17  ;;  %p4589_p8 = scmp.lt.u32.totalorder %s5640_s13, %s5831_s11 }
0x16d0   : > { %p4590_p12 = scmp.lt.u32.totalorder %s4588_s0, %s4584_s17  ;;  %p4592_p1 = scmp.lt.u32.totalorder %s4584_s17, %s5640_s13 }
0x16d1   : > { %p4586_p7 = pnand %p4585_p0, %p5827_p10 }
0x16d2   : > { %p4591_p13 = por %p4590_p12, %p4589_p8 }
0x16d3   : > { %p4587_p11 = pneg %p4586_p7 }
0x16d4   : > { %p4593_p3 = por %p4592_p1, %p4591_p13 }
0x16d6   : > { %p4594_p2 = pnand %p4593_p3, %p4587_p11 }
0x16d8   : > { %4597 = shalt.err (!%p4594_p2)
}
0x16d9   : > { %3895 = dma.vmem_to_hbm [thread:$0]  (%p5827_p10), %s5642_s8, 128, %s5640_s13, %s3117_s10  }
0x16da PF: > { %s3160_s14 = sand.u32 1, %s4660_s29   ;;  %p5832_p6 = scmp.ne.s32.totalorder %s5788_s27, 0 }
0x16db   : > { %p5833_p4 = scmp.ge.s32.totalorder %s4672_s30, 2  ;;  %s3161_s21 = scalar_lea.sflag [#allocation6], %s3160_s14 }
0x16dd   : > { %p3947_p5 = pnand %p5833_p4, %p5832_p6 }
0x16df   : > { %4651 = dma.done.wait (!%p3947_p5), %s3161_s21, 128  }
0x16e0   : > { %4653 = vsyncadd (!%p3947_p5), %s3161_s21, 4294967168  ;;  %s3170_s20 = scalar_lea.sflag [#allocation30], %s3160_s14 }
0x16e1   : > { %4655 = dma.done.wait (!%p3947_p5), %s3170_s20, 128  }
0x16e2   : > { %4657 = vsyncadd (!%p3947_p5), %s3170_s20, 4294967168  ;;  %p51_p10 = scmp.ge.s32.totalorder %s5164_s4, 4   ;;  %s5834_s29 = smov %s4664_s2 }
0x16e3   : > { %s5835_s2 = smov %s4668_s6  ;;  %s5836_s6 = smov %s5176_s3 }
0x16e4   : > { %s5837_s30 = smov %s5164_s4  ;;  %53 = sbr.rel (!%p51_p10) target bundleno = 41 (0x29), region = 246 }
0x16eb   :  { %3175 = vsyncpa [#allocation5], 1 }
0x16ec   :  { %3177 = vsyncpa [#allocation5 + $0x1], 1 }
0x16ed   :  { %3178 = vsyncpa [#allocation8], 1 }
0x16ee   :  { %3180 = vsyncpa [#allocation8 + $0x1], 1 }
0x16ef   :  { %3181 = vsyncpa [#allocation11], 1 }
0x16f0   :  { %3182 = vsyncpa [#allocation14], 1 }
0x16f1   :  { %3183 = vsyncpa [#allocation17], 1 }
0x16f2   :  { %3184 = vsyncpa [#allocation20], 1 }
0x16f3   :  { %3185 = vsyncpa [#allocation23], 1 }
0x16f4   :  { %3186 = vsyncpa [#allocation26], 1 }
0x16f5   :  { %3187 = vsyncpa [#allocation6], 1 }
0x16f6   :  { %3189 = vsyncpa [#allocation6 + $0x1], 1 }
0x16f7   :  { %3190 = vsyncpa [#allocation30], 1 }
0x16f8   :  { %3192 = vsyncpa [#allocation30 + $0x1], 1 }

</bundles_post_ra>
